<compile_context>
chip_gen: v5e
topology: v5e:2x2
jax: 0.10.0
libtpu: 0.0.40
codegen_flags: <defaults>
</compile_context>

<pallas_src>
import jax
import jax.numpy as jnp
from jax import lax
from jax.experimental import pallas as pl
from jax.experimental.pallas import tpu as pltpu

FEATURE_DIM = 8
CP = 128  # lane-padded channel width used for every conv layer in-kernel


def _round_up(x, m):
    return ((x + m - 1) // m) * m


# ----------------------------------------------------------------------------
# Fused kernel factory
# ----------------------------------------------------------------------------
def make_fused_kernel(Bt, H, W, n_layers):
    """Fused forward kernel for Bt images per grid step.

    Activation layout: per image, zero-padded row-flattened slabs
    ((Hl+2)*(Wl+2), 128) stacked along the row axis for Bt images; conv tap
    (ky,kx) is then the contiguous row slice starting at ky*(Wl+2)+kx, and one
    slice spans all Bt images at once (each image keeps its own zero borders).
    """
    geom = []
    h, w = H, W
    for _ in range(n_layers):
        geom.append((h, w))
        h, w = h // 2, w // 2
    HF, WF = h, w                               # final spatial size (1x1 here)
    S1 = _round_up(H * (W + 2) - 2, 8)          # layer-1 per-image row stride

    def kernel(*refs):
        x_ref, f_ref = refs[0], refs[1]
        idx = 2
        conv_w, conv_b = [], []
        for _ in range(n_layers):
            conv_w.append(refs[idx]); conv_b.append(refs[idx + 1]); idx += 2
        w1a, w1b, hb1, hw2, hb2, hw3, hb3 = refs[idx:idx + 7]
        idx += 7
        o_ref = refs[idx]; idx += 1
        conv_s = [refs[idx]]; idx += 1
        pad_s = []
        for _ in range(1, n_layers):
            pad_s.append(refs[idx]); conv_s.append(refs[idx + 1]); idx += 2
        pool_s, feat_s = refs[idx], refs[idx + 1]

        zero2 = jnp.zeros((2, CP), jnp.float32)

        for l in range(n_layers):
            Hl, Wl = geom[l]
            Wp = Wl + 2
            HP, WP = Hl // 2, Wl // 2
            HPWp = HP * Wp
            cs = conv_s[l]

            # ------------- conv3x3 (SAME) + bias + ReLU -------------
            if l == 0:
                # Taps already folded into the contraction dim (prologue):
                # one (rows, 18) @ (18, 128) matmul, chunked over rows.
                Sl = S1
                M = Bt * S1
                TC = 128
                for c0 in range(0, M, TC):
                    r = min(TC, M - c0)
                    y = jnp.dot(x_ref[c0:c0 + r, :], conv_w[0][...],
                                preferred_element_type=jnp.float32)
                    cs[c0:c0 + r, :] = jnp.maximum(y + conv_b[0][...], 0.0)
            else:
                # 9 tap matmuls over the whole stacked slab, row-chunked so the
                # accumulator stays in registers (maps to MXU accumulation).
                Sl = (Hl + 2) * Wp
                M = Bt * Sl - (2 * Wp + 2)
                pin = pad_s[l - 1]
                wr, br = conv_w[l], conv_b[l]
                TC = 128
                for c0 in range(0, M, TC):
                    r = min(TC, M - c0)
                    acc = None
                    for t in range(9):
                        ky, kx = divmod(t, 3)
                        d = ky * Wp + kx
                        p = jnp.dot(pin[c0 + d:c0 + d + r, :],
                                    wr[t * CP:(t + 1) * CP, :],
                                    preferred_element_type=jnp.float32)
                        acc = p if acc is None else acc + p
                    cs[c0:c0 + r, :] = jnp.maximum(acc + br[...], 0.0)

            # ------------- fused 2x2 max-pool (H and W together) -------------
            last = (l + 1 == n_layers)
            if not last:
                WPp = WP + 2
                Sn = (HP + 2) * WPp
                pnext = pad_s[l]
                ztop = jnp.zeros((WPp + 1, CP), jnp.float32)
                zbot = jnp.zeros((WPp - 1, CP), jnp.float32)

            for i in range(Bt):
                base = i * Sl
                # Interleave trick (Wp is even): the two stride-2 reads below
                # contain, per pooled row py, the even-row corners at
                # [py*Wp : py*Wp+WP] and the odd-row corners at
                # [py*Wp+Wp/2 : py*Wp+Wp/2+WP] after the horizontal max.
                a = cs[pl.ds(base, HPWp, stride=2), :]
                b = cs[pl.ds(base + 1, HPWp, stride=2), :]
                pool_s[0:HPWp, :] = jnp.maximum(a, b)
                if not last:
                    # Only the border rows of the next padded slab need
                    # zeroing; interiors (incl. L/R pads) are written below.
                    pnext[i * Sn:i * Sn + WPp + 1, :] = ztop
                    pnext[i * Sn + (HP + 1) * WPp + 1:
                          i * Sn + (HP + 2) * WPp, :] = zbot
                img_sum = None
                for py in range(HP):
                    top = pool_s[py * Wp:py * Wp + WP, :]
                    bot = pool_s[py * Wp + Wp // 2:py * Wp + Wp // 2 + WP, :]
                    row = jnp.maximum(top, bot)                    # (WP, 128)
                    if last:
                        sr = (jnp.sum(row, axis=0, keepdims=True)
                              if WP > 1 else row)
                        img_sum = sr if img_sum is None else img_sum + sr
                    else:
                        s0 = i * Sn + (py + 1) * WPp + 1
                        pnext[s0:s0 + WP, :] = row
                        # widen the store with zeros: right pad of this row and
                        # left pad of the next padded row.
                        pnext[s0 + WP:s0 + WP + 2, :] = zero2
                if last:
                    # AdaptiveAvgPool2d(1): identity for the 1x1 final map.
                    if HF * WF > 1:
                        img_sum = img_sum * (1.0 / float(HF * WF))
                    feat_s[i:i + 1, :] = img_sum

        # ------------- MLP head (batched over the Bt images) -------------
        imgf = feat_s[...]                                     # (Bt, 128)
        fts = f_ref[0]                                         # (Bt, F)
        h1 = jnp.dot(imgf, w1a[...], preferred_element_type=jnp.float32)
        h1 = h1 + jnp.dot(fts, w1b[...], preferred_element_type=jnp.float32)
        h1 = jnp.maximum(h1 + hb1[...], 0.0)
        # TODO(synk): nn.Dropout(0.3)/(0.2) are identity here (inference mode).
        h2 = jnp.maximum(
            jnp.dot(h1, hw2[...], preferred_element_type=jnp.float32)
            + hb2[...], 0.0)
        o_ref[0] = (jnp.dot(h2, hw3[...], preferred_element_type=jnp.float32)
                    + hb3[...])

    return kernel


# ----------------------------------------------------------------------------
# Wrapper: single pallas_call for the whole forward pass
# ----------------------------------------------------------------------------
def dual_path_forward(images_nchw, features, params, *, block_b=None):
    """images_nchw: (B, 2, H, W) f32 (PyTorch layout), features: (B, F) -> (B,)."""
    x = jnp.transpose(images_nchw, (0, 2, 3, 1)).astype(jnp.float32)   # NHWC
    B, H, W, Cin0 = x.shape
    feats = features.astype(jnp.float32)
    Fdim = feats.shape[-1]
    chans = [(wc.shape[2], wc.shape[3]) for wc, _ in params["conv"]]
    n_layers = len(chans)

    # MaxPool2d(2) at every stage requires even spatial dims (holds for 16x16).
    h, w = H, W
    for _ in chans:
        assert h % 2 == 0 and w % 2 == 0, "even spatial dims required"
        h, w = h // 2, w // 2

    # Batch blocking: Bt images per grid step; keep >= 2 steps when B >= 2 so
    # v7x's two TensorCores still split the grid ('parallel' batch axis).
    Bt = block_b if block_b is not None else max(1, min(8, B // 2))
    G = -(-B // Bt)
    Bpad = G * Bt
    if Bpad != B:
        x = jnp.pad(x, ((0, Bpad - B), (0, 0), (0, 0), (0, 0)))
        feats = jnp.pad(feats, ((0, Bpad - B), (0, 0)))

    # --- XLA prologue: fold layer-1's 3x3 taps into the contraction dim and
    # flatten to the kernel's row-stacked layout (lane-dense: 18 lanes). ---
    Hp, Wp = H + 2, W + 2
    xp = jnp.pad(x, ((0, 0), (1, 1), (1, 1), (0, 0))).reshape(Bpad, Hp * Wp, Cin0)
    N1 = H * Wp - 2
    taps = [lax.slice_in_dim(xp, ky * Wp + kx, ky * Wp + kx + N1, axis=1)
            for ky in range(3) for kx in range(3)]
    xe = jnp.concatenate(taps, axis=2)                         # (Bpad, N1, 18)
    S1 = _round_up(N1, 8)
    xe = jnp.pad(xe, ((0, 0), (0, S1 - N1), (0, 0)))
    xe = xe.reshape(Bpad * S1, 9 * Cin0)
    feats3 = feats.reshape(G, Bt, Fdim)

    # --- conv weights: lane-pad every channel dim to 128 (zeros) ---
    conv_args, conv_specs = [], []
    for li, (wc, bc) in enumerate(params["conv"]):
        ci, co = wc.shape[2], wc.shape[3]
        if li == 0:
            wmat = jnp.pad(wc.reshape(9 * ci, co), ((0, 0), (0, CP - co)))
        else:
            wmat = jnp.pad(wc.reshape(9, ci, co),
                           ((0, 0), (0, CP - ci), (0, CP - co))).reshape(9 * CP, CP)
        bmat = jnp.pad(bc.reshape(1, co), ((0, 0), (0, CP - co)))
        conv_args += [wmat, bmat]
        conv_specs += [pl.BlockSpec(wmat.shape, lambda g: (0, 0)),
                       pl.BlockSpec(bmat.shape, lambda g: (0, 0))]

    C_last = chans[-1][1]
    D1, D2 = params["w1"].shape[1], params["w2"].shape[1]
    w1a = jnp.pad(params["w1"][:C_last], ((0, CP - C_last), (0, 0)))
    w1b = params["w1"][C_last:]
    head_args = [w1a, w1b, params["b1"].reshape(1, D1),
                 params["w2"], params["b2"].reshape(1, D2),
                 params["w3"], params["b3"].reshape(1, 1)]
    head_specs = [pl.BlockSpec(a.shape, lambda g: (0, 0)) for a in head_args]

    # --- VMEM scratch: conv slab per layer + padded-input slab per later
    # layer (all 128-lane), one pooling staging buffer, one feature buffer. ---
    scratch = [pltpu.VMEM((Bt * S1, CP), jnp.float32)]
    hh, ww = H // 2, W // 2
    for _ in range(1, n_layers):
        Sl = (hh + 2) * (ww + 2)
        scratch += [pltpu.VMEM((Bt * Sl, CP), jnp.float32),   # padded input slab
                    pltpu.VMEM((Bt * Sl, CP), jnp.float32)]   # conv output slab
        hh, ww = hh // 2, ww // 2
    scratch += [pltpu.VMEM(((H // 2) * (W + 2), CP), jnp.float32),   # pool staging
                pltpu.VMEM((Bt, CP), jnp.float32)]                   # image feats

    kernel = make_fused_kernel(Bt, H, W, n_layers)
    out = pl.pallas_call(
        kernel,
        out_shape=jax.ShapeDtypeStruct((G, Bt, 1), jnp.float32),
        grid=(G,),
        in_specs=([pl.BlockSpec((Bt * S1, 9 * Cin0), lambda g: (g, 0)),
                   pl.BlockSpec((1, Bt, Fdim), lambda g: (g, 0, 0))]
                  + conv_specs + head_specs),
        out_specs=pl.BlockSpec((1, Bt, 1), lambda g: (g, 0, 0)),
        scratch_shapes=scratch,
        compiler_params=pltpu.CompilerParams(
            dimension_semantics=("parallel",)),   # v7x: split steps over 2 TCs
    )(xe, feats3, *conv_args, *head_args)
    return out.reshape(Bpad)[:B]


# ----------------------------------------------------------------------------
# Pure-JAX reference
# ----------------------------------------------------------------------------
def reference_forward(images_nchw, features, params):
    x = jnp.transpose(images_nchw, (0, 2, 3, 1)).astype(jnp.float32)
    for w, b in params["conv"]:
        x = lax.conv_general_dilated(
            x, w, window_strides=(1, 1), padding="SAME",
            dimension_numbers=("NHWC", "HWIO", "NHWC"),
            precision=lax.Precision.HIGHEST) + b
        x = jnp.maximum(x, 0.0)
        x = lax.reduce_window(x, jnp.array(-jnp.inf, jnp.float32), lax.max,
                              (1, 2, 2, 1), (1, 2, 2, 1), "VALID")
    img = jnp.mean(x, axis=(1, 2))
    comb = jnp.concatenate([img, features.astype(jnp.float32)], axis=1)
    h = jnp.maximum(jnp.matmul(comb, params["w1"], precision=lax.Precision.HIGHEST)
                    + params["b1"], 0.0)
    h = jnp.maximum(jnp.matmul(h, params["w2"], precision=lax.Precision.HIGHEST)
                    + params["b2"], 0.0)
    return (jnp.matmul(h, params["w3"], precision=lax.Precision.HIGHEST)
            + params["b3"])[:, 0]


def init_params(key):
    ks = jax.random.split(key, 14)

    def nrm(k, shape, scale):
        return scale * jax.random.normal(k, shape, jnp.float32)

    chans = [(2, 16), (16, 32), (32, 64), (64, 128)]
    conv = []
    for i, (ci, co) in enumerate(chans):
        conv.append((nrm(ks[2 * i], (3, 3, ci, co), 0.15),
                     nrm(ks[2 * i + 1], (co,), 0.05)))
    return dict(
        conv=conv,
        w1=nrm(ks[8], (128 + FEATURE_DIM, 64), 0.10), b1=nrm(ks[9], (64,), 0.05),
        w2=nrm(ks[10], (64, 32), 0.15),               b2=nrm(ks[11], (32,), 0.05),
        w3=nrm(ks[12], (32, 1), 0.20),                b3=nrm(ks[13], (1,), 0.05),
    )


if __name__ == "__main__":
    key = jax.random.PRNGKey(0)
    k_img, k_feat, k_par = jax.random.split(key, 3)

    B, H, W = 2, 16, 16
    images = jax.random.normal(k_img, (B, 2, H, W), jnp.float32)      # NCHW, like PyTorch
    features = jax.random.normal(k_feat, (B, FEATURE_DIM), jnp.float32)
    params = init_params(k_par)

    fwd = jax.jit(dual_path_forward)
    out = jax.block_until_ready(fwd(images, features, params))
    assert out.shape == (B,), out.shape

    ref = jax.block_until_ready(jax.jit(reference_forward)(images, features, params))
    if not bool(jnp.allclose(out, ref, atol=1e-2, rtol=1e-2)):
        raise AssertionError(
            f"Pallas output {out} does not match reference {ref}")

    print("KERNEL_OK")
</pallas_src>

<mosaic_0001>
module attributes {stable_mosaic.version = 11 : i64} {
  func.func @kernel(%arg0: i32, %arg1: memref<288x18xf32, #tpu.memory_space<vmem>>, %arg2: memref<1x1x8xf32, #tpu.memory_space<vmem>>, %arg3: memref<18x128xf32, #tpu.memory_space<vmem>>, %arg4: memref<1x128xf32, #tpu.memory_space<vmem>>, %arg5: memref<1152x128xf32, #tpu.memory_space<vmem>>, %arg6: memref<1x128xf32, #tpu.memory_space<vmem>>, %arg7: memref<1152x128xf32, #tpu.memory_space<vmem>>, %arg8: memref<1x128xf32, #tpu.memory_space<vmem>>, %arg9: memref<1152x128xf32, #tpu.memory_space<vmem>>, %arg10: memref<1x128xf32, #tpu.memory_space<vmem>>, %arg11: memref<128x64xf32, #tpu.memory_space<vmem>>, %arg12: memref<8x64xf32, #tpu.memory_space<vmem>>, %arg13: memref<1x64xf32, #tpu.memory_space<vmem>>, %arg14: memref<64x32xf32, #tpu.memory_space<vmem>>, %arg15: memref<1x32xf32, #tpu.memory_space<vmem>>, %arg16: memref<32x1xf32, #tpu.memory_space<vmem>>, %arg17: memref<1x1xf32, #tpu.memory_space<vmem>>, %arg18: memref<1x1x1xf32, #tpu.memory_space<vmem>>, %arg19: memref<288x128xf32, #tpu.memory_space<vmem>>, %arg20: memref<100x128xf32, #tpu.memory_space<vmem>>, %arg21: memref<100x128xf32, #tpu.memory_space<vmem>>, %arg22: memref<36x128xf32, #tpu.memory_space<vmem>>, %arg23: memref<36x128xf32, #tpu.memory_space<vmem>>, %arg24: memref<16x128xf32, #tpu.memory_space<vmem>>, %arg25: memref<16x128xf32, #tpu.memory_space<vmem>>, %arg26: memref<144x128xf32, #tpu.memory_space<vmem>>, %arg27: memref<1x128xf32, #tpu.memory_space<vmem>>) attributes {dimension_semantics = [#tpu.dimension_semantics<parallel>], iteration_bounds = array<i64: 2>, scalar_prefetch = 0 : i64, scratch_operands = 9 : i64, tpu.core_type = #tpu.core_type<tc>, window_params = [{transform_indices = @transform_0, window_bounds = array<i64: 288, 18>}, {transform_indices = @transform_1, window_bounds = array<i64: 1, 1, 8>}, {pipeline_mode = #tpu.pipeline_mode<synchronous>, transform_indices = @transform_2, window_bounds = array<i64: 18, 128>}, {pipeline_mode = #tpu.pipeline_mode<synchronous>, transform_indices = @transform_3, window_bounds = array<i64: 1, 128>}, {pipeline_mode = #tpu.pipeline_mode<synchronous>, transform_indices = @transform_4, window_bounds = array<i64: 1152, 128>}, {pipeline_mode = #tpu.pipeline_mode<synchronous>, transform_indices = @transform_5, window_bounds = array<i64: 1, 128>}, {pipeline_mode = #tpu.pipeline_mode<synchronous>, transform_indices = @transform_6, window_bounds = array<i64: 1152, 128>}, {pipeline_mode = #tpu.pipeline_mode<synchronous>, transform_indices = @transform_7, window_bounds = array<i64: 1, 128>}, {pipeline_mode = #tpu.pipeline_mode<synchronous>, transform_indices = @transform_8, window_bounds = array<i64: 1152, 128>}, {pipeline_mode = #tpu.pipeline_mode<synchronous>, transform_indices = @transform_9, window_bounds = array<i64: 1, 128>}, {pipeline_mode = #tpu.pipeline_mode<synchronous>, transform_indices = @transform_10, window_bounds = array<i64: 128, 64>}, {pipeline_mode = #tpu.pipeline_mode<synchronous>, transform_indices = @transform_11, window_bounds = array<i64: 8, 64>}, {pipeline_mode = #tpu.pipeline_mode<synchronous>, transform_indices = @transform_12, window_bounds = array<i64: 1, 64>}, {pipeline_mode = #tpu.pipeline_mode<synchronous>, transform_indices = @transform_13, window_bounds = array<i64: 64, 32>}, {pipeline_mode = #tpu.pipeline_mode<synchronous>, transform_indices = @transform_14, window_bounds = array<i64: 1, 32>}, {pipeline_mode = #tpu.pipeline_mode<synchronous>, transform_indices = @transform_15, window_bounds = array<i64: 32, 1>}, {pipeline_mode = #tpu.pipeline_mode<synchronous>, transform_indices = @transform_16, window_bounds = array<i64: 1, 1>}, {transform_indices = @transform_17, window_bounds = array<i64: 1, 1, 1>}]} {
    %cst = arith.constant 0.000000e+00 : f32
    %0 = vector.broadcast %cst : f32 to vector<2x128xf32>
    %c0 = arith.constant 0 : index
    %c0_0 = arith.constant 0 : index
    %1 = vector.load %arg1[%c0, %c0_0] : memref<288x18xf32, #tpu.memory_space<vmem>>, vector<128x18xf32>
    %c0_1 = arith.constant 0 : index
    %c0_2 = arith.constant 0 : index
    %2 = vector.load %arg3[%c0_1, %c0_2] : memref<18x128xf32, #tpu.memory_space<vmem>>, vector<18x128xf32>
    %cst_3 = arith.constant dense<0.000000e+00> : vector<128x128xf32>
    %3 = tpu.matmul %1, %2, %cst_3 {dimension_numbers = #tpu.dot_dimension_numbers<[1], [0], [0], [1], [0, 0, 1, 1], [], []>} : vector<128x18xf32>, vector<18x128xf32>, vector<128x128xf32> -> vector<128x128xf32>
    %c0_4 = arith.constant 0 : index
    %c0_5 = arith.constant 0 : index
    %4 = vector.load %arg4[%c0_4, %c0_5] : memref<1x128xf32, #tpu.memory_space<vmem>>, vector<1x128xf32>
    %5 = vector.broadcast %4 : vector<1x128xf32> to vector<128x128xf32>
    %6 = arith.addf %3, %5 : vector<128x128xf32>
    %cst_6 = arith.constant 0.000000e+00 : f32
    %7 = vector.broadcast %cst_6 : f32 to vector<128x128xf32>
    %8 = arith.maximumf %6, %7 : vector<128x128xf32>
    %c0_7 = arith.constant 0 : index
    %c0_8 = arith.constant 0 : index
    %9 = vector.load %arg19[%c0_7, %c0_8] : memref<288x128xf32, #tpu.memory_space<vmem>>, vector<128x128xf32>
    tpu.vector_store %arg19[%c0_7, %c0_8], %8 {strides = array<i32>} : memref<288x128xf32, #tpu.memory_space<vmem>>, vector<128x128xf32>,
    %c128 = arith.constant 128 : index
    %c0_9 = arith.constant 0 : index
    %10 = vector.load %arg1[%c128, %c0_9] : memref<288x18xf32, #tpu.memory_space<vmem>>, vector<128x18xf32>
    %c0_10 = arith.constant 0 : index
    %c0_11 = arith.constant 0 : index
    %11 = vector.load %arg3[%c0_10, %c0_11] : memref<18x128xf32, #tpu.memory_space<vmem>>, vector<18x128xf32>
    %cst_12 = arith.constant dense<0.000000e+00> : vector<128x128xf32>
    %12 = tpu.matmul %10, %11, %cst_12 {dimension_numbers = #tpu.dot_dimension_numbers<[1], [0], [0], [1], [0, 0, 1, 1], [], []>} : vector<128x18xf32>, vector<18x128xf32>, vector<128x128xf32> -> vector<128x128xf32>
    %c0_13 = arith.constant 0 : index
    %c0_14 = arith.constant 0 : index
    %13 = vector.load %arg4[%c0_13, %c0_14] : memref<1x128xf32, #tpu.memory_space<vmem>>, vector<1x128xf32>
    %14 = vector.broadcast %13 : vector<1x128xf32> to vector<128x128xf32>
    %15 = arith.addf %12, %14 : vector<128x128xf32>
    %cst_15 = arith.constant 0.000000e+00 : f32
    %16 = vector.broadcast %cst_15 : f32 to vector<128x128xf32>
    %17 = arith.maximumf %15, %16 : vector<128x128xf32>
    %c128_16 = arith.constant 128 : index
    %c0_17 = arith.constant 0 : index
    %18 = vector.load %arg19[%c128_16, %c0_17] : memref<288x128xf32, #tpu.memory_space<vmem>>, vector<128x128xf32>
    tpu.vector_store %arg19[%c128_16, %c0_17], %17 {strides = array<i32>} : memref<288x128xf32, #tpu.memory_space<vmem>>, vector<128x128xf32>,
    %c256 = arith.constant 256 : index
    %c0_18 = arith.constant 0 : index
    %19 = vector.load %arg1[%c256, %c0_18] : memref<288x18xf32, #tpu.memory_space<vmem>>, vector<32x18xf32>
    %c0_19 = arith.constant 0 : index
    %c0_20 = arith.constant 0 : index
    %20 = vector.load %arg3[%c0_19, %c0_20] : memref<18x128xf32, #tpu.memory_space<vmem>>, vector<18x128xf32>
    %cst_21 = arith.constant dense<0.000000e+00> : vector<32x128xf32>
    %21 = tpu.matmul %19, %20, %cst_21 {dimension_numbers = #tpu.dot_dimension_numbers<[1], [0], [0], [1], [0, 0, 1, 1], [], []>} : vector<32x18xf32>, vector<18x128xf32>, vector<32x128xf32> -> vector<32x128xf32>
    %c0_22 = arith.constant 0 : index
    %c0_23 = arith.constant 0 : index
    %22 = vector.load %arg4[%c0_22, %c0_23] : memref<1x128xf32, #tpu.memory_space<vmem>>, vector<1x128xf32>
    %23 = vector.broadcast %22 : vector<1x128xf32> to vector<32x128xf32>
    %24 = arith.addf %21, %23 : vector<32x128xf32>
    %cst_24 = arith.constant 0.000000e+00 : f32
    %25 = vector.broadcast %cst_24 : f32 to vector<32x128xf32>
    %26 = arith.maximumf %24, %25 : vector<32x128xf32>
    %c256_25 = arith.constant 256 : index
    %c0_26 = arith.constant 0 : index
    %27 = vector.load %arg19[%c256_25, %c0_26] : memref<288x128xf32, #tpu.memory_space<vmem>>, vector<32x128xf32>
    tpu.vector_store %arg19[%c256_25, %c0_26], %26 {strides = array<i32>} : memref<288x128xf32, #tpu.memory_space<vmem>>, vector<32x128xf32>,
    %cst_27 = arith.constant 0.000000e+00 : f32
    %28 = vector.broadcast %cst_27 : f32 to vector<11x128xf32>
    %cst_28 = arith.constant 0.000000e+00 : f32
    %29 = vector.broadcast %cst_28 : f32 to vector<9x128xf32>
    %c0_29 = arith.constant 0 : index
    %c0_30 = arith.constant 0 : index
    %30 = tpu.strided_load %arg19[%c0_29, %c0_30] {strides = array<i32: 2, 1>} : memref<288x128xf32, #tpu.memory_space<vmem>>, vector<144x128xf32>
    %c1 = arith.constant 1 : index
    %c0_31 = arith.constant 0 : index
    %31 = tpu.strided_load %arg19[%c1, %c0_31] {strides = array<i32: 2, 1>} : memref<288x128xf32, #tpu.memory_space<vmem>>, vector<144x128xf32>
    %32 = arith.maximumf %30, %31 : vector<144x128xf32>
    %c0_32 = arith.constant 0 : index
    %c0_33 = arith.constant 0 : index
    %33 = vector.load %arg26[%c0_32, %c0_33] : memref<144x128xf32, #tpu.memory_space<vmem>>, vector<144x128xf32>
    tpu.vector_store %arg26[%c0_32, %c0_33], %32 {strides = array<i32>} : memref<144x128xf32, #tpu.memory_space<vmem>>, vector<144x128xf32>,
    %c0_34 = arith.constant 0 : index
    %c0_35 = arith.constant 0 : index
    %34 = vector.load %arg20[%c0_34, %c0_35] : memref<100x128xf32, #tpu.memory_space<vmem>>, vector<11x128xf32>
    tpu.vector_store %arg20[%c0_34, %c0_35], %28 {strides = array<i32>} : memref<100x128xf32, #tpu.memory_space<vmem>>, vector<11x128xf32>,
    %c91 = arith.constant 91 : index
    %c0_36 = arith.constant 0 : index
    %35 = vector.load %arg20[%c91, %c0_36] : memref<100x128xf32, #tpu.memory_space<vmem>>, vector<9x128xf32>
    tpu.vector_store %arg20[%c91, %c0_36], %29 {strides = array<i32>} : memref<100x128xf32, #tpu.memory_space<vmem>>, vector<9x128xf32>,
    %c0_37 = arith.constant 0 : index
    %c0_38 = arith.constant 0 : index
    %36 = vector.load %arg26[%c0_37, %c0_38] : memref<144x128xf32, #tpu.memory_space<vmem>>, vector<8x128xf32>
    %c9 = arith.constant 9 : index
    %c0_39 = arith.constant 0 : index
    %37 = vector.load %arg26[%c9, %c0_39] : memref<144x128xf32, #tpu.memory_space<vmem>>, vector<8x128xf32>
    %38 = arith.maximumf %36, %37 : vector<8x128xf32>
    %c11 = arith.constant 11 : index
    %c0_40 = arith.constant 0 : index
    %39 = vector.load %arg20[%c11, %c0_40] : memref<100x128xf32, #tpu.memory_space<vmem>>, vector<8x128xf32>
    tpu.vector_store %arg20[%c11, %c0_40], %38 {strides = array<i32>} : memref<100x128xf32, #tpu.memory_space<vmem>>, vector<8x128xf32>,
    %c19 = arith.constant 19 : index
    %c0_41 = arith.constant 0 : index
    %40 = vector.load %arg20[%c19, %c0_41] : memref<100x128xf32, #tpu.memory_space<vmem>>, vector<2x128xf32>
    tpu.vector_store %arg20[%c19, %c0_41], %0 {strides = array<i32>} : memref<100x128xf32, #tpu.memory_space<vmem>>, vector<2x128xf32>,
    %c18 = arith.constant 18 : index
    %c0_42 = arith.constant 0 : index
    %41 = vector.load %arg26[%c18, %c0_42] : memref<144x128xf32, #tpu.memory_space<vmem>>, vector<8x128xf32>
    %c27 = arith.constant 27 : index
    %c0_43 = arith.constant 0 : index
    %42 = vector.load %arg26[%c27, %c0_43] : memref<144x128xf32, #tpu.memory_space<vmem>>, vector<8x128xf32>
    %43 = arith.maximumf %41, %42 : vector<8x128xf32>
    %c21 = arith.constant 21 : index
    %c0_44 = arith.constant 0 : index
    %44 = vector.load %arg20[%c21, %c0_44] : memref<100x128xf32, #tpu.memory_space<vmem>>, vector<8x128xf32>
    tpu.vector_store %arg20[%c21, %c0_44], %43 {strides = array<i32>} : memref<100x128xf32, #tpu.memory_space<vmem>>, vector<8x128xf32>,
    %c29 = arith.constant 29 : index
    %c0_45 = arith.constant 0 : index
    %45 = vector.load %arg20[%c29, %c0_45] : memref<100x128xf32, #tpu.memory_space<vmem>>, vector<2x128xf32>
    tpu.vector_store %arg20[%c29, %c0_45], %0 {strides = array<i32>} : memref<100x128xf32, #tpu.memory_space<vmem>>, vector<2x128xf32>,
    %c36 = arith.constant 36 : index
    %c0_46 = arith.constant 0 : index
    %46 = vector.load %arg26[%c36, %c0_46] : memref<144x128xf32, #tpu.memory_space<vmem>>, vector<8x128xf32>
    %c45 = arith.constant 45 : index
    %c0_47 = arith.constant 0 : index
    %47 = vector.load %arg26[%c45, %c0_47] : memref<144x128xf32, #tpu.memory_space<vmem>>, vector<8x128xf32>
    %48 = arith.maximumf %46, %47 : vector<8x128xf32>
    %c31 = arith.constant 31 : index
    %c0_48 = arith.constant 0 : index
    %49 = vector.load %arg20[%c31, %c0_48] : memref<100x128xf32, #tpu.memory_space<vmem>>, vector<8x128xf32>
    tpu.vector_store %arg20[%c31, %c0_48], %48 {strides = array<i32>} : memref<100x128xf32, #tpu.memory_space<vmem>>, vector<8x128xf32>,
    %c39 = arith.constant 39 : index
    %c0_49 = arith.constant 0 : index
    %50 = vector.load %arg20[%c39, %c0_49] : memref<100x128xf32, #tpu.memory_space<vmem>>, vector<2x128xf32>
    tpu.vector_store %arg20[%c39, %c0_49], %0 {strides = array<i32>} : memref<100x128xf32, #tpu.memory_space<vmem>>, vector<2x128xf32>,
    %c54 = arith.constant 54 : index
    %c0_50 = arith.constant 0 : index
    %51 = vector.load %arg26[%c54, %c0_50] : memref<144x128xf32, #tpu.memory_space<vmem>>, vector<8x128xf32>
    %c63 = arith.constant 63 : index
    %c0_51 = arith.constant 0 : index
    %52 = vector.load %arg26[%c63, %c0_51] : memref<144x128xf32, #tpu.memory_space<vmem>>, vector<8x128xf32>
    %53 = arith.maximumf %51, %52 : vector<8x128xf32>
    %c41 = arith.constant 41 : index
    %c0_52 = arith.constant 0 : index
    %54 = vector.load %arg20[%c41, %c0_52] : memref<100x128xf32, #tpu.memory_space<vmem>>, vector<8x128xf32>
    tpu.vector_store %arg20[%c41, %c0_52], %53 {strides = array<i32>} : memref<100x128xf32, #tpu.memory_space<vmem>>, vector<8x128xf32>,
    %c49 = arith.constant 49 : index
    %c0_53 = arith.constant 0 : index
    %55 = vector.load %arg20[%c49, %c0_53] : memref<100x128xf32, #tpu.memory_space<vmem>>, vector<2x128xf32>
    tpu.vector_store %arg20[%c49, %c0_53], %0 {strides = array<i32>} : memref<100x128xf32, #tpu.memory_space<vmem>>, vector<2x128xf32>,
    %c72 = arith.constant 72 : index
    %c0_54 = arith.constant 0 : index
    %56 = vector.load %arg26[%c72, %c0_54] : memref<144x128xf32, #tpu.memory_space<vmem>>, vector<8x128xf32>
    %c81 = arith.constant 81 : index
    %c0_55 = arith.constant 0 : index
    %57 = vector.load %arg26[%c81, %c0_55] : memref<144x128xf32, #tpu.memory_space<vmem>>, vector<8x128xf32>
    %58 = arith.maximumf %56, %57 : vector<8x128xf32>
    %c51 = arith.constant 51 : index
    %c0_56 = arith.constant 0 : index
    %59 = vector.load %arg20[%c51, %c0_56] : memref<100x128xf32, #tpu.memory_space<vmem>>, vector<8x128xf32>
    tpu.vector_store %arg20[%c51, %c0_56], %58 {strides = array<i32>} : memref<100x128xf32, #tpu.memory_space<vmem>>, vector<8x128xf32>,
    %c59 = arith.constant 59 : index
    %c0_57 = arith.constant 0 : index
    %60 = vector.load %arg20[%c59, %c0_57] : memref<100x128xf32, #tpu.memory_space<vmem>>, vector<2x128xf32>
    tpu.vector_store %arg20[%c59, %c0_57], %0 {strides = array<i32>} : memref<100x128xf32, #tpu.memory_space<vmem>>, vector<2x128xf32>,
    %c90 = arith.constant 90 : index
    %c0_58 = arith.constant 0 : index
    %61 = vector.load %arg26[%c90, %c0_58] : memref<144x128xf32, #tpu.memory_space<vmem>>, vector<8x128xf32>
    %c99 = arith.constant 99 : index
    %c0_59 = arith.constant 0 : index
    %62 = vector.load %arg26[%c99, %c0_59] : memref<144x128xf32, #tpu.memory_space<vmem>>, vector<8x128xf32>
    %63 = arith.maximumf %61, %62 : vector<8x128xf32>
    %c61 = arith.constant 61 : index
    %c0_60 = arith.constant 0 : index
    %64 = vector.load %arg20[%c61, %c0_60] : memref<100x128xf32, #tpu.memory_space<vmem>>, vector<8x128xf32>
    tpu.vector_store %arg20[%c61, %c0_60], %63 {strides = array<i32>} : memref<100x128xf32, #tpu.memory_space<vmem>>, vector<8x128xf32>,
    %c69 = arith.constant 69 : index
    %c0_61 = arith.constant 0 : index
    %65 = vector.load %arg20[%c69, %c0_61] : memref<100x128xf32, #tpu.memory_space<vmem>>, vector<2x128xf32>
    tpu.vector_store %arg20[%c69, %c0_61], %0 {strides = array<i32>} : memref<100x128xf32, #tpu.memory_space<vmem>>, vector<2x128xf32>,
    %c108 = arith.constant 108 : index
    %c0_62 = arith.constant 0 : index
    %66 = vector.load %arg26[%c108, %c0_62] : memref<144x128xf32, #tpu.memory_space<vmem>>, vector<8x128xf32>
    %c117 = arith.constant 117 : index
    %c0_63 = arith.constant 0 : index
    %67 = vector.load %arg26[%c117, %c0_63] : memref<144x128xf32, #tpu.memory_space<vmem>>, vector<8x128xf32>
    %68 = arith.maximumf %66, %67 : vector<8x128xf32>
    %c71 = arith.constant 71 : index
    %c0_64 = arith.constant 0 : index
    %69 = vector.load %arg20[%c71, %c0_64] : memref<100x128xf32, #tpu.memory_space<vmem>>, vector<8x128xf32>
    tpu.vector_store %arg20[%c71, %c0_64], %68 {strides = array<i32>} : memref<100x128xf32, #tpu.memory_space<vmem>>, vector<8x128xf32>,
    %c79 = arith.constant 79 : index
    %c0_65 = arith.constant 0 : index
    %70 = vector.load %arg20[%c79, %c0_65] : memref<100x128xf32, #tpu.memory_space<vmem>>, vector<2x128xf32>
    tpu.vector_store %arg20[%c79, %c0_65], %0 {strides = array<i32>} : memref<100x128xf32, #tpu.memory_space<vmem>>, vector<2x128xf32>,
    %c126 = arith.constant 126 : index
    %c0_66 = arith.constant 0 : index
    %71 = vector.load %arg26[%c126, %c0_66] : memref<144x128xf32, #tpu.memory_space<vmem>>, vector<8x128xf32>
    %c135 = arith.constant 135 : index
    %c0_67 = arith.constant 0 : index
    %72 = vector.load %arg26[%c135, %c0_67] : memref<144x128xf32, #tpu.memory_space<vmem>>, vector<8x128xf32>
    %73 = arith.maximumf %71, %72 : vector<8x128xf32>
    %c81_68 = arith.constant 81 : index
    %c0_69 = arith.constant 0 : index
    %74 = vector.load %arg20[%c81_68, %c0_69] : memref<100x128xf32, #tpu.memory_space<vmem>>, vector<8x128xf32>
    tpu.vector_store %arg20[%c81_68, %c0_69], %73 {strides = array<i32>} : memref<100x128xf32, #tpu.memory_space<vmem>>, vector<8x128xf32>,
    %c89 = arith.constant 89 : index
    %c0_70 = arith.constant 0 : index
    %75 = vector.load %arg20[%c89, %c0_70] : memref<100x128xf32, #tpu.memory_space<vmem>>, vector<2x128xf32>
    tpu.vector_store %arg20[%c89, %c0_70], %0 {strides = array<i32>} : memref<100x128xf32, #tpu.memory_space<vmem>>, vector<2x128xf32>,
    %c0_71 = arith.constant 0 : index
    %c0_72 = arith.constant 0 : index
    %76 = vector.load %arg20[%c0_71, %c0_72] : memref<100x128xf32, #tpu.memory_space<vmem>>, vector<78x128xf32>
    %c0_73 = arith.constant 0 : index
    %c0_74 = arith.constant 0 : index
    %77 = vector.load %arg5[%c0_73, %c0_74] : memref<1152x128xf32, #tpu.memory_space<vmem>>, vector<128x128xf32>
    %cst_75 = arith.constant dense<0.000000e+00> : vector<78x128xf32>
    %78 = tpu.matmul %76, %77, %cst_75 {dimension_numbers = #tpu.dot_dimension_numbers<[1], [0], [0], [1], [0, 0, 1, 1], [], []>} : vector<78x128xf32>, vector<128x128xf32>, vector<78x128xf32> -> vector<78x128xf32>
    %c1_76 = arith.constant 1 : index
    %c0_77 = arith.constant 0 : index
    %79 = vector.load %arg20[%c1_76, %c0_77] : memref<100x128xf32, #tpu.memory_space<vmem>>, vector<78x128xf32>
    %c128_78 = arith.constant 128 : index
    %c0_79 = arith.constant 0 : index
    %80 = vector.load %arg5[%c128_78, %c0_79] : memref<1152x128xf32, #tpu.memory_space<vmem>>, vector<128x128xf32>
    %cst_80 = arith.constant dense<0.000000e+00> : vector<78x128xf32>
    %81 = tpu.matmul %79, %80, %cst_80 {dimension_numbers = #tpu.dot_dimension_numbers<[1], [0], [0], [1], [0, 0, 1, 1], [], []>} : vector<78x128xf32>, vector<128x128xf32>, vector<78x128xf32> -> vector<78x128xf32>
    %82 = arith.addf %78, %81 : vector<78x128xf32>
    %c2 = arith.constant 2 : index
    %c0_81 = arith.constant 0 : index
    %83 = vector.load %arg20[%c2, %c0_81] : memref<100x128xf32, #tpu.memory_space<vmem>>, vector<78x128xf32>
    %c256_82 = arith.constant 256 : index
    %c0_83 = arith.constant 0 : index
    %84 = vector.load %arg5[%c256_82, %c0_83] : memref<1152x128xf32, #tpu.memory_space<vmem>>, vector<128x128xf32>
    %cst_84 = arith.constant dense<0.000000e+00> : vector<78x128xf32>
    %85 = tpu.matmul %83, %84, %cst_84 {dimension_numbers = #tpu.dot_dimension_numbers<[1], [0], [0], [1], [0, 0, 1, 1], [], []>} : vector<78x128xf32>, vector<128x128xf32>, vector<78x128xf32> -> vector<78x128xf32>
    %86 = arith.addf %82, %85 : vector<78x128xf32>
    %c10 = arith.constant 10 : index
    %c0_85 = arith.constant 0 : index
    %87 = vector.load %arg20[%c10, %c0_85] : memref<100x128xf32, #tpu.memory_space<vmem>>, vector<78x128xf32>
    %c384 = arith.constant 384 : index
    %c0_86 = arith.constant 0 : index
    %88 = vector.load %arg5[%c384, %c0_86] : memref<1152x128xf32, #tpu.memory_space<vmem>>, vector<128x128xf32>
    %cst_87 = arith.constant dense<0.000000e+00> : vector<78x128xf32>
    %89 = tpu.matmul %87, %88, %cst_87 {dimension_numbers = #tpu.dot_dimension_numbers<[1], [0], [0], [1], [0, 0, 1, 1], [], []>} : vector<78x128xf32>, vector<128x128xf32>, vector<78x128xf32> -> vector<78x128xf32>
    %90 = arith.addf %86, %89 : vector<78x128xf32>
    %c11_88 = arith.constant 11 : index
    %c0_89 = arith.constant 0 : index
    %91 = vector.load %arg20[%c11_88, %c0_89] : memref<100x128xf32, #tpu.memory_space<vmem>>, vector<78x128xf32>
    %c512 = arith.constant 512 : index
    %c0_90 = arith.constant 0 : index
    %92 = vector.load %arg5[%c512, %c0_90] : memref<1152x128xf32, #tpu.memory_space<vmem>>, vector<128x128xf32>
    %cst_91 = arith.constant dense<0.000000e+00> : vector<78x128xf32>
    %93 = tpu.matmul %91, %92, %cst_91 {dimension_numbers = #tpu.dot_dimension_numbers<[1], [0], [0], [1], [0, 0, 1, 1], [], []>} : vector<78x128xf32>, vector<128x128xf32>, vector<78x128xf32> -> vector<78x128xf32>
    %94 = arith.addf %90, %93 : vector<78x128xf32>
    %c12 = arith.constant 12 : index
    %c0_92 = arith.constant 0 : index
    %95 = vector.load %arg20[%c12, %c0_92] : memref<100x128xf32, #tpu.memory_space<vmem>>, vector<78x128xf32>
    %c640 = arith.constant 640 : index
    %c0_93 = arith.constant 0 : index
    %96 = vector.load %arg5[%c640, %c0_93] : memref<1152x128xf32, #tpu.memory_space<vmem>>, vector<128x128xf32>
    %cst_94 = arith.constant dense<0.000000e+00> : vector<78x128xf32>
    %97 = tpu.matmul %95, %96, %cst_94 {dimension_numbers = #tpu.dot_dimension_numbers<[1], [0], [0], [1], [0, 0, 1, 1], [], []>} : vector<78x128xf32>, vector<128x128xf32>, vector<78x128xf32> -> vector<78x128xf32>
    %98 = arith.addf %94, %97 : vector<78x128xf32>
    %c20 = arith.constant 20 : index
    %c0_95 = arith.constant 0 : index
    %99 = vector.load %arg20[%c20, %c0_95] : memref<100x128xf32, #tpu.memory_space<vmem>>, vector<78x128xf32>
    %c768 = arith.constant 768 : index
    %c0_96 = arith.constant 0 : index
    %100 = vector.load %arg5[%c768, %c0_96] : memref<1152x128xf32, #tpu.memory_space<vmem>>, vector<128x128xf32>
    %cst_97 = arith.constant dense<0.000000e+00> : vector<78x128xf32>
    %101 = tpu.matmul %99, %100, %cst_97 {dimension_numbers = #tpu.dot_dimension_numbers<[1], [0], [0], [1], [0, 0, 1, 1], [], []>} : vector<78x128xf32>, vector<128x128xf32>, vector<78x128xf32> -> vector<78x128xf32>
    %102 = arith.addf %98, %101 : vector<78x128xf32>
    %c21_98 = arith.constant 21 : index
    %c0_99 = arith.constant 0 : index
    %103 = vector.load %arg20[%c21_98, %c0_99] : memref<100x128xf32, #tpu.memory_space<vmem>>, vector<78x128xf32>
    %c896 = arith.constant 896 : index
    %c0_100 = arith.constant 0 : index
    %104 = vector.load %arg5[%c896, %c0_100] : memref<1152x128xf32, #tpu.memory_space<vmem>>, vector<128x128xf32>
    %cst_101 = arith.constant dense<0.000000e+00> : vector<78x128xf32>
    %105 = tpu.matmul %103, %104, %cst_101 {dimension_numbers = #tpu.dot_dimension_numbers<[1], [0], [0], [1], [0, 0, 1, 1], [], []>} : vector<78x128xf32>, vector<128x128xf32>, vector<78x128xf32> -> vector<78x128xf32>
    %106 = arith.addf %102, %105 : vector<78x128xf32>
    %c22 = arith.constant 22 : index
    %c0_102 = arith.constant 0 : index
    %107 = vector.load %arg20[%c22, %c0_102] : memref<100x128xf32, #tpu.memory_space<vmem>>, vector<78x128xf32>
    %c1024 = arith.constant 1024 : index
    %c0_103 = arith.constant 0 : index
    %108 = vector.load %arg5[%c1024, %c0_103] : memref<1152x128xf32, #tpu.memory_space<vmem>>, vector<128x128xf32>
    %cst_104 = arith.constant dense<0.000000e+00> : vector<78x128xf32>
    %109 = tpu.matmul %107, %108, %cst_104 {dimension_numbers = #tpu.dot_dimension_numbers<[1], [0], [0], [1], [0, 0, 1, 1], [], []>} : vector<78x128xf32>, vector<128x128xf32>, vector<78x128xf32> -> vector<78x128xf32>
    %110 = arith.addf %106, %109 : vector<78x128xf32>
    %c0_105 = arith.constant 0 : index
    %c0_106 = arith.constant 0 : index
    %111 = vector.load %arg6[%c0_105, %c0_106] : memref<1x128xf32, #tpu.memory_space<vmem>>, vector<1x128xf32>
    %112 = vector.broadcast %111 : vector<1x128xf32> to vector<78x128xf32>
    %113 = arith.addf %110, %112 : vector<78x128xf32>
    %cst_107 = arith.constant 0.000000e+00 : f32
    %114 = vector.broadcast %cst_107 : f32 to vector<78x128xf32>
    %115 = arith.maximumf %113, %114 : vector<78x128xf32>
    %c0_108 = arith.constant 0 : index
    %c0_109 = arith.constant 0 : index
    %116 = vector.load %arg21[%c0_108, %c0_109] : memref<100x128xf32, #tpu.memory_space<vmem>>, vector<78x128xf32>
    tpu.vector_store %arg21[%c0_108, %c0_109], %115 {strides = array<i32>} : memref<100x128xf32, #tpu.memory_space<vmem>>, vector<78x128xf32>,
    %cst_110 = arith.constant 0.000000e+00 : f32
    %117 = vector.broadcast %cst_110 : f32 to vector<7x128xf32>
    %cst_111 = arith.constant 0.000000e+00 : f32
    %118 = vector.broadcast %cst_111 : f32 to vector<5x128xf32>
    %c0_112 = arith.constant 0 : index
    %c0_113 = arith.constant 0 : index
    %119 = tpu.strided_load %arg21[%c0_112, %c0_113] {strides = array<i32: 2, 1>} : memref<100x128xf32, #tpu.memory_space<vmem>>, vector<40x128xf32>
    %c1_114 = arith.constant 1 : index
    %c0_115 = arith.constant 0 : index
    %120 = tpu.strided_load %arg21[%c1_114, %c0_115] {strides = array<i32: 2, 1>} : memref<100x128xf32, #tpu.memory_space<vmem>>, vector<40x128xf32>
    %121 = arith.maximumf %119, %120 : vector<40x128xf32>
    %c0_116 = arith.constant 0 : index
    %c0_117 = arith.constant 0 : index
    %122 = vector.load %arg26[%c0_116, %c0_117] : memref<144x128xf32, #tpu.memory_space<vmem>>, vector<40x128xf32>
    tpu.vector_store %arg26[%c0_116, %c0_117], %121 {strides = array<i32>} : memref<144x128xf32, #tpu.memory_space<vmem>>, vector<40x128xf32>,
    %c0_118 = arith.constant 0 : index
    %c0_119 = arith.constant 0 : index
    %123 = vector.load %arg22[%c0_118, %c0_119] : memref<36x128xf32, #tpu.memory_space<vmem>>, vector<7x128xf32>
    tpu.vector_store %arg22[%c0_118, %c0_119], %117 {strides = array<i32>} : memref<36x128xf32, #tpu.memory_space<vmem>>, vector<7x128xf32>,
    %c31_120 = arith.constant 31 : index
    %c0_121 = arith.constant 0 : index
    %124 = vector.load %arg22[%c31_120, %c0_121] : memref<36x128xf32, #tpu.memory_space<vmem>>, vector<5x128xf32>
    tpu.vector_store %arg22[%c31_120, %c0_121], %118 {strides = array<i32>} : memref<36x128xf32, #tpu.memory_space<vmem>>, vector<5x128xf32>,
    %c0_122 = arith.constant 0 : index
    %c0_123 = arith.constant 0 : index
    %125 = vector.load %arg26[%c0_122, %c0_123] : memref<144x128xf32, #tpu.memory_space<vmem>>, vector<4x128xf32>
    %c5 = arith.constant 5 : index
    %c0_124 = arith.constant 0 : index
    %126 = vector.load %arg26[%c5, %c0_124] : memref<144x128xf32, #tpu.memory_space<vmem>>, vector<4x128xf32>
    %127 = arith.maximumf %125, %126 : vector<4x128xf32>
    %c7 = arith.constant 7 : index
    %c0_125 = arith.constant 0 : index
    %128 = vector.load %arg22[%c7, %c0_125] : memref<36x128xf32, #tpu.memory_space<vmem>>, vector<4x128xf32>
    tpu.vector_store %arg22[%c7, %c0_125], %127 {strides = array<i32>} : memref<36x128xf32, #tpu.memory_space<vmem>>, vector<4x128xf32>,
    %c11_126 = arith.constant 11 : index
    %c0_127 = arith.constant 0 : index
    %129 = vector.load %arg22[%c11_126, %c0_127] : memref<36x128xf32, #tpu.memory_space<vmem>>, vector<2x128xf32>
    tpu.vector_store %arg22[%c11_126, %c0_127], %0 {strides = array<i32>} : memref<36x128xf32, #tpu.memory_space<vmem>>, vector<2x128xf32>,
    %c10_128 = arith.constant 10 : index
    %c0_129 = arith.constant 0 : index
    %130 = vector.load %arg26[%c10_128, %c0_129] : memref<144x128xf32, #tpu.memory_space<vmem>>, vector<4x128xf32>
    %c15 = arith.constant 15 : index
    %c0_130 = arith.constant 0 : index
    %131 = vector.load %arg26[%c15, %c0_130] : memref<144x128xf32, #tpu.memory_space<vmem>>, vector<4x128xf32>
    %132 = arith.maximumf %130, %131 : vector<4x128xf32>
    %c13 = arith.constant 13 : index
    %c0_131 = arith.constant 0 : index
    %133 = vector.load %arg22[%c13, %c0_131] : memref<36x128xf32, #tpu.memory_space<vmem>>, vector<4x128xf32>
    tpu.vector_store %arg22[%c13, %c0_131], %132 {strides = array<i32>} : memref<36x128xf32, #tpu.memory_space<vmem>>, vector<4x128xf32>,
    %c17 = arith.constant 17 : index
    %c0_132 = arith.constant 0 : index
    %134 = vector.load %arg22[%c17, %c0_132] : memref<36x128xf32, #tpu.memory_space<vmem>>, vector<2x128xf32>
    tpu.vector_store %arg22[%c17, %c0_132], %0 {strides = array<i32>} : memref<36x128xf32, #tpu.memory_space<vmem>>, vector<2x128xf32>,
    %c20_133 = arith.constant 20 : index
    %c0_134 = arith.constant 0 : index
    %135 = vector.load %arg26[%c20_133, %c0_134] : memref<144x128xf32, #tpu.memory_space<vmem>>, vector<4x128xf32>
    %c25 = arith.constant 25 : index
    %c0_135 = arith.constant 0 : index
    %136 = vector.load %arg26[%c25, %c0_135] : memref<144x128xf32, #tpu.memory_space<vmem>>, vector<4x128xf32>
    %137 = arith.maximumf %135, %136 : vector<4x128xf32>
    %c19_136 = arith.constant 19 : index
    %c0_137 = arith.constant 0 : index
    %138 = vector.load %arg22[%c19_136, %c0_137] : memref<36x128xf32, #tpu.memory_space<vmem>>, vector<4x128xf32>
    tpu.vector_store %arg22[%c19_136, %c0_137], %137 {strides = array<i32>} : memref<36x128xf32, #tpu.memory_space<vmem>>, vector<4x128xf32>,
    %c23 = arith.constant 23 : index
    %c0_138 = arith.constant 0 : index
    %139 = vector.load %arg22[%c23, %c0_138] : memref<36x128xf32, #tpu.memory_space<vmem>>, vector<2x128xf32>
    tpu.vector_store %arg22[%c23, %c0_138], %0 {strides = array<i32>} : memref<36x128xf32, #tpu.memory_space<vmem>>, vector<2x128xf32>,
    %c30 = arith.constant 30 : index
    %c0_139 = arith.constant 0 : index
    %140 = vector.load %arg26[%c30, %c0_139] : memref<144x128xf32, #tpu.memory_space<vmem>>, vector<4x128xf32>
    %c35 = arith.constant 35 : index
    %c0_140 = arith.constant 0 : index
    %141 = vector.load %arg26[%c35, %c0_140] : memref<144x128xf32, #tpu.memory_space<vmem>>, vector<4x128xf32>
    %142 = arith.maximumf %140, %141 : vector<4x128xf32>
    %c25_141 = arith.constant 25 : index
    %c0_142 = arith.constant 0 : index
    %143 = vector.load %arg22[%c25_141, %c0_142] : memref<36x128xf32, #tpu.memory_space<vmem>>, vector<4x128xf32>
    tpu.vector_store %arg22[%c25_141, %c0_142], %142 {strides = array<i32>} : memref<36x128xf32, #tpu.memory_space<vmem>>, vector<4x128xf32>,
    %c29_143 = arith.constant 29 : index
    %c0_144 = arith.constant 0 : index
    %144 = vector.load %arg22[%c29_143, %c0_144] : memref<36x128xf32, #tpu.memory_space<vmem>>, vector<2x128xf32>
    tpu.vector_store %arg22[%c29_143, %c0_144], %0 {strides = array<i32>} : memref<36x128xf32, #tpu.memory_space<vmem>>, vector<2x128xf32>,
    %c0_145 = arith.constant 0 : index
    %c0_146 = arith.constant 0 : index
    %145 = vector.load %arg22[%c0_145, %c0_146] : memref<36x128xf32, #tpu.memory_space<vmem>>, vector<22x128xf32>
    %c0_147 = arith.constant 0 : index
    %c0_148 = arith.constant 0 : index
    %146 = vector.load %arg7[%c0_147, %c0_148] : memref<1152x128xf32, #tpu.memory_space<vmem>>, vector<128x128xf32>
    %cst_149 = arith.constant dense<0.000000e+00> : vector<22x128xf32>
    %147 = tpu.matmul %145, %146, %cst_149 {dimension_numbers = #tpu.dot_dimension_numbers<[1], [0], [0], [1], [0, 0, 1, 1], [], []>} : vector<22x128xf32>, vector<128x128xf32>, vector<22x128xf32> -> vector<22x128xf32>
    %c1_150 = arith.constant 1 : index
    %c0_151 = arith.constant 0 : index
    %148 = vector.load %arg22[%c1_150, %c0_151] : memref<36x128xf32, #tpu.memory_space<vmem>>, vector<22x128xf32>
    %c128_152 = arith.constant 128 : index
    %c0_153 = arith.constant 0 : index
    %149 = vector.load %arg7[%c128_152, %c0_153] : memref<1152x128xf32, #tpu.memory_space<vmem>>, vector<128x128xf32>
    %cst_154 = arith.constant dense<0.000000e+00> : vector<22x128xf32>
    %150 = tpu.matmul %148, %149, %cst_154 {dimension_numbers = #tpu.dot_dimension_numbers<[1], [0], [0], [1], [0, 0, 1, 1], [], []>} : vector<22x128xf32>, vector<128x128xf32>, vector<22x128xf32> -> vector<22x128xf32>
    %151 = arith.addf %147, %150 : vector<22x128xf32>
    %c2_155 = arith.constant 2 : index
    %c0_156 = arith.constant 0 : index
    %152 = vector.load %arg22[%c2_155, %c0_156] : memref<36x128xf32, #tpu.memory_space<vmem>>, vector<22x128xf32>
    %c256_157 = arith.constant 256 : index
    %c0_158 = arith.constant 0 : index
    %153 = vector.load %arg7[%c256_157, %c0_158] : memref<1152x128xf32, #tpu.memory_space<vmem>>, vector<128x128xf32>
    %cst_159 = arith.constant dense<0.000000e+00> : vector<22x128xf32>
    %154 = tpu.matmul %152, %153, %cst_159 {dimension_numbers = #tpu.dot_dimension_numbers<[1], [0], [0], [1], [0, 0, 1, 1], [], []>} : vector<22x128xf32>, vector<128x128xf32>, vector<22x128xf32> -> vector<22x128xf32>
    %155 = arith.addf %151, %154 : vector<22x128xf32>
    %c6 = arith.constant 6 : index
    %c0_160 = arith.constant 0 : index
    %156 = vector.load %arg22[%c6, %c0_160] : memref<36x128xf32, #tpu.memory_space<vmem>>, vector<22x128xf32>
    %c384_161 = arith.constant 384 : index
    %c0_162 = arith.constant 0 : index
    %157 = vector.load %arg7[%c384_161, %c0_162] : memref<1152x128xf32, #tpu.memory_space<vmem>>, vector<128x128xf32>
    %cst_163 = arith.constant dense<0.000000e+00> : vector<22x128xf32>
    %158 = tpu.matmul %156, %157, %cst_163 {dimension_numbers = #tpu.dot_dimension_numbers<[1], [0], [0], [1], [0, 0, 1, 1], [], []>} : vector<22x128xf32>, vector<128x128xf32>, vector<22x128xf32> -> vector<22x128xf32>
    %159 = arith.addf %155, %158 : vector<22x128xf32>
    %c7_164 = arith.constant 7 : index
    %c0_165 = arith.constant 0 : index
    %160 = vector.load %arg22[%c7_164, %c0_165] : memref<36x128xf32, #tpu.memory_space<vmem>>, vector<22x128xf32>
    %c512_166 = arith.constant 512 : index
    %c0_167 = arith.constant 0 : index
    %161 = vector.load %arg7[%c512_166, %c0_167] : memref<1152x128xf32, #tpu.memory_space<vmem>>, vector<128x128xf32>
    %cst_168 = arith.constant dense<0.000000e+00> : vector<22x128xf32>
    %162 = tpu.matmul %160, %161, %cst_168 {dimension_numbers = #tpu.dot_dimension_numbers<[1], [0], [0], [1], [0, 0, 1, 1], [], []>} : vector<22x128xf32>, vector<128x128xf32>, vector<22x128xf32> -> vector<22x128xf32>
    %163 = arith.addf %159, %162 : vector<22x128xf32>
    %c8 = arith.constant 8 : index
    %c0_169 = arith.constant 0 : index
    %164 = vector.load %arg22[%c8, %c0_169] : memref<36x128xf32, #tpu.memory_space<vmem>>, vector<22x128xf32>
    %c640_170 = arith.constant 640 : index
    %c0_171 = arith.constant 0 : index
    %165 = vector.load %arg7[%c640_170, %c0_171] : memref<1152x128xf32, #tpu.memory_space<vmem>>, vector<128x128xf32>
    %cst_172 = arith.constant dense<0.000000e+00> : vector<22x128xf32>
    %166 = tpu.matmul %164, %165, %cst_172 {dimension_numbers = #tpu.dot_dimension_numbers<[1], [0], [0], [1], [0, 0, 1, 1], [], []>} : vector<22x128xf32>, vector<128x128xf32>, vector<22x128xf32> -> vector<22x128xf32>
    %167 = arith.addf %163, %166 : vector<22x128xf32>
    %c12_173 = arith.constant 12 : index
    %c0_174 = arith.constant 0 : index
    %168 = vector.load %arg22[%c12_173, %c0_174] : memref<36x128xf32, #tpu.memory_space<vmem>>, vector<22x128xf32>
    %c768_175 = arith.constant 768 : index
    %c0_176 = arith.constant 0 : index
    %169 = vector.load %arg7[%c768_175, %c0_176] : memref<1152x128xf32, #tpu.memory_space<vmem>>, vector<128x128xf32>
    %cst_177 = arith.constant dense<0.000000e+00> : vector<22x128xf32>
    %170 = tpu.matmul %168, %169, %cst_177 {dimension_numbers = #tpu.dot_dimension_numbers<[1], [0], [0], [1], [0, 0, 1, 1], [], []>} : vector<22x128xf32>, vector<128x128xf32>, vector<22x128xf32> -> vector<22x128xf32>
    %171 = arith.addf %167, %170 : vector<22x128xf32>
    %c13_178 = arith.constant 13 : index
    %c0_179 = arith.constant 0 : index
    %172 = vector.load %arg22[%c13_178, %c0_179] : memref<36x128xf32, #tpu.memory_space<vmem>>, vector<22x128xf32>
    %c896_180 = arith.constant 896 : index
    %c0_181 = arith.constant 0 : index
    %173 = vector.load %arg7[%c896_180, %c0_181] : memref<1152x128xf32, #tpu.memory_space<vmem>>, vector<128x128xf32>
    %cst_182 = arith.constant dense<0.000000e+00> : vector<22x128xf32>
    %174 = tpu.matmul %172, %173, %cst_182 {dimension_numbers = #tpu.dot_dimension_numbers<[1], [0], [0], [1], [0, 0, 1, 1], [], []>} : vector<22x128xf32>, vector<128x128xf32>, vector<22x128xf32> -> vector<22x128xf32>
    %175 = arith.addf %171, %174 : vector<22x128xf32>
    %c14 = arith.constant 14 : index
    %c0_183 = arith.constant 0 : index
    %176 = vector.load %arg22[%c14, %c0_183] : memref<36x128xf32, #tpu.memory_space<vmem>>, vector<22x128xf32>
    %c1024_184 = arith.constant 1024 : index
    %c0_185 = arith.constant 0 : index
    %177 = vector.load %arg7[%c1024_184, %c0_185] : memref<1152x128xf32, #tpu.memory_space<vmem>>, vector<128x128xf32>
    %cst_186 = arith.constant dense<0.000000e+00> : vector<22x128xf32>
    %178 = tpu.matmul %176, %177, %cst_186 {dimension_numbers = #tpu.dot_dimension_numbers<[1], [0], [0], [1], [0, 0, 1, 1], [], []>} : vector<22x128xf32>, vector<128x128xf32>, vector<22x128xf32> -> vector<22x128xf32>
    %179 = arith.addf %175, %178 : vector<22x128xf32>
    %c0_187 = arith.constant 0 : index
    %c0_188 = arith.constant 0 : index
    %180 = vector.load %arg8[%c0_187, %c0_188] : memref<1x128xf32, #tpu.memory_space<vmem>>, vector<1x128xf32>
    %181 = vector.broadcast %180 : vector<1x128xf32> to vector<22x128xf32>
    %182 = arith.addf %179, %181 : vector<22x128xf32>
    %cst_189 = arith.constant 0.000000e+00 : f32
    %183 = vector.broadcast %cst_189 : f32 to vector<22x128xf32>
    %184 = arith.maximumf %182, %183 : vector<22x128xf32>
    %c0_190 = arith.constant 0 : index
    %c0_191 = arith.constant 0 : index
    %185 = vector.load %arg23[%c0_190, %c0_191] : memref<36x128xf32, #tpu.memory_space<vmem>>, vector<22x128xf32>
    tpu.vector_store %arg23[%c0_190, %c0_191], %184 {strides = array<i32>} : memref<36x128xf32, #tpu.memory_space<vmem>>, vector<22x128xf32>,
    %cst_192 = arith.constant 0.000000e+00 : f32
    %186 = vector.broadcast %cst_192 : f32 to vector<5x128xf32>
    %cst_193 = arith.constant 0.000000e+00 : f32
    %187 = vector.broadcast %cst_193 : f32 to vector<3x128xf32>
    %c0_194 = arith.constant 0 : index
    %c0_195 = arith.constant 0 : index
    %188 = tpu.strided_load %arg23[%c0_194, %c0_195] {strides = array<i32: 2, 1>} : memref<36x128xf32, #tpu.memory_space<vmem>>, vector<12x128xf32>
    %c1_196 = arith.constant 1 : index
    %c0_197 = arith.constant 0 : index
    %189 = tpu.strided_load %arg23[%c1_196, %c0_197] {strides = array<i32: 2, 1>} : memref<36x128xf32, #tpu.memory_space<vmem>>, vector<12x128xf32>
    %190 = arith.maximumf %188, %189 : vector<12x128xf32>
    %c0_198 = arith.constant 0 : index
    %c0_199 = arith.constant 0 : index
    %191 = vector.load %arg26[%c0_198, %c0_199] : memref<144x128xf32, #tpu.memory_space<vmem>>, vector<12x128xf32>
    tpu.vector_store %arg26[%c0_198, %c0_199], %190 {strides = array<i32>} : memref<144x128xf32, #tpu.memory_space<vmem>>, vector<12x128xf32>,
    %c0_200 = arith.constant 0 : index
    %c0_201 = arith.constant 0 : index
    %192 = vector.load %arg24[%c0_200, %c0_201] : memref<16x128xf32, #tpu.memory_space<vmem>>, vector<5x128xf32>
    tpu.vector_store %arg24[%c0_200, %c0_201], %186 {strides = array<i32>} : memref<16x128xf32, #tpu.memory_space<vmem>>, vector<5x128xf32>,
    %c13_202 = arith.constant 13 : index
    %c0_203 = arith.constant 0 : index
    %193 = vector.load %arg24[%c13_202, %c0_203] : memref<16x128xf32, #tpu.memory_space<vmem>>, vector<3x128xf32>
    tpu.vector_store %arg24[%c13_202, %c0_203], %187 {strides = array<i32>} : memref<16x128xf32, #tpu.memory_space<vmem>>, vector<3x128xf32>,
    %c0_204 = arith.constant 0 : index
    %c0_205 = arith.constant 0 : index
    %194 = vector.load %arg26[%c0_204, %c0_205] : memref<144x128xf32, #tpu.memory_space<vmem>>, vector<2x128xf32>
    %c3 = arith.constant 3 : index
    %c0_206 = arith.constant 0 : index
    %195 = vector.load %arg26[%c3, %c0_206] : memref<144x128xf32, #tpu.memory_space<vmem>>, vector<2x128xf32>
    %196 = arith.maximumf %194, %195 : vector<2x128xf32>
    %c5_207 = arith.constant 5 : index
    %c0_208 = arith.constant 0 : index
    %197 = vector.load %arg24[%c5_207, %c0_208] : memref<16x128xf32, #tpu.memory_space<vmem>>, vector<2x128xf32>
    tpu.vector_store %arg24[%c5_207, %c0_208], %196 {strides = array<i32>} : memref<16x128xf32, #tpu.memory_space<vmem>>, vector<2x128xf32>,
    %c7_209 = arith.constant 7 : index
    %c0_210 = arith.constant 0 : index
    %198 = vector.load %arg24[%c7_209, %c0_210] : memref<16x128xf32, #tpu.memory_space<vmem>>, vector<2x128xf32>
    tpu.vector_store %arg24[%c7_209, %c0_210], %0 {strides = array<i32>} : memref<16x128xf32, #tpu.memory_space<vmem>>, vector<2x128xf32>,
    %c6_211 = arith.constant 6 : index
    %c0_212 = arith.constant 0 : index
    %199 = vector.load %arg26[%c6_211, %c0_212] : memref<144x128xf32, #tpu.memory_space<vmem>>, vector<2x128xf32>
    %c9_213 = arith.constant 9 : index
    %c0_214 = arith.constant 0 : index
    %200 = vector.load %arg26[%c9_213, %c0_214] : memref<144x128xf32, #tpu.memory_space<vmem>>, vector<2x128xf32>
    %201 = arith.maximumf %199, %200 : vector<2x128xf32>
    %c9_215 = arith.constant 9 : index
    %c0_216 = arith.constant 0 : index
    %202 = vector.load %arg24[%c9_215, %c0_216] : memref<16x128xf32, #tpu.memory_space<vmem>>, vector<2x128xf32>
    tpu.vector_store %arg24[%c9_215, %c0_216], %201 {strides = array<i32>} : memref<16x128xf32, #tpu.memory_space<vmem>>, vector<2x128xf32>,
    %c11_217 = arith.constant 11 : index
    %c0_218 = arith.constant 0 : index
    %203 = vector.load %arg24[%c11_217, %c0_218] : memref<16x128xf32, #tpu.memory_space<vmem>>, vector<2x128xf32>
    tpu.vector_store %arg24[%c11_217, %c0_218], %0 {strides = array<i32>} : memref<16x128xf32, #tpu.memory_space<vmem>>, vector<2x128xf32>,
    %c0_219 = arith.constant 0 : index
    %c0_220 = arith.constant 0 : index
    %204 = vector.load %arg24[%c0_219, %c0_220] : memref<16x128xf32, #tpu.memory_space<vmem>>, vector<6x128xf32>
    %c0_221 = arith.constant 0 : index
    %c0_222 = arith.constant 0 : index
    %205 = vector.load %arg9[%c0_221, %c0_222] : memref<1152x128xf32, #tpu.memory_space<vmem>>, vector<128x128xf32>
    %cst_223 = arith.constant dense<0.000000e+00> : vector<6x128xf32>
    %206 = tpu.matmul %204, %205, %cst_223 {dimension_numbers = #tpu.dot_dimension_numbers<[1], [0], [0], [1], [0, 0, 1, 1], [], []>} : vector<6x128xf32>, vector<128x128xf32>, vector<6x128xf32> -> vector<6x128xf32>
    %c1_224 = arith.constant 1 : index
    %c0_225 = arith.constant 0 : index
    %207 = vector.load %arg24[%c1_224, %c0_225] : memref<16x128xf32, #tpu.memory_space<vmem>>, vector<6x128xf32>
    %c128_226 = arith.constant 128 : index
    %c0_227 = arith.constant 0 : index
    %208 = vector.load %arg9[%c128_226, %c0_227] : memref<1152x128xf32, #tpu.memory_space<vmem>>, vector<128x128xf32>
    %cst_228 = arith.constant dense<0.000000e+00> : vector<6x128xf32>
    %209 = tpu.matmul %207, %208, %cst_228 {dimension_numbers = #tpu.dot_dimension_numbers<[1], [0], [0], [1], [0, 0, 1, 1], [], []>} : vector<6x128xf32>, vector<128x128xf32>, vector<6x128xf32> -> vector<6x128xf32>
    %210 = arith.addf %206, %209 : vector<6x128xf32>
    %c2_229 = arith.constant 2 : index
    %c0_230 = arith.constant 0 : index
    %211 = vector.load %arg24[%c2_229, %c0_230] : memref<16x128xf32, #tpu.memory_space<vmem>>, vector<6x128xf32>
    %c256_231 = arith.constant 256 : index
    %c0_232 = arith.constant 0 : index
    %212 = vector.load %arg9[%c256_231, %c0_232] : memref<1152x128xf32, #tpu.memory_space<vmem>>, vector<128x128xf32>
    %cst_233 = arith.constant dense<0.000000e+00> : vector<6x128xf32>
    %213 = tpu.matmul %211, %212, %cst_233 {dimension_numbers = #tpu.dot_dimension_numbers<[1], [0], [0], [1], [0, 0, 1, 1], [], []>} : vector<6x128xf32>, vector<128x128xf32>, vector<6x128xf32> -> vector<6x128xf32>
    %214 = arith.addf %210, %213 : vector<6x128xf32>
    %c4 = arith.constant 4 : index
    %c0_234 = arith.constant 0 : index
    %215 = vector.load %arg24[%c4, %c0_234] : memref<16x128xf32, #tpu.memory_space<vmem>>, vector<6x128xf32>
    %c384_235 = arith.constant 384 : index
    %c0_236 = arith.constant 0 : index
    %216 = vector.load %arg9[%c384_235, %c0_236] : memref<1152x128xf32, #tpu.memory_space<vmem>>, vector<128x128xf32>
    %cst_237 = arith.constant dense<0.000000e+00> : vector<6x128xf32>
    %217 = tpu.matmul %215, %216, %cst_237 {dimension_numbers = #tpu.dot_dimension_numbers<[1], [0], [0], [1], [0, 0, 1, 1], [], []>} : vector<6x128xf32>, vector<128x128xf32>, vector<6x128xf32> -> vector<6x128xf32>
    %218 = arith.addf %214, %217 : vector<6x128xf32>
    %c5_238 = arith.constant 5 : index
    %c0_239 = arith.constant 0 : index
    %219 = vector.load %arg24[%c5_238, %c0_239] : memref<16x128xf32, #tpu.memory_space<vmem>>, vector<6x128xf32>
    %c512_240 = arith.constant 512 : index
    %c0_241 = arith.constant 0 : index
    %220 = vector.load %arg9[%c512_240, %c0_241] : memref<1152x128xf32, #tpu.memory_space<vmem>>, vector<128x128xf32>
    %cst_242 = arith.constant dense<0.000000e+00> : vector<6x128xf32>
    %221 = tpu.matmul %219, %220, %cst_242 {dimension_numbers = #tpu.dot_dimension_numbers<[1], [0], [0], [1], [0, 0, 1, 1], [], []>} : vector<6x128xf32>, vector<128x128xf32>, vector<6x128xf32> -> vector<6x128xf32>
    %222 = arith.addf %218, %221 : vector<6x128xf32>
    %c6_243 = arith.constant 6 : index
    %c0_244 = arith.constant 0 : index
    %223 = vector.load %arg24[%c6_243, %c0_244] : memref<16x128xf32, #tpu.memory_space<vmem>>, vector<6x128xf32>
    %c640_245 = arith.constant 640 : index
    %c0_246 = arith.constant 0 : index
    %224 = vector.load %arg9[%c640_245, %c0_246] : memref<1152x128xf32, #tpu.memory_space<vmem>>, vector<128x128xf32>
    %cst_247 = arith.constant dense<0.000000e+00> : vector<6x128xf32>
    %225 = tpu.matmul %223, %224, %cst_247 {dimension_numbers = #tpu.dot_dimension_numbers<[1], [0], [0], [1], [0, 0, 1, 1], [], []>} : vector<6x128xf32>, vector<128x128xf32>, vector<6x128xf32> -> vector<6x128xf32>
    %226 = arith.addf %222, %225 : vector<6x128xf32>
    %c8_248 = arith.constant 8 : index
    %c0_249 = arith.constant 0 : index
    %227 = vector.load %arg24[%c8_248, %c0_249] : memref<16x128xf32, #tpu.memory_space<vmem>>, vector<6x128xf32>
    %c768_250 = arith.constant 768 : index
    %c0_251 = arith.constant 0 : index
    %228 = vector.load %arg9[%c768_250, %c0_251] : memref<1152x128xf32, #tpu.memory_space<vmem>>, vector<128x128xf32>
    %cst_252 = arith.constant dense<0.000000e+00> : vector<6x128xf32>
    %229 = tpu.matmul %227, %228, %cst_252 {dimension_numbers = #tpu.dot_dimension_numbers<[1], [0], [0], [1], [0, 0, 1, 1], [], []>} : vector<6x128xf32>, vector<128x128xf32>, vector<6x128xf32> -> vector<6x128xf32>
    %230 = arith.addf %226, %229 : vector<6x128xf32>
    %c9_253 = arith.constant 9 : index
    %c0_254 = arith.constant 0 : index
    %231 = vector.load %arg24[%c9_253, %c0_254] : memref<16x128xf32, #tpu.memory_space<vmem>>, vector<6x128xf32>
    %c896_255 = arith.constant 896 : index
    %c0_256 = arith.constant 0 : index
    %232 = vector.load %arg9[%c896_255, %c0_256] : memref<1152x128xf32, #tpu.memory_space<vmem>>, vector<128x128xf32>
    %cst_257 = arith.constant dense<0.000000e+00> : vector<6x128xf32>
    %233 = tpu.matmul %231, %232, %cst_257 {dimension_numbers = #tpu.dot_dimension_numbers<[1], [0], [0], [1], [0, 0, 1, 1], [], []>} : vector<6x128xf32>, vector<128x128xf32>, vector<6x128xf32> -> vector<6x128xf32>
    %234 = arith.addf %230, %233 : vector<6x128xf32>
    %c10_258 = arith.constant 10 : index
    %c0_259 = arith.constant 0 : index
    %235 = vector.load %arg24[%c10_258, %c0_259] : memref<16x128xf32, #tpu.memory_space<vmem>>, vector<6x128xf32>
    %c1024_260 = arith.constant 1024 : index
    %c0_261 = arith.constant 0 : index
    %236 = vector.load %arg9[%c1024_260, %c0_261] : memref<1152x128xf32, #tpu.memory_space<vmem>>, vector<128x128xf32>
    %cst_262 = arith.constant dense<0.000000e+00> : vector<6x128xf32>
    %237 = tpu.matmul %235, %236, %cst_262 {dimension_numbers = #tpu.dot_dimension_numbers<[1], [0], [0], [1], [0, 0, 1, 1], [], []>} : vector<6x128xf32>, vector<128x128xf32>, vector<6x128xf32> -> vector<6x128xf32>
    %238 = arith.addf %234, %237 : vector<6x128xf32>
    %c0_263 = arith.constant 0 : index
    %c0_264 = arith.constant 0 : index
    %239 = vector.load %arg10[%c0_263, %c0_264] : memref<1x128xf32, #tpu.memory_space<vmem>>, vector<1x128xf32>
    %240 = vector.broadcast %239 : vector<1x128xf32> to vector<6x128xf32>
    %241 = arith.addf %238, %240 : vector<6x128xf32>
    %cst_265 = arith.constant 0.000000e+00 : f32
    %242 = vector.broadcast %cst_265 : f32 to vector<6x128xf32>
    %243 = arith.maximumf %241, %242 : vector<6x128xf32>
    %c0_266 = arith.constant 0 : index
    %c0_267 = arith.constant 0 : index
    %244 = vector.load %arg25[%c0_266, %c0_267] : memref<16x128xf32, #tpu.memory_space<vmem>>, vector<6x128xf32>
    tpu.vector_store %arg25[%c0_266, %c0_267], %243 {strides = array<i32>} : memref<16x128xf32, #tpu.memory_space<vmem>>, vector<6x128xf32>,
    %c0_268 = arith.constant 0 : index
    %c0_269 = arith.constant 0 : index
    %245 = tpu.strided_load %arg25[%c0_268, %c0_269] {strides = array<i32: 2, 1>} : memref<16x128xf32, #tpu.memory_space<vmem>>, vector<4x128xf32>
    %c1_270 = arith.constant 1 : index
    %c0_271 = arith.constant 0 : index
    %246 = tpu.strided_load %arg25[%c1_270, %c0_271] {strides = array<i32: 2, 1>} : memref<16x128xf32, #tpu.memory_space<vmem>>, vector<4x128xf32>
    %247 = arith.maximumf %245, %246 : vector<4x128xf32>
    %c0_272 = arith.constant 0 : index
    %c0_273 = arith.constant 0 : index
    %248 = vector.load %arg26[%c0_272, %c0_273] : memref<144x128xf32, #tpu.memory_space<vmem>>, vector<4x128xf32>
    tpu.vector_store %arg26[%c0_272, %c0_273], %247 {strides = array<i32>} : memref<144x128xf32, #tpu.memory_space<vmem>>, vector<4x128xf32>,
    %c0_274 = arith.constant 0 : index
    %c0_275 = arith.constant 0 : index
    %249 = vector.load %arg26[%c0_274, %c0_275] : memref<144x128xf32, #tpu.memory_space<vmem>>, vector<1x128xf32>
    %c2_276 = arith.constant 2 : index
    %c0_277 = arith.constant 0 : index
    %250 = vector.load %arg26[%c2_276, %c0_277] : memref<144x128xf32, #tpu.memory_space<vmem>>, vector<1x128xf32>
    %251 = arith.maximumf %249, %250 : vector<1x128xf32>
    %c0_278 = arith.constant 0 : index
    %c0_279 = arith.constant 0 : index
    %252 = vector.load %arg27[%c0_278, %c0_279] : memref<1x128xf32, #tpu.memory_space<vmem>>, vector<1x128xf32>
    tpu.vector_store %arg27[%c0_278, %c0_279], %251 {strides = array<i32>} : memref<1x128xf32, #tpu.memory_space<vmem>>, vector<1x128xf32>,
    %c0_280 = arith.constant 0 : index
    %c0_281 = arith.constant 0 : index
    %253 = vector.load %arg27[%c0_280, %c0_281] : memref<1x128xf32, #tpu.memory_space<vmem>>, vector<1x128xf32>
    %c0_282 = arith.constant 0 : index
    %c0_283 = arith.constant 0 : index
    %c0_284 = arith.constant 0 : index
    %254 = vector.load %arg2[%c0_282, %c0_283, %c0_284] : memref<1x1x8xf32, #tpu.memory_space<vmem>>, vector<1x1x8xf32>
    %255 = vector.shape_cast %254 : vector<1x1x8xf32> to vector<1x8xf32>
    %c0_285 = arith.constant 0 : index
    %c0_286 = arith.constant 0 : index
    %256 = vector.load %arg11[%c0_285, %c0_286] : memref<128x64xf32, #tpu.memory_space<vmem>>, vector<128x64xf32>
    %cst_287 = arith.constant dense<0.000000e+00> : vector<1x64xf32>
    %257 = tpu.matmul %253, %256, %cst_287 {dimension_numbers = #tpu.dot_dimension_numbers<[1], [0], [0], [1], [0, 0, 1, 1], [], []>} : vector<1x128xf32>, vector<128x64xf32>, vector<1x64xf32> -> vector<1x64xf32>
    %c0_288 = arith.constant 0 : index
    %c0_289 = arith.constant 0 : index
    %258 = vector.load %arg12[%c0_288, %c0_289] : memref<8x64xf32, #tpu.memory_space<vmem>>, vector<8x64xf32>
    %cst_290 = arith.constant dense<0.000000e+00> : vector<1x64xf32>
    %259 = tpu.matmul %255, %258, %cst_290 {dimension_numbers = #tpu.dot_dimension_numbers<[1], [0], [0], [1], [0, 0, 1, 1], [], []>} : vector<1x8xf32>, vector<8x64xf32>, vector<1x64xf32> -> vector<1x64xf32>
    %260 = arith.addf %257, %259 : vector<1x64xf32>
    %c0_291 = arith.constant 0 : index
    %c0_292 = arith.constant 0 : index
    %261 = vector.load %arg13[%c0_291, %c0_292] : memref<1x64xf32, #tpu.memory_space<vmem>>, vector<1x64xf32>
    %262 = arith.addf %260, %261 : vector<1x64xf32>
    %cst_293 = arith.constant 0.000000e+00 : f32
    %263 = vector.broadcast %cst_293 : f32 to vector<1x64xf32>
    %264 = arith.maximumf %262, %263 : vector<1x64xf32>
    %c0_294 = arith.constant 0 : index
    %c0_295 = arith.constant 0 : index
    %265 = vector.load %arg14[%c0_294, %c0_295] : memref<64x32xf32, #tpu.memory_space<vmem>>, vector<64x32xf32>
    %cst_296 = arith.constant dense<0.000000e+00> : vector<1x32xf32>
    %266 = tpu.matmul %264, %265, %cst_296 {dimension_numbers = #tpu.dot_dimension_numbers<[1], [0], [0], [1], [0, 0, 1, 1], [], []>} : vector<1x64xf32>, vector<64x32xf32>, vector<1x32xf32> -> vector<1x32xf32>
    %c0_297 = arith.constant 0 : index
    %c0_298 = arith.constant 0 : index
    %267 = vector.load %arg15[%c0_297, %c0_298] : memref<1x32xf32, #tpu.memory_space<vmem>>, vector<1x32xf32>
    %268 = arith.addf %266, %267 : vector<1x32xf32>
    %cst_299 = arith.constant 0.000000e+00 : f32
    %269 = vector.broadcast %cst_299 : f32 to vector<1x32xf32>
    %270 = arith.maximumf %268, %269 : vector<1x32xf32>
    %c0_300 = arith.constant 0 : index
    %c0_301 = arith.constant 0 : index
    %271 = vector.load %arg16[%c0_300, %c0_301] : memref<32x1xf32, #tpu.memory_space<vmem>>, vector<32x1xf32>
    %cst_302 = arith.constant dense<0.000000e+00> : vector<1x1xf32>
    %272 = tpu.matmul %270, %271, %cst_302 {dimension_numbers = #tpu.dot_dimension_numbers<[1], [0], [0], [1], [0, 0, 1, 1], [], []>} : vector<1x32xf32>, vector<32x1xf32>, vector<1x1xf32> -> vector<1x1xf32>
    %c0_303 = arith.constant 0 : index
    %c0_304 = arith.constant 0 : index
    %273 = vector.load %arg17[%c0_303, %c0_304] : memref<1x1xf32, #tpu.memory_space<vmem>>, vector<1x1xf32>
    %274 = arith.addf %272, %273 : vector<1x1xf32>
    %c0_305 = arith.constant 0 : index
    %c0_306 = arith.constant 0 : index
    %c0_307 = arith.constant 0 : index
    %275 = vector.load %arg18[%c0_305, %c0_306, %c0_307] : memref<1x1x1xf32, #tpu.memory_space<vmem>>, vector<1x1x1xf32>
    %276 = vector.shape_cast %275 : vector<1x1x1xf32> to vector<1x1xf32>
    %277 = vector.shape_cast %274 : vector<1x1xf32> to vector<1x1x1xf32>
    tpu.vector_store %arg18[%c0_305, %c0_306, %c0_307], %277 {strides = array<i32>} : memref<1x1x1xf32, #tpu.memory_space<vmem>>, vector<1x1x1xf32>,
    return
  }
  func.func @transform_0(%arg0: i32) -> (i32, i32) {
    %c0_i32 = arith.constant 0 : i32
    %c0_i32_0 = arith.constant 0 : i32
    return %arg0, %c0_i32 : i32, i32
  }
  func.func @transform_1(%arg0: i32) -> (i32, i32, i32) {
    %c0_i32 = arith.constant 0 : i32
    %c0_i32_0 = arith.constant 0 : i32
    %c0_i32_1 = arith.constant 0 : i32
    return %arg0, %c0_i32, %c0_i32_0 : i32, i32, i32
  }
  func.func @transform_2(%arg0: i32) -> (i32, i32) {
    %c0_i32 = arith.constant 0 : i32
    %c0_i32_0 = arith.constant 0 : i32
    %c0_i32_1 = arith.constant 0 : i32
    return %c0_i32, %c0_i32_0 : i32, i32
  }
  func.func @transform_3(%arg0: i32) -> (i32, i32) {
    %c0_i32 = arith.constant 0 : i32
    %c0_i32_0 = arith.constant 0 : i32
    %c0_i32_1 = arith.constant 0 : i32
    return %c0_i32, %c0_i32_0 : i32, i32
  }
  func.func @transform_4(%arg0: i32) -> (i32, i32) {
    %c0_i32 = arith.constant 0 : i32
    %c0_i32_0 = arith.constant 0 : i32
    %c0_i32_1 = arith.constant 0 : i32
    return %c0_i32, %c0_i32_0 : i32, i32
  }
  func.func @transform_5(%arg0: i32) -> (i32, i32) {
    %c0_i32 = arith.constant 0 : i32
    %c0_i32_0 = arith.constant 0 : i32
    %c0_i32_1 = arith.constant 0 : i32
    return %c0_i32, %c0_i32_0 : i32, i32
  }
  func.func @transform_6(%arg0: i32) -> (i32, i32) {
    %c0_i32 = arith.constant 0 : i32
    %c0_i32_0 = arith.constant 0 : i32
    %c0_i32_1 = arith.constant 0 : i32
    return %c0_i32, %c0_i32_0 : i32, i32
  }
  func.func @transform_7(%arg0: i32) -> (i32, i32) {
    %c0_i32 = arith.constant 0 : i32
    %c0_i32_0 = arith.constant 0 : i32
    %c0_i32_1 = arith.constant 0 : i32
    return %c0_i32, %c0_i32_0 : i32, i32
  }
  func.func @transform_8(%arg0: i32) -> (i32, i32) {
    %c0_i32 = arith.constant 0 : i32
    %c0_i32_0 = arith.constant 0 : i32
    %c0_i32_1 = arith.constant 0 : i32
    return %c0_i32, %c0_i32_0 : i32, i32
  }
  func.func @transform_9(%arg0: i32) -> (i32, i32) {
    %c0_i32 = arith.constant 0 : i32
    %c0_i32_0 = arith.constant 0 : i32
    %c0_i32_1 = arith.constant 0 : i32
    return %c0_i32, %c0_i32_0 : i32, i32
  }
  func.func @transform_10(%arg0: i32) -> (i32, i32) {
    %c0_i32 = arith.constant 0 : i32
    %c0_i32_0 = arith.constant 0 : i32
    %c0_i32_1 = arith.constant 0 : i32
    return %c0_i32, %c0_i32_0 : i32, i32
  }
  func.func @transform_11(%arg0: i32) -> (i32, i32) {
    %c0_i32 = arith.constant 0 : i32
    %c0_i32_0 = arith.constant 0 : i32
    %c0_i32_1 = arith.constant 0 : i32
    return %c0_i32, %c0_i32_0 : i32, i32
  }
  func.func @transform_12(%arg0: i32) -> (i32, i32) {
    %c0_i32 = arith.constant 0 : i32
    %c0_i32_0 = arith.constant 0 : i32
    %c0_i32_1 = arith.constant 0 : i32
    return %c0_i32, %c0_i32_0 : i32, i32
  }
  func.func @transform_13(%arg0: i32) -> (i32, i32) {
    %c0_i32 = arith.constant 0 : i32
    %c0_i32_0 = arith.constant 0 : i32
    %c0_i32_1 = arith.constant 0 : i32
    return %c0_i32, %c0_i32_0 : i32, i32
  }
  func.func @transform_14(%arg0: i32) -> (i32, i32) {
    %c0_i32 = arith.constant 0 : i32
    %c0_i32_0 = arith.constant 0 : i32
    %c0_i32_1 = arith.constant 0 : i32
    return %c0_i32, %c0_i32_0 : i32, i32
  }
  func.func @transform_15(%arg0: i32) -> (i32, i32) {
    %c0_i32 = arith.constant 0 : i32
    %c0_i32_0 = arith.constant 0 : i32
    %c0_i32_1 = arith.constant 0 : i32
    return %c0_i32, %c0_i32_0 : i32, i32
  }
  func.func @transform_16(%arg0: i32) -> (i32, i32) {
    %c0_i32 = arith.constant 0 : i32
    %c0_i32_0 = arith.constant 0 : i32
    %c0_i32_1 = arith.constant 0 : i32
    return %c0_i32, %c0_i32_0 : i32, i32
  }
  func.func @transform_17(%arg0: i32) -> (i32, i32, i32) {
    %c0_i32 = arith.constant 0 : i32
    %c0_i32_0 = arith.constant 0 : i32
    %c0_i32_1 = arith.constant 0 : i32
    return %arg0, %c0_i32, %c0_i32_0 : i32, i32, i32
  }
}

</mosaic_0001>

<bundles_post_ra>
// kernel: dual_path_forward.1
= control target key start
LH: loop header
LB: loop body
LE: loop exit
PB: predicated region body
PF: predicated region fallthrough
CT: control target
= control target key end

     0   :  { %s3105_s26 = smov 0   ;;  %s4880_s0 = inlined_call_operand.vmem [shape: f32[576,18], index: 0, kind: input, shape index: {}]   ;;  %s4881_s1 = inlined_call_operand.vmem [shape: f32[2,1,8], index: 1, kind: input, shape index: {}]   ;;  %s4882_s2 = inlined_call_operand.vmem [shape: f32[18,128], index: 2, kind: input, shape index: {}]   ;;  %s4883_s3 = inlined_call_operand.vmem [shape: f32[1,128], index: 3, kind: input, shape index: {}]   ;;  %s4884_s4 = inlined_call_operand.vmem [shape: f32[1152,128], index: 4, kind: input, shape index: {}]   ;;  %s4885_s5 = inlined_call_operand.vmem [shape: f32[1,128], index: 5, kind: input, shape index: {}]   ;;  %s4886_s6 = inlined_call_operand.vmem [shape: f32[1152,128], index: 6, kind: input, shape index: {}]   ;;  %s4887_s7 = inlined_call_operand.vmem [shape: f32[1,128], index: 7, kind: input, shape index: {}]   ;;  %s4888_s8 = inlined_call_operand.vmem [shape: f32[1152,128], index: 8, kind: input, shape index: {}]   ;;  %s4889_s9 = inlined_call_operand.vmem [shape: f32[1,128], index: 9, kind: input, shape index: {}]   ;;  %s4890_s10 = inlined_call_operand.vmem [shape: f32[128,64], index: 10, kind: input, shape index: {}]   ;;  %s4891_s11 = inlined_call_operand.vmem [shape: f32[8,64], index: 11, kind: input, shape index: {}]   ;;  %s4892_s12 = inlined_call_operand.vmem [shape: f32[1,64], index: 12, kind: input, shape index: {}]   ;;  %s4893_s13 = inlined_call_operand.vmem [shape: f32[64,32], index: 13, kind: input, shape index: {}]   ;;  %s4894_s14 = inlined_call_operand.vmem [shape: f32[1,32], index: 14, kind: input, shape index: {}]   ;;  %s4895_s15 = inlined_call_operand.vmem [shape: f32[32,1], index: 15, kind: input, shape index: {}]   ;;  %s4896_s16 = inlined_call_operand.<no memory space> [shape: f32[1,1], index: 16, kind: input, shape index: {}]   ;;  %s4897_s17 = inlined_call_operand.vmem [shape: f32[2,1,1], index: 17, kind: output, shape index: {}]  }
   0x1   :  { %4898 = sst [smem:[#allocation12_spill]] %s4880_s0  ;;  %v22_v0 = vstv %s4896_s16 }
   0x2   :  { %4899 = sst [smem:[#allocation13_spill]] %s4881_s1  ;;  %23 = vst [vmem:[#allocation11] sm:$0x1] %v22_v0 }
   0x3 LB: > { %s3111_s27 = sadd.s32 4294967295, %s3009_s26   ;;  %p2942_p0 = scmp.ge.s32.totalorder %s3009_s26, 1  ;;  %s3009_s26 = sphi %s3105_s26, %s29_s26  }
   0x4   : > { %p498_p1 = scmp.lt.s32.totalorder %s3009_s26, 3 }
   0x6   : > { %p499_p2 = pnand %p2942_p0, %p498_p1 }
   0x7   : > { %s551_s20 = smul.u32 (!%p499_p2), 36, %s3111_s27  ;;  %s4900_s24 = sld [smem:[#allocation12_spill]] (!%p499_p2) }
   0x8   : > { %502 = sbr.rel (%p499_p2) target bundleno = 1465 (0x5b9), region = 88  ;;  %p557_p4 = scmp.lt.s32.totalorder (!%p499_p2), %s3111_s27, 1 }
   0x9   : > { %p552_p3 = scmp.lt.s32.totalorder (!%p499_p2), %s551_s20, 71  ;;  %s4901_s16 = sld [smem:[#allocation13_spill]] (!%p499_p2) }
   0xd   : > { %v581_v1 = vld [vmem:[%s4882_s2 + $0x10] sm:$0x3]  ;;  %vm635_vm0 = vcmask 1041408   ;;  %v580_v3 = vld [vmem:[%s4882_s2 + $0x8] sm:$0xff]  ;;  %v579_v4 = vld [vmem:[%s4882_s2] sm:$0xff]  ;;  %s4903_s20 = smov (!%p552_p3, %s551_s20), 71 }
   0xe   : > { %v754_v2 = vld [vmem:[%s4882_s2 + $0x10] sm:$0x3]  ;;  %2944 = vmatpush.msk.msra.mxu0 %vm635_vm0, %v581_v1  ;;  %s2943_s21 = sshll.u32 %s4903_s20, 3  ;;  %vm586_vm1 = vcmask 146432   ;;  %v3214_v42 = vld [vmem:[%s4883_s3] ss:$0 sm:$0xff] }
   0xf   : > { %2961 = vmatpush.msk.msra.mxu1 %vm635_vm0, %v754_v2  ;;  %s3133_s25 = scalar_lea.vmem %s4900_s24, %s2943_s21  ;;  %v913_v19 = vld [vmem:[%s4882_s2 + $0x10] sm:$0x3]  ;;  %v3219_v43 = vld [vmem:[%s4883_s3] ss:$0 sm:$0xff]  ;;  %v1172_v48 = vld [vmem:[%s4884_s4 + $0xf8] sm:$0xff]  ;;  %s4905_s27 = smov (!%p557_p4, %s3111_s27), 1 }
  0x10   : > { %653 = vmatpush.msra.mxu0 %v580_v3  ;;  %v563_v5 = vld [vmem:[%s3133_s25] sm:$0xff]  ;;  %v564_v7 = vld [vmem:[%s3133_s25 + $0x8] sm:$0xff]  ;;  %v565_v9 = vld [vmem:[%s3133_s25 + $0x10] sm:$0xff]  ;;  %2978 = vmatpush.msk.msra.mxu2 %vm635_vm0, %v913_v19  ;;  %s559_s0 = scalar_lea.vmem %s4901_s16, %s4905_s27  ;;  %vm2770_vm2 = vcmask 64512   ;;  %vm2826_vm3 = vcmask 523264   ;;  %vm2856_vm4 = vcmask 261120   ;;  %s562_s20 = scalar_lea.vmem %s4897_s17, %s4905_s27 }
  0x11   : > { %824 = vmatpush.msra.mxu1 %v580_v3  ;;  %v736_v6 = vld [vmem:[%s3133_s25 + $0x80] sm:$0xff]  ;;  %v737_v8 = vld [vmem:[%s3133_s25 + $0x88] sm:$0xff]  ;;  %v738_v10 = vld [vmem:[%s3133_s25 + $0x90] sm:$0xff]  ;;  %1173 = vmatpush.msra.mxu3 %v1172_v48  ;;  %vm2880_vm5 = vcmask 0  }
  0x12   : > { %654 = vmatpush.msra.mxu0 %v579_v4  ;;  %v566_v11 = vld [vmem:[%s3133_s25 + $0x18] sm:$0xff]  ;;  %v567_v13 = vld [vmem:[%s3133_s25 + $0x20] sm:$0xff]  ;;  %v568_v15 = vld [vmem:[%s3133_s25 + $0x28] sm:$0xff]  ;;  %947 = vmatpush.msra.mxu2 %v580_v3 }
  0x13   : > { %825 = vmatpush.msra.mxu1 %v579_v4  ;;  %2945 = vmatmul.msk.f32.vlgmr.msra.gmra.mxu0 %vm586_vm1, %v563_v5  ;;  %v739_v12 = vld [vmem:[%s3133_s25 + $0x98] sm:$0xff]  ;;  %v740_v14 = vld [vmem:[%s3133_s25 + $0xa0] sm:$0xff]  ;;  %v741_v16 = vld [vmem:[%s3133_s25 + $0xa8] sm:$0xff] }
  0x14   : > { %2962 = vmatmul.msk.f32.vlgmr.msra.gmra.mxu1 %vm586_vm1, %v736_v6  ;;  %v569_v17 = vld [vmem:[%s3133_s25 + $0x30] sm:$0xff]  ;;  %v570_v20 = vld [vmem:[%s3133_s25 + $0x38] sm:$0xff]  ;;  %948 = vmatpush.msra.mxu2 %v579_v4  ;;  %v907_v22 = vld [vmem:[%s3133_s25 + $0x100] sm:$0xff] }
  0x15   : > { %v742_v18 = vld [vmem:[%s3133_s25 + $0xb0] sm:$0xff]  ;;  %v743_v21 = vld [vmem:[%s3133_s25 + $0xb8] sm:$0xff]  ;;  %2979 = vmatmul.msk.f32.vlgmr.msra.gmra.mxu2 %vm586_vm1, %v907_v22  ;;  %v571_v23 = vld [vmem:[%s3133_s25 + $0x40] sm:$0xff] }
  0x16   : > { %v744_v24 = vld [vmem:[%s3133_s25 + $0xc0] sm:$0xff]  ;;  %v908_v25 = vld [vmem:[%s3133_s25 + $0x108] sm:$0xff]  ;;  %v909_v28 = vld [vmem:[%s3133_s25 + $0x110] sm:$0xff] }
  0x17   : > { %v572_v26 = vld [vmem:[%s3133_s25 + $0x48] sm:$0xff]  ;;  %v573_v29 = vld [vmem:[%s3133_s25 + $0x50] sm:$0xff]  ;;  %v910_v31 = vld [vmem:[%s3133_s25 + $0x118] sm:$0xff] }
  0x18   : > { %v745_v27 = vld [vmem:[%s3133_s25 + $0xc8] sm:$0xff]  ;;  %v746_v30 = vld [vmem:[%s3133_s25 + $0xd0] sm:$0xff]  ;;  %v574_v32 = vld [vmem:[%s3133_s25 + $0x58] sm:$0xff] }
  0x19   : > { %v747_v33 = vld [vmem:[%s3133_s25 + $0xd8] sm:$0xff]  ;;  %v575_v34 = vld [vmem:[%s3133_s25 + $0x60] sm:$0xff]  ;;  %v576_v36 = vld [vmem:[%s3133_s25 + $0x68] sm:$0xff] }
  0x1a   : > { %v748_v35 = vld [vmem:[%s3133_s25 + $0xe0] sm:$0xff]  ;;  %v749_v37 = vld [vmem:[%s3133_s25 + $0xe8] sm:$0xff]  ;;  %v577_v38 = vld [vmem:[%s3133_s25 + $0x70] sm:$0xff] }
  0x1b   : > { %2946 = vmatmul.msk.f32.gmra.mxu0 %vm586_vm1, %v564_v7  ;;  %v750_v39 = vld [vmem:[%s3133_s25 + $0xf0] sm:$0xff]  ;;  %v578_v40 = vld [vmem:[%s3133_s25 + $0x78] sm:$0xff]  ;;  %v1170_v56 = vld [vmem:[%s4884_s4 + $0xe8] sm:$0xff] }
  0x1c   : > { %2963 = vmatmul.msk.f32.gmra.mxu1 %vm586_vm1, %v737_v8  ;;  %v751_v41 = vld [vmem:[%s3133_s25 + $0xf8] sm:$0xff]  ;;  %v1171_v53 = vld [vmem:[%s4884_s4 + $0xf0] sm:$0xff]  ;;  %v1144_v57 = vld [vmem:[%s4884_s4 + $0x68] sm:$0xff] }
  0x1d   : > { %2980 = vmatmul.msk.f32.gmra.mxu2 %vm586_vm1, %v908_v25  ;;  %v1146_v49 = vld [vmem:[%s4884_s4 + $0x78] sm:$0xff]  ;;  %v1145_v54 = vld [vmem:[%s4884_s4 + $0x70] sm:$0xff]  ;;  %1174 = vmatpush.msra.mxu3 %v1171_v53  ;;  %v1456_v58 = vld [vmem:[%s4884_s4 + $0x268] sm:$0xff] }
  0x1e   : > { %v1458_v50 = vld [vmem:[%s4884_s4 + $0x278] sm:$0xff]  ;;  %1220 = vmatpush.msrb.mxu2 %v1146_v49  ;;  %v1457_v55 = vld [vmem:[%s4884_s4 + $0x270] sm:$0xff]  ;;  %v1169_v59 = vld [vmem:[%s4884_s4 + $0xe0] sm:$0xff] }
  0x1f   : > { %1459 = vmatpush.msrb.mxu0 %v1458_v50  ;;  %1175 = vmatpush.msra.mxu3 %v1170_v56  ;;  %v1143_v60 = vld [vmem:[%s4884_s4 + $0x60] sm:$0xff]  ;;  %v1168_v2 = vld [vmem:[%s4884_s4 + $0xd8] sm:$0xff]  ;;  %v1167_v8 = vld [vmem:[%s4884_s4 + $0xd0] sm:$0xff] }
  0x20   : > { %1221 = vmatpush.msrb.mxu2 %v1145_v54  ;;  %v1455_v61 = vld [vmem:[%s4884_s4 + $0x260] sm:$0xff]  ;;  %v1142_v3 = vld [vmem:[%s4884_s4 + $0x58] sm:$0xff]  ;;  %v3011_v54 = vmov 0.0  }
  0x21   : > { %1460 = vmatpush.msrb.mxu0 %v1457_v55  ;;  %1176 = vmatpush.msra.mxu3 %v1169_v59  ;;  %v1541_v4 = vld [vmem:[%s4884_s4 + $0x2f8] sm:$0xff]  ;;  %v1447_v50 = vld [vmem:[%s4884_s4 + $0x220] sm:$0xff]  ;;  %1077 = vst [vmem:[#allocation3] sm:$0xff] %v3011_v54  ;;  %v1133_v59 = vld [vmem:[%s4884_s4 + $0x10] sm:$0xff] }
  0x22   : > { %1222 = vmatpush.msrb.mxu2 %v1144_v57  ;;  %v1454_v5 = vld [vmem:[%s4884_s4 + $0x258] sm:$0xff]  ;;  %1542 = vmatpush.msrb.mxu1 %v1541_v4  ;;  %1078 = vst [vmem:[#allocation3 + $0x8] sm:$0x7] %v3011_v54  ;;  %v1157_v4 = vld [vmem:[%s4884_s4 + $0x80] sm:$0xff] }
  0x23   : > { %2947 = vmatmul.msk.f32.gmra.mxu0 %vm586_vm1, %v565_v9  ;;  %1177 = vmatpush.msra.mxu3 %v1168_v2  ;;  %v1141_v9 = vld [vmem:[%s4884_s4 + $0x50] sm:$0xff]  ;;  %v1138_v25 = vld [vmem:[%s4884_s4 + $0x38] sm:$0xff]  ;;  %1079 = vst [vmem:[#allocation3 + $0x5b] sm:$0xff] %v3011_v54 }
  0x24   : > { %2964 = vmatmul.msk.f32.gmra.mxu1 %vm586_vm1, %v738_v10  ;;  %1461 = vmatpush.msrb.mxu0 %v1456_v58  ;;  %v1540_v10 = vld [vmem:[%s4884_s4 + $0x2f0] sm:$0xff]  ;;  %v1533_v53 = vld [vmem:[%s4884_s4 + $0x2b8] sm:$0xff]  ;;  %1080 = vst [vmem:[#allocation3 + $0x63] sm:$0x1] %v3011_v54 }
  0x25   : > { %2981 = vmatmul.msk.f32.gmra.mxu2 %vm586_vm1, %v909_v28  ;;  %1178 = vmatpush.msra.mxu3 %v1167_v8  ;;  %v1446_v57 = vld [vmem:[%s4884_s4 + $0x218] sm:$0xff]  ;;  %v1159_v58 = vld [vmem:[%s4884_s4 + $0x90] sm:$0xff]  ;;  %1085 = vst [vmem:[#allocation3 + $0x13] sm:$0x3] %v3011_v54 }
  0x26   : > { %1223 = vmatpush.msrb.mxu2 %v1143_v60  ;;  %1462 = vmatpush.msrb.mxu0 %v1455_v61  ;;  %v1532_v60 = vld [vmem:[%s4884_s4 + $0x2b0] sm:$0xff]  ;;  %1090 = vst [vmem:[#allocation3 + $0x1d] sm:$0x3] %v3011_v54 }
  0x27   : > { %1543 = vmatpush.msrb.mxu1 %v1540_v10  ;;  %v1445_v61 = vld [vmem:[%s4884_s4 + $0x210] sm:$0xff]  ;;  %1095 = vst [vmem:[#allocation3 + $0x27] sm:$0x3] %v3011_v54 }
  0x28   : > { %1224 = vmatpush.msrb.mxu2 %v1142_v3  ;;  %1463 = vmatpush.msrb.mxu0 %v1454_v5  ;;  %v1131_v5 = vld [vmem:[%s4884_s4] sm:$0xff]  ;;  %1100 = vst [vmem:[#allocation3 + $0x31] sm:$0x3] %v3011_v54 }
  0x29   : > { %v1147_v10 = vld [vmem:[#allocation3 + $0x1] sm:$0xff]  ;;  %1105 = vst [vmem:[#allocation3 + $0x3b] sm:$0x3] %v3011_v54 }
  0x2a   : > { %1225 = vmatpush.msrb.mxu2 %v1141_v9  ;;  %v1443_v9 = vld [vmem:[%s4884_s4 + $0x200] sm:$0xff]  ;;  %1110 = vst [vmem:[#allocation3 + $0x45] sm:$0x3] %v3011_v54 }
  0x2b   : > { %2948 = vmatmul.msk.f32.gmra.mxu0 %vm586_vm1, %v566_v11  ;;  %v1453_v11 = vld [vmem:[%s4884_s4 + $0x250] sm:$0xff]  ;;  %1115 = vst [vmem:[#allocation3 + $0x4f] sm:$0x3] %v3011_v54 }
  0x2c   : > { %2965 = vmatmul.msk.f32.gmra.mxu1 %vm586_vm1, %v739_v12  ;;  %v1166_v12 = vld [vmem:[%s4884_s4 + $0xc8] sm:$0xff]  ;;  %1464 = vmatpush.msrb.mxu0 %v1453_v11  ;;  %v1529_v11 = vld [vmem:[%s4884_s4 + $0x298] sm:$0xff]  ;;  %1120 = vst [vmem:[#allocation3 + $0x59] sm:$0x3] %v3011_v54 }
  0x2d   : > { %2982 = vmatmul.msk.f32.gmra.mxu2 %vm586_vm1, %v910_v31  ;;  %1179 = vmatpush.msra.mxu3 %v1166_v12  ;;  %v1137_v31 = vld [vmem:[%s4884_s4 + $0x30] sm:$0xff]  ;;  %1911 = vst [vmem:[#allocation5] sm:$0x7f] %v3011_v54 }
  0x2e   : > { %1912 = vst [vmem:[#allocation5 + $0x1f] sm:$0x1f] %v3011_v54 }
  0x2f   : > { %1917 = vst [vmem:[#allocation5 + $0xb] sm:$0x3] %v3011_v54 }
  0x30   : > { %1922 = vst [vmem:[#allocation5 + $0x11] sm:$0x3] %v3011_v54 }
  0x31   : > { %1927 = vst [vmem:[#allocation5 + $0x17] sm:$0x3] %v3011_v54 }
  0x32   : > { %1932 = vst [vmem:[#allocation5 + $0x1d] sm:$0x3] %v3011_v54 }
  0x33   : > { %2949 = vmatmul.msk.f32.gmra.mxu0 %vm586_vm1, %v567_v13  ;;  %v1140_v13 = vld [vmem:[%s4884_s4 + $0x48] sm:$0xff]  ;;  %2383 = vst [vmem:[#allocation7] sm:$0x1f] %v3011_v54 }
  0x34   : > { %2966 = vmatmul.msk.f32.gmra.mxu1 %vm586_vm1, %v740_v14  ;;  %v1539_v14 = vld [vmem:[%s4884_s4 + $0x2e8] sm:$0xff]  ;;  %1226 = vmatpush.msrb.mxu2 %v1140_v13  ;;  %2384 = vst [vmem:[#allocation7 + $0xd] sm:$0x7] %v3011_v54 }
  0x35   : > { %1544 = vmatpush.msrb.mxu1 %v1539_v14  ;;  %2389 = vst [vmem:[#allocation7 + $0x7] sm:$0x3] %v3011_v54 }
  0x36   : > { %2394 = vst [vmem:[#allocation7 + $0xb] sm:$0x3] %v3011_v54 }
  0x3b   : > { %2950 = vmatmul.msk.f32.gmra.mxu0 %vm586_vm1, %v568_v15  ;;  %v1452_v15 = vld [vmem:[%s4884_s4 + $0x248] sm:$0xff] }
  0x3c   : > { %2967 = vmatmul.msk.f32.gmra.mxu1 %vm586_vm1, %v741_v16  ;;  %v1165_v16 = vld [vmem:[%s4884_s4 + $0xc0] sm:$0xff]  ;;  %1465 = vmatpush.msrb.mxu0 %v1452_v15 }
  0x3d   : > { %1180 = vmatpush.msra.mxu3 %v1165_v16 }
  0x43   : > { %2951 = vmatmul.msk.f32.gmra.mxu0 %vm586_vm1, %v569_v17  ;;  %v1139_v17 = vld [vmem:[%s4884_s4 + $0x40] sm:$0xff] }
  0x44   : > { %2968 = vmatmul.msk.f32.gmra.mxu1 %vm586_vm1, %v742_v18  ;;  %v1538_v18 = vld [vmem:[%s4884_s4 + $0x2e0] sm:$0xff]  ;;  %1227 = vmatpush.msrb.mxu2 %v1139_v17 }
  0x45   : > { %1545 = vmatpush.msrb.mxu1 %v1538_v18 }
  0x46   : > { %1228 = vmatpush.msrb.mxu2 %v1138_v25 }
  0x48   : > { %1229 = vmatpush.msrb.mxu2 %v1137_v31 }
  0x4b   : > { %2952 = vmatmul.msk.f32.gmra.mxu0 %vm586_vm1, %v570_v20 }
  0x4c   : > { %2969 = vmatmul.msk.f32.gmra.mxu1 %vm586_vm1, %v743_v21  ;;  %v1451_v21 = vld [vmem:[%s4884_s4 + $0x240] sm:$0xff] }
  0x4d   : > { %1466 = vmatpush.msrb.mxu0 %v1451_v21  ;;  %v1527_v21 = vld [vmem:[%s4884_s4 + $0x288] sm:$0xff] }
  0x53   : > { %2953 = vmatmul.msk.f32.gmra.mxu0 %vm586_vm1, %v571_v23 }
  0x54   : > { %2970 = vmatmul.msk.f32.gmra.mxu1 %vm586_vm1, %v744_v24  ;;  %v1164_v24 = vld [vmem:[%s4884_s4 + $0xb8] sm:$0xff] }
  0x55   : > { %1181 = vmatpush.msra.mxu3 %v1164_v24  ;;  %v1526_v24 = vld [vmem:[%s4884_s4 + $0x280] sm:$0xff] }
  0x5b   : > { %2954 = vmatmul.msk.f32.gmra.mxu0 %vm586_vm1, %v572_v26  ;;  %v1537_v26 = vld [vmem:[%s4884_s4 + $0x2d8] sm:$0xff] }
  0x5c   : > { %2971 = vmatmul.msk.f32.gmra.mxu1 %vm586_vm1, %v745_v27  ;;  %v1450_v27 = vld [vmem:[%s4884_s4 + $0x238] sm:$0xff] }
  0x5d   : > { %1546 = vmatpush.msrb.mxu1 %v1537_v26  ;;  %1467 = vmatpush.msrb.mxu0 %v1450_v27 }
  0x63   : > { %2955 = vmatmul.msk.f32.gmra.mxu0 %vm586_vm1, %v573_v29 }
  0x64   : > { %2972 = vmatmul.msk.f32.gmra.mxu1 %vm586_vm1, %v746_v30  ;;  %v1163_v30 = vld [vmem:[%s4884_s4 + $0xb0] sm:$0xff] }
  0x65   : > { %1182 = vmatpush.msra.mxu3 %v1163_v30 }
  0x6b   : > { %2956 = vmatmul.msk.f32.gmra.mxu0 %vm586_vm1, %v574_v32  ;;  %v1536_v32 = vld [vmem:[%s4884_s4 + $0x2d0] sm:$0xff] }
  0x6c   : > { %2973 = vmatmul.msk.f32.gmra.mxu1 %vm586_vm1, %v747_v33  ;;  %v1449_v33 = vld [vmem:[%s4884_s4 + $0x230] sm:$0xff] }
  0x6d   : > { %1547 = vmatpush.msrb.mxu1 %v1536_v32  ;;  %1468 = vmatpush.msrb.mxu0 %v1449_v33 }
  0x73   : > { %2957 = vmatmul.msk.f32.gmra.mxu0 %vm586_vm1, %v575_v34 }
  0x74   : > { %2974 = vmatmul.msk.f32.gmra.mxu1 %vm586_vm1, %v748_v35 }
  0x7b   : > { %2958 = vmatmul.msk.f32.gmra.mxu0 %vm586_vm1, %v576_v36  ;;  %v1162_v36 = vld [vmem:[%s4884_s4 + $0xa8] sm:$0xff] }
  0x7c   : > { %2975 = vmatmul.msk.f32.gmra.mxu1 %vm586_vm1, %v749_v37  ;;  %1183 = vmatpush.msra.mxu3 %v1162_v36 }
  0x83   : > { %2959 = vmatmul.msk.f32.gmra.mxu0 %vm586_vm1, %v577_v38  ;;  %v1136_v38 = vld [vmem:[%s4884_s4 + $0x28] sm:$0xff] }
  0x84   : > { %2976 = vmatmul.msk.f32.gmra.mxu1 %vm586_vm1, %v750_v39  ;;  %v1535_v39 = vld [vmem:[%s4884_s4 + $0x2c8] sm:$0xff]  ;;  %1230 = vmatpush.msrb.mxu2 %v1136_v38 }
  0x85   : > { %1548 = vmatpush.msrb.mxu1 %v1535_v39 }
  0x8b   : > { %2960 = vmatmul.msk.f32.gmra.mxu0 %vm586_vm1, %v578_v40  ;;  %v1448_v40 = vld [vmem:[%s4884_s4 + $0x228] sm:$0xff] }
  0x8c   : > { %2977 = vmatmul.msk.f32.gmra.mxu1 %vm586_vm1, %v751_v41  ;;  %1469 = vmatpush.msrb.mxu0 %v1448_v40 }
  0x8e   : > { %1470 = vmatpush.msrb.mxu0 %v1447_v50 }
  0x90   : > { %v656_v44 = vpop.f32.mrf.mxu0  ;;  %1471 = vmatpush.msrb.mxu0 %v1446_v57 }
  0x91   : > { %v827_v45 = vpop.f32.mrf.mxu1  ;;  %v657_v46 = vadd.f32 %v3214_v42, %v656_v44 }
  0x92   : > { %v828_v47 = vadd.f32 %v3219_v43, %v827_v45  ;;  %v1161_v45 = vld [vmem:[%s4884_s4 + $0xa0] sm:$0xff]  ;;  %1472 = vmatpush.msrb.mxu0 %v1445_v61 }
  0x93   : > { %v704_v51 = vmax.f32 %v657_v46, 0.0  ;;  %v1135_v46 = vld [vmem:[%s4884_s4 + $0x20] sm:$0xff]  ;;  %1184 = vmatpush.msra.mxu3 %v1161_v45 }
  0x94   : > { %v875_v52 = vmax.f32 %v828_v47, 0.0  ;;  %v1534_v47 = vld [vmem:[%s4884_s4 + $0x2c0] sm:$0xff]  ;;  %1231 = vmatpush.msrb.mxu2 %v1135_v46 }
  0x95   : > { %720 = vst [vmem:[#allocation2] sm:$0xff] %v704_v51  ;;  %1549 = vmatpush.msrb.mxu1 %v1534_v47  ;;  %v1160_v51 = vld [vmem:[%s4884_s4 + $0x98] sm:$0xff] }
  0x96   : > { %891 = vst [vmem:[#allocation2 + $0x80] sm:$0xff] %v875_v52  ;;  %v1134_v52 = vld [vmem:[%s4884_s4 + $0x18] sm:$0xff]  ;;  %1185 = vmatpush.msra.mxu3 %v1160_v51 }
  0x97   : > { %1232 = vmatpush.msrb.mxu2 %v1134_v52  ;;  %1550 = vmatpush.msrb.mxu1 %v1533_v53 }
  0x98   : > { %v659_v62 = vpop.f32.mrf.mxu0  ;;  %1186 = vmatpush.msra.mxu3 %v1159_v58 }
  0x99   : > { %v830_v63 = vpop.f32.mrf.mxu1  ;;  %v660_v0 = vadd.f32 %v3214_v42, %v659_v62  ;;  %1233 = vmatpush.msrb.mxu2 %v1133_v59  ;;  %1551 = vmatpush.msrb.mxu1 %v1532_v60  ;;  %v1158_v62 = vld [vmem:[%s4884_s4 + $0x88] sm:$0xff]  ;;  %v950_v59 = vpop.f32.mrf.mxu2 }
  0x9a   : > { %v831_v1 = vadd.f32 %v3219_v43, %v830_v63  ;;  %v1132_v63 = vld [vmem:[%s4884_s4 + $0x8] sm:$0xff]  ;;  %1187 = vmatpush.msra.mxu3 %v1158_v62 }
  0x9b   : > { %v705_v6 = vmax.f32 %v660_v0, 0.0  ;;  %v1531_v0 = vld [vmem:[%s4884_s4 + $0x2a8] sm:$0xff]  ;;  %1234 = vmatpush.msrb.mxu2 %v1132_v63 }
  0x9c   : > { %v876_v7 = vmax.f32 %v831_v1, 0.0  ;;  %v1444_v1 = vld [vmem:[%s4884_s4 + $0x208] sm:$0xff]  ;;  %1552 = vmatpush.msrb.mxu1 %v1531_v0  ;;  %1188 = vmatpush.msra.mxu3 %v1157_v4 }
  0x9d   : > { %721 = vst [vmem:[#allocation2 + $0x8] sm:$0xff] %v705_v6  ;;  %v1530_v6 = vld [vmem:[%s4884_s4 + $0x2a0] sm:$0xff]  ;;  %1473 = vmatpush.msrb.mxu0 %v1444_v1  ;;  %1235 = vmatpush.msrb.mxu2 %v1131_v5 }
  0x9e   : > { %892 = vst [vmem:[#allocation2 + $0x88] sm:$0xff] %v876_v7  ;;  %1553 = vmatpush.msrb.mxu1 %v1530_v6  ;;  %1236 = vmatmul.f32.vlgmr.msrb.gmra.mxu2 %v3011_v54 }
  0x9f   : > { %1189 = vmatmul.f32.vlgmr.msra.gmra.mxu3 %v1147_v10  ;;  %1474 = vmatpush.msrb.mxu0 %v1443_v9  ;;  %v2999_v10 = vld [vmem:[%s4883_s3] ss:$0 sm:$0xff] }
  0xa0   : > { %v662_v19 = vpop.f32.mrf.mxu0  ;;  %1554 = vmatpush.msrb.mxu1 %v1529_v11 }
  0xa1   : > { %v833_v20 = vpop.f32.mrf.mxu1  ;;  %v663_v22 = vadd.f32 %v3214_v42, %v662_v19  ;;  %v1528_v19 = vld [vmem:[%s4884_s4 + $0x290] sm:$0xff]  ;;  %v953_v11 = vpop.f32.mrf.mxu2 }
  0xa2   : > { %v834_v23 = vadd.f32 %v3219_v43, %v833_v20  ;;  %1555 = vmatpush.msrb.mxu1 %v1528_v19 }
  0xa3   : > { %v706_v28 = vmax.f32 %v663_v22, 0.0 }
  0xa4   : > { %v877_v29 = vmax.f32 %v834_v23, 0.0  ;;  %1556 = vmatpush.msrb.mxu1 %v1527_v21  ;;  %v970_v47 = vld [vmem:[#allocation2] ss:$2 sm:$0xff] }
  0xa5   : > { %v986_v34 = vld [vmem:[#allocation2 + $0x80] ss:$2 sm:$0xff]  ;;  %v1022_v35 = vld [vmem:[#allocation2 + $0x81] ss:$2 sm:$0xff]  ;;  %722 = vst [vmem:[#allocation2 + $0x10] sm:$0xff] %v706_v28 }
  0xa6   : > { %v1049_v37 = vmax.f32 %v986_v34, %v1022_v35  ;;  %893 = vst [vmem:[#allocation2 + $0x90] sm:$0xff] %v877_v29  ;;  %1557 = vmatpush.msrb.mxu1 %v1526_v24 }
  0xa8   : > { %1067 = vst [vmem:[#allocation9 + $0x40] sm:$0xff] %v1049_v37  ;;  %v665_v41 = vpop.f32.mrf.mxu0 }
  0xa9   : > { %v836_v44 = vpop.f32.mrf.mxu1  ;;  %v666_v48 = vadd.f32 %v3214_v42, %v665_v41 }
  0xaa   : > { %v837_v49 = vadd.f32 %v3219_v43, %v836_v44 }
  0xab   : > { %v707_v55 = vmax.f32 %v666_v48, 0.0  ;;  %v1006_v48 = vld [vmem:[#allocation2 + $0x1] ss:$2 sm:$0xff] }
  0xac   : > { %v878_v56 = vmax.f32 %v837_v49, 0.0  ;;  %v1041_v51 = vmax.f32 %v970_v47, %v1006_v48 }
  0xad   : > { %723 = vst [vmem:[#allocation2 + $0x18] sm:$0xff] %v707_v55 }
  0xae   : > { %894 = vst [vmem:[#allocation2 + $0x98] sm:$0xff] %v878_v56 }
  0xb0   : > { %v668_v2 = vpop.f32.mrf.mxu0 }
  0xb1   : > { %v839_v3 = vpop.f32.mrf.mxu1  ;;  %v669_v7 = vadd.f32 %v3214_v42, %v668_v2 }
  0xb2   : > { %v840_v8 = vadd.f32 %v3219_v43, %v839_v3 }
  0xb3   : > { %v708_v12 = vmax.f32 %v669_v7, 0.0 }
  0xb4   : > { %v879_v13 = vmax.f32 %v840_v8, 0.0  ;;  %v972_v14 = vld [vmem:[#allocation2 + $0x10] ss:$2 sm:$0xff]  ;;  %v1008_v15 = vld [vmem:[#allocation2 + $0x11] ss:$2 sm:$0xff] }
  0xb5   : > { %v1042_v16 = vmax.f32 %v972_v14, %v1008_v15  ;;  %v3424_v17 = vld [vmem:[#allocation2 + $0x90] ss:$2 sm:$0xff]  ;;  %v3426_v18 = vld [vmem:[#allocation2 + $0x91] ss:$2 sm:$0xff]  ;;  %724 = vst [vmem:[#allocation2 + $0x20] sm:$0xff] %v708_v12  ;;  %v951_v14 = vadd.f32 %v2999_v10, %v950_v59 }
  0xb6   : > { %v1050_v20 = vmax.f32 %v3424_v17, %v3426_v18  ;;  %895 = vst [vmem:[#allocation2 + $0xa0] sm:$0xff] %v879_v13 }
  0xb7   : > { %1060 = vst [vmem:[#allocation9 + $0x8] sm:$0xff] %v1042_v16  ;;  %v962_v15 = vmax.f32 %v951_v14, 0.0  ;;  %v1374_v14 = vld [vmem:[%s4884_s4 + $0x1f0] sm:$0xff] }
  0xb8   : > { %v671_v22 = vpop.f32.mrf.mxu0 }
  0xb9   : > { %v842_v23 = vpop.f32.mrf.mxu1  ;;  %v672_v25 = vadd.f32 %v3214_v42, %v671_v22  ;;  %966 = vst [vmem:[#allocation2 + $0x100] sm:$0xff] %v962_v15  ;;  %v1290_v15 = vld [vmem:[%s4884_s4 + $0x168] sm:$0xff] }
  0xba   : > { %v843_v26 = vadd.f32 %v3219_v43, %v842_v23 }
  0xbb   : > { %v709_v27 = vmax.f32 %v672_v25, 0.0  ;;  %v956_v25 = vpop.f32.mrf.mxu2 }
  0xbc   : > { %v880_v28 = vmax.f32 %v843_v26, 0.0 }
  0xbd   : > { %725 = vst [vmem:[#allocation2 + $0x28] sm:$0xff] %v709_v27 }
  0xbe   : > { %896 = vst [vmem:[#allocation2 + $0xa8] sm:$0xff] %v880_v28 }
  0xc0   : > { %v674_v29 = vpop.f32.mrf.mxu0 }
  0xc1   : > { %v845_v30 = vpop.f32.mrf.mxu1  ;;  %v675_v31 = vadd.f32 %v3214_v42, %v674_v29 }
  0xc2   : > { %v846_v32 = vadd.f32 %v3219_v43, %v845_v30 }
  0xc3   : > { %v710_v33 = vmax.f32 %v675_v31, 0.0 }
  0xc4   : > { %v881_v34 = vmax.f32 %v846_v32, 0.0  ;;  %v974_v35 = vld [vmem:[#allocation2 + $0x20] ss:$2 sm:$0xff]  ;;  %v1010_v36 = vld [vmem:[#allocation2 + $0x21] ss:$2 sm:$0xff] }
  0xc5   : > { %v1043_v37 = vmax.f32 %v974_v35, %v1010_v36  ;;  %v990_v38 = vld [vmem:[#allocation2 + $0xa0] ss:$2 sm:$0xff]  ;;  %v1026_v39 = vld [vmem:[#allocation2 + $0xa1] ss:$2 sm:$0xff]  ;;  %726 = vst [vmem:[#allocation2 + $0x30] sm:$0xff] %v710_v33  ;;  %v1292_v35 = vld [vmem:[%s4884_s4 + $0x178] sm:$0xff] }
  0xc6   : > { %v1051_v40 = vmax.f32 %v990_v38, %v1026_v39  ;;  %897 = vst [vmem:[#allocation2 + $0xb0] sm:$0xff] %v881_v34  ;;  %v957_v34 = vadd.f32 %v2999_v10, %v956_v25  ;;  %v1375_v36 = vld [vmem:[%s4884_s4 + $0x1f8] sm:$0xff]  ;;  %1293 = vmatpush.msrb.mxu3 %v1292_v35  ;;  %v1285_v35 = vld [vmem:[%s4884_s4 + $0x140] sm:$0xff] }
  0xc7   : > { %1061 = vst [vmem:[#allocation9 + $0x10] sm:$0xff] %v1043_v37  ;;  %v1291_v37 = vld [vmem:[%s4884_s4 + $0x170] sm:$0xff]  ;;  %1376 = vmatpush.msra.mxu2 %v1375_v36  ;;  %v1288_v25 = vld [vmem:[%s4884_s4 + $0x158] sm:$0xff] }
  0xc8   : > { %1069 = vst [vmem:[#allocation9 + $0x50] sm:$0xff] %v1051_v40  ;;  %v677_v41 = vpop.f32.mrf.mxu0  ;;  %v959_v40 = vpop.f32.mrf.mxu2  ;;  %v964_v47 = vmax.f32 %v957_v34, 0.0  ;;  %1294 = vmatpush.msrb.mxu3 %v1291_v37  ;;  %v1369_v34 = vld [vmem:[%s4884_s4 + $0x1c8] sm:$0xff] }
  0xc9   : > { %v848_v44 = vpop.f32.mrf.mxu1  ;;  %v678_v45 = vadd.f32 %v3214_v42, %v677_v41  ;;  %1377 = vmatpush.msra.mxu2 %v1374_v14 }
  0xca   : > { %v849_v46 = vadd.f32 %v3219_v43, %v848_v44  ;;  %v960_v44 = vadd.f32 %v2999_v10, %v959_v40  ;;  %968 = vst [vmem:[#allocation2 + $0x110] sm:$0xff] %v964_v47  ;;  %1295 = vmatpush.msrb.mxu3 %v1290_v15  ;;  %v1368_v40 = vld [vmem:[%s4884_s4 + $0x1c0] sm:$0xff] }
  0xcb   : > { %v711_v49 = vmax.f32 %v678_v45, 0.0 }
  0xcc   : > { %v882_v50 = vmax.f32 %v849_v46, 0.0  ;;  %v965_v48 = vmax.f32 %v960_v44, 0.0 }
  0xcd   : > { %727 = vst [vmem:[#allocation2 + $0x38] sm:$0xff] %v711_v49 }
  0xce   : > { %898 = vst [vmem:[#allocation2 + $0xb8] sm:$0xff] %v882_v50  ;;  %v1082_v52 = vld [vmem:[#allocation9 + $0x9] sm:$0xff] }
  0xcf   : > { %v1083_v53 = vmax.f32 %v1041_v51, %v1082_v52  ;;  %969 = vst [vmem:[#allocation2 + $0x118] sm:$0xff] %v965_v48 }
  0xd0   : > { %v680_v55 = vpop.f32.mrf.mxu0 }
  0xd1   : > { %v851_v56 = vpop.f32.mrf.mxu1  ;;  %v681_v57 = vadd.f32 %v3214_v42, %v680_v55  ;;  %1084 = vst [vmem:[#allocation3 + $0xb] sm:$0xff] %v1083_v53  ;;  %1475 = vmatmul.f32.vlgmr.msrb.gmra.mxu0 %v1083_v53 }
  0xd2   : > { %v852_v58 = vadd.f32 %v3219_v43, %v851_v56 }
  0xd3   : > { %v712_v60 = vmax.f32 %v681_v57, 0.0 }
  0xd4   : > { %v883_v61 = vmax.f32 %v852_v58, 0.0  ;;  %v976_v62 = vld [vmem:[#allocation2 + $0x30] ss:$2 sm:$0xff]  ;;  %v1012_v63 = vld [vmem:[#allocation2 + $0x31] ss:$2 sm:$0xff] }
  0xd5   : > { %v1044_v0 = vmax.f32 %v976_v62, %v1012_v63  ;;  %v992_v54 = vld [vmem:[#allocation2 + $0xb0] ss:$2 sm:$0xff]  ;;  %v1028_v1 = vld [vmem:[#allocation2 + $0xb1] ss:$2 sm:$0xff]  ;;  %728 = vst [vmem:[#allocation2 + $0x40] sm:$0xff] %v712_v60 }
  0xd6   : > { %v1052_v2 = vmax.f32 %v992_v54, %v1028_v1  ;;  %899 = vst [vmem:[#allocation2 + $0xc0] sm:$0xff] %v883_v61 }
  0xd7   : > { %1062 = vst [vmem:[#allocation9 + $0x18] sm:$0xff] %v1044_v0 }
  0xd8   : > { %1070 = vst [vmem:[#allocation9 + $0x58] sm:$0xff] %v1052_v2  ;;  %v683_v3 = vpop.f32.mrf.mxu0  ;;  %v1148_v5 = vld [vmem:[#allocation3 + $0x9] sm:$0xff] }
  0xd9   : > { %v854_v4 = vpop.f32.mrf.mxu1  ;;  %v1122_v6 = vld [vmem:[#allocation3 + $0x8] sm:$0xff]  ;;  %v684_v8 = vadd.f32 %v3214_v42, %v683_v3  ;;  %1192 = vmatmul.f32.gmra.mxu3 %v1148_v5  ;;  %v1004_v3 = vld [vmem:[#allocation2 + $0x110] ss:$2 sm:$0xff] }
  0xda   : > { %v1516_v7 = vld [vmem:[#allocation3 + $0xc] sm:$0xff]  ;;  %v855_v9 = vadd.f32 %v3219_v43, %v854_v4  ;;  %1239 = vmatmul.f32.gmra.mxu2 %v1122_v6 }
  0xdb   : > { %1558 = vmatmul.f32.vlgmr.msrb.gmra.mxu1 %v1516_v7  ;;  %v713_v12 = vmax.f32 %v684_v8, 0.0  ;;  %v1040_v4 = vld [vmem:[#allocation2 + $0x111] ss:$2 sm:$0xff] }
  0xdc   : > { %v884_v13 = vmax.f32 %v855_v9, 0.0 }
  0xdd   : > { %729 = vst [vmem:[#allocation2 + $0x48] sm:$0xff] %v713_v12 }
  0xde   : > { %900 = vst [vmem:[#allocation2 + $0xc8] sm:$0xff] %v884_v13  ;;  %v1086_v49 = vld [vmem:[#allocation9 + $0x12] sm:$0xff] }
  0xdf   : > { %v1102_v16 = vld [vmem:[#allocation9 + $0x51] sm:$0xff] }
  0xe0   : > { %v686_v19 = vpop.f32.mrf.mxu0  ;;  %v3468_v22 = vmax.f32 %v1050_v20, %v1102_v16  ;;  %v954_v20 = vadd.f32 %v2999_v10, %v953_v11  ;;  %v1058_v10 = vmax.f32 %v1004_v3, %v1040_v4  ;;  %v1373_v16 = vld [vmem:[%s4884_s4 + $0x1e8] sm:$0xff] }
  0xe1   : > { %v857_v21 = vpop.f32.mrf.mxu1  ;;  %v687_v23 = vadd.f32 %v3214_v42, %v686_v19  ;;  %v1289_v19 = vld [vmem:[%s4884_s4 + $0x160] sm:$0xff]  ;;  %1378 = vmatpush.msra.mxu2 %v1373_v16 }
  0xe2   : > { %v858_v24 = vadd.f32 %v3219_v43, %v857_v21  ;;  %1104 = vst [vmem:[#allocation3 + $0x33] sm:$0xff] %v3468_v22  ;;  %v963_v41 = vmax.f32 %v954_v20, 0.0  ;;  %1296 = vmatpush.msrb.mxu3 %v1289_v19 }
  0xe3   : > { %v714_v26 = vmax.f32 %v687_v23, 0.0  ;;  %1076 = vst [vmem:[#allocation9 + $0x88] sm:$0xff] %v1058_v10  ;;  %v1363_v10 = vld [vmem:[%s4884_s4 + $0x198] sm:$0xff] }
  0xe4   : > { %v885_v27 = vmax.f32 %v858_v24, 0.0  ;;  %v978_v28 = vld [vmem:[#allocation2 + $0x40] ss:$2 sm:$0xff]  ;;  %v1014_v29 = vld [vmem:[#allocation2 + $0x41] ss:$2 sm:$0xff]  ;;  %967 = vst [vmem:[#allocation2 + $0x108] sm:$0xff] %v963_v41  ;;  %1297 = vmatpush.msrb.mxu3 %v1288_v25 }
  0xe5   : > { %v1045_v30 = vmax.f32 %v978_v28, %v1014_v29  ;;  %v994_v31 = vld [vmem:[#allocation2 + $0xc0] ss:$2 sm:$0xff]  ;;  %v1030_v32 = vld [vmem:[#allocation2 + $0xc1] ss:$2 sm:$0xff]  ;;  %730 = vst [vmem:[#allocation2 + $0x50] sm:$0xff] %v714_v26  ;;  %v1371_v26 = vld [vmem:[%s4884_s4 + $0x1d8] sm:$0xff] }
  0xe6   : > { %v1053_v33 = vmax.f32 %v994_v31, %v1030_v32  ;;  %901 = vst [vmem:[#allocation2 + $0xd0] sm:$0xff] %v885_v27  ;;  %v1372_v24 = vld [vmem:[%s4884_s4 + $0x1e0] sm:$0xff]  ;;  %v1287_v27 = vld [vmem:[%s4884_s4 + $0x150] sm:$0xff] }
  0xe7   : > { %1063 = vst [vmem:[#allocation9 + $0x20] sm:$0xff] %v1045_v30  ;;  %1379 = vmatpush.msra.mxu2 %v1372_v24  ;;  %v1370_v32 = vld [vmem:[%s4884_s4 + $0x1d0] sm:$0xff]  ;;  %1298 = vmatpush.msrb.mxu3 %v1287_v27 }
  0xe8   : > { %1071 = vst [vmem:[#allocation9 + $0x60] sm:$0xff] %v1053_v33  ;;  %v689_v17 = vpop.f32.mrf.mxu0  ;;  %v1286_v33 = vld [vmem:[%s4884_s4 + $0x148] sm:$0xff]  ;;  %v1279_v27 = vld [vmem:[%s4884_s4 + $0x110] sm:$0xff] }
  0xe9   : > { %v860_v18 = vpop.f32.mrf.mxu1  ;;  %v690_v38 = vadd.f32 %v3214_v42, %v689_v17  ;;  %1380 = vmatpush.msra.mxu2 %v1371_v26  ;;  %1299 = vmatpush.msrb.mxu3 %v1286_v33  ;;  %v1787_v33 = vld [vmem:[%s4884_s4 + $0x460] sm:$0xff] }
  0xea   : > { %v861_v39 = vadd.f32 %v3219_v43, %v860_v18 }
  0xeb   : > { %v715_v45 = vmax.f32 %v690_v38, 0.0  ;;  %v1002_v59 = vld [vmem:[#allocation2 + $0x100] ss:$2 sm:$0xff]  ;;  %v1038_v60 = vld [vmem:[#allocation2 + $0x101] ss:$2 sm:$0xff]  ;;  %1381 = vmatpush.msra.mxu2 %v1370_v32  ;;  %1300 = vmatpush.msrb.mxu3 %v1285_v35 }
  0xec   : > { %v886_v46 = vmax.f32 %v861_v39, 0.0  ;;  %v1057_v1 = vmax.f32 %v1002_v59, %v1038_v60  ;;  %v1282_v60 = vld [vmem:[%s4884_s4 + $0x128] sm:$0xff] }
  0xed   : > { %731 = vst [vmem:[#allocation2 + $0x58] sm:$0xff] %v715_v45  ;;  %1382 = vmatpush.msra.mxu2 %v1369_v34  ;;  %v1788_v32 = vld [vmem:[%s4884_s4 + $0x468] sm:$0xff] }
  0xee   : > { %902 = vst [vmem:[#allocation2 + $0xd8] sm:$0xff] %v886_v46  ;;  %v1087_v50 = vld [vmem:[#allocation9 + $0x1b] sm:$0xff]  ;;  %v1361_v35 = vld [vmem:[%s4884_s4 + $0x188] sm:$0xff] }
  0xef   : > { %v3484_v51 = vmax.f32 %v1086_v49, %v1087_v50  ;;  %1075 = vst [vmem:[#allocation9 + $0x80] sm:$0xff] %v1057_v1  ;;  %v1106_v28 = vld [vmem:[#allocation9 + $0x5a] sm:$0xff]  ;;  %1383 = vmatpush.msra.mxu2 %v1368_v40  ;;  %v1153_v40 = vld [vmem:[#allocation3 + $0x31] sm:$0xff] }
  0xf0   : > { %v692_v52 = vpop.f32.mrf.mxu0 }
  0xf1   : > { %v863_v53 = vpop.f32.mrf.mxu1  ;;  %v693_v55 = vadd.f32 %v3214_v42, %v692_v52  ;;  %1089 = vst [vmem:[#allocation3 + $0x15] sm:$0xff] %v3484_v51  ;;  %v1284_v52 = vld [vmem:[%s4884_s4 + $0x138] sm:$0xff] }
  0xf2   : > { %v864_v56 = vadd.f32 %v3219_v43, %v863_v53  ;;  %1301 = vmatpush.msrb.mxu3 %v1284_v52  ;;  %v1367_v53 = vld [vmem:[%s4884_s4 + $0x1b8] sm:$0xff]  ;;  %v1623_v52 = vld [vmem:[%s4884_s4 + $0x370] sm:$0xff] }
  0xf3   : > { %v716_v57 = vmax.f32 %v693_v55, 0.0  ;;  %v1283_v55 = vld [vmem:[%s4884_s4 + $0x130] sm:$0xff]  ;;  %1384 = vmatpush.msra.mxu2 %v1367_v53 }
  0xf4   : > { %v887_v58 = vmax.f32 %v864_v56, 0.0  ;;  %v980_v61 = vld [vmem:[#allocation2 + $0x50] ss:$2 sm:$0xff]  ;;  %v1016_v62 = vld [vmem:[#allocation2 + $0x51] ss:$2 sm:$0xff]  ;;  %1302 = vmatpush.msrb.mxu3 %v1283_v55 }
  0xf5   : > { %v1046_v63 = vmax.f32 %v980_v61, %v1016_v62  ;;  %v996_v0 = vld [vmem:[#allocation2 + $0xd0] ss:$2 sm:$0xff]  ;;  %v1032_v54 = vld [vmem:[#allocation2 + $0xd1] ss:$2 sm:$0xff]  ;;  %732 = vst [vmem:[#allocation2 + $0x60] sm:$0xff] %v716_v57  ;;  %v1365_v61 = vld [vmem:[%s4884_s4 + $0x1a8] sm:$0xff] }
  0xf6   : > { %v1054_v2 = vmax.f32 %v996_v0, %v1032_v54  ;;  %903 = vst [vmem:[#allocation2 + $0xe0] sm:$0xff] %v887_v58  ;;  %v1366_v56 = vld [vmem:[%s4884_s4 + $0x1b0] sm:$0xff]  ;;  %v1281_v62 = vld [vmem:[%s4884_s4 + $0x120] sm:$0xff]  ;;  %1303 = vmatpush.msrb.mxu3 %v1282_v60 }
  0xf7   : > { %1064 = vst [vmem:[#allocation9 + $0x28] sm:$0xff] %v1046_v63  ;;  %1385 = vmatpush.msra.mxu2 %v1366_v56  ;;  %v1706_v53 = vld [vmem:[%s4884_s4 + $0x3f0] sm:$0xff]  ;;  %v1621_v60 = vld [vmem:[%s4884_s4 + $0x360] sm:$0xff] }
  0xf8   : > { %1072 = vst [vmem:[#allocation9 + $0x68] sm:$0xff] %v1054_v2  ;;  %v695_v5 = vpop.f32.mrf.mxu0  ;;  %v1149_v7 = vld [vmem:[#allocation3 + $0x11] sm:$0xff]  ;;  %1304 = vmatpush.msrb.mxu3 %v1281_v62 }
  0xf9   : > { %v866_v6 = vpop.f32.mrf.mxu1  ;;  %v1123_v8 = vld [vmem:[#allocation3 + $0x10] sm:$0xff]  ;;  %v696_v11 = vadd.f32 %v3214_v42, %v695_v5  ;;  %1195 = vmatmul.f32.gmra.mxu3 %v1149_v7  ;;  %1386 = vmatpush.msra.mxu2 %v1365_v61 }
  0xfa   : > { %v1434_v9 = vld [vmem:[#allocation3 + $0x13] sm:$0xff]  ;;  %v867_v12 = vadd.f32 %v3219_v43, %v866_v6  ;;  %1242 = vmatmul.f32.gmra.mxu2 %v1123_v8  ;;  %v1364_v8 = vld [vmem:[%s4884_s4 + $0x1a0] sm:$0xff] }
  0xfb   : > { %v3491_v13 = vld [vmem:[#allocation3 + $0x14] sm:$0xff]  ;;  %1478 = vmatmul.f32.gmra.mxu0 %v1434_v9  ;;  %v717_v21 = vmax.f32 %v696_v11, 0.0  ;;  %1387 = vmatpush.msra.mxu2 %v1364_v8  ;;  %v1117_v11 = vld [vmem:[#allocation9 + $0x87] sm:$0xff] }
  0xfc   : > { %1561 = vmatmul.f32.gmra.mxu1 %v3491_v13  ;;  %v888_v23 = vmax.f32 %v867_v12, 0.0  ;;  %v1280_v9 = vld [vmem:[%s4884_s4 + $0x118] sm:$0xff] }
  0xfd   : > { %733 = vst [vmem:[#allocation2 + $0x68] sm:$0xff] %v717_v21  ;;  %1305 = vmatpush.msrb.mxu3 %v1280_v9  ;;  %1388 = vmatpush.msra.mxu2 %v1363_v10  ;;  %v1775_v9 = vld [vmem:[%s4884_s4 + $0x400] sm:$0xff] }
  0xfe   : > { %904 = vst [vmem:[#allocation2 + $0xe8] sm:$0xff] %v888_v23 }
  0xff   : > { %v1107_v29 = vld [vmem:[#allocation9 + $0x63] sm:$0xff]  ;;  %1306 = vmatpush.msrb.mxu3 %v1279_v27  ;;  %v1351_v27 = vld [vmem:[#allocation3 + $0x12] sm:$0xff] }
 0x100   : > { %v698_v30 = vpop.f32.mrf.mxu0  ;;  %v3524_v17 = vmax.f32 %v1106_v28, %v1107_v29  ;;  %v1790_v28 = vld [vmem:[%s4884_s4 + $0x478] sm:$0xff]  ;;  %v1362_v29 = vld [vmem:[%s4884_s4 + $0x190] sm:$0xff] }
 0x101   : > { %v869_v31 = vpop.f32.mrf.mxu1  ;;  %v699_v18 = vadd.f32 %v3214_v42, %v698_v30  ;;  %1791 = vmatpush.msra.mxu0 %v1790_v28  ;;  %v1789_v30 = vld [vmem:[%s4884_s4 + $0x470] sm:$0xff]  ;;  %1389 = vmatpush.msra.mxu2 %v1362_v29 }
 0x102   : > { %v870_v20 = vadd.f32 %v3219_v43, %v869_v31  ;;  %1109 = vst [vmem:[#allocation3 + $0x3d] sm:$0xff] %v3524_v17  ;;  %v1278_v31 = vld [vmem:[%s4884_s4 + $0x108] sm:$0xff] }
 0x103   : > { %v718_v36 = vmax.f32 %v699_v18, 0.0  ;;  %1792 = vmatpush.msra.mxu0 %v1789_v30  ;;  %1307 = vmatpush.msrb.mxu3 %v1278_v31  ;;  %v1616_v30 = vld [vmem:[%s4884_s4 + $0x338] sm:$0xff] }
 0x104   : > { %v889_v37 = vmax.f32 %v870_v20, 0.0  ;;  %v982_v38 = vld [vmem:[#allocation2 + $0x60] ss:$2 sm:$0xff]  ;;  %v1018_v39 = vld [vmem:[#allocation2 + $0x61] ss:$2 sm:$0xff]  ;;  %1390 = vmatpush.msra.mxu2 %v1361_v35  ;;  %v1699_v31 = vld [vmem:[%s4884_s4 + $0x3b8] sm:$0xff] }
 0x105   : > { %v1047_v41 = vmax.f32 %v982_v38, %v1018_v39  ;;  %v998_v44 = vld [vmem:[#allocation2 + $0xe0] ss:$2 sm:$0xff]  ;;  %v1034_v45 = vld [vmem:[#allocation2 + $0xe1] ss:$2 sm:$0xff]  ;;  %734 = vst [vmem:[#allocation2 + $0x70] sm:$0xff] %v718_v36  ;;  %1793 = vmatpush.msra.mxu0 %v1788_v32  ;;  %v1786_v36 = vld [vmem:[%s4884_s4 + $0x458] sm:$0xff] }
 0x106   : > { %v1055_v46 = vmax.f32 %v998_v44, %v1034_v45  ;;  %905 = vst [vmem:[#allocation2 + $0xf0] sm:$0xff] %v889_v37  ;;  %v1277_v37 = vld [vmem:[%s4884_s4 + $0x100] sm:$0xff]  ;;  %v1785_v38 = vld [vmem:[%s4884_s4 + $0x450] sm:$0xff]  ;;  %v1784_v44 = vld [vmem:[%s4884_s4 + $0x448] sm:$0xff] }
 0x107   : > { %1065 = vst [vmem:[#allocation9 + $0x30] sm:$0xff] %v1047_v41  ;;  %1794 = vmatpush.msra.mxu0 %v1787_v33  ;;  %1308 = vmatpush.msrb.mxu3 %v1277_v37  ;;  %v1360_v39 = vld [vmem:[%s4884_s4 + $0x180] sm:$0xff]  ;;  %v1615_v32 = vld [vmem:[%s4884_s4 + $0x330] sm:$0xff]  ;;  %v1614_v35 = vld [vmem:[%s4884_s4 + $0x328] sm:$0xff] }
 0x108   : > { %1073 = vst [vmem:[#allocation9 + $0x70] sm:$0xff] %v1055_v46  ;;  %v701_v47 = vpop.f32.mrf.mxu0  ;;  %1391 = vmatpush.msra.mxu2 %v1360_v39  ;;  %v1698_v33 = vld [vmem:[%s4884_s4 + $0x3b0] sm:$0xff]  ;;  %v1613_v37 = vld [vmem:[%s4884_s4 + $0x320] sm:$0xff] }
 0x109   : > { %v872_v48 = vpop.f32.mrf.mxu1  ;;  %v702_v49 = vadd.f32 %v3214_v42, %v701_v47  ;;  %1795 = vmatpush.msra.mxu0 %v1786_v36  ;;  %v1783_v47 = vld [vmem:[%s4884_s4 + $0x440] sm:$0xff]  ;;  %v1128_v56 = vld [vmem:[#allocation3 + $0x38] sm:$0xff]  ;;  %v1697_v36 = vld [vmem:[%s4884_s4 + $0x3a8] sm:$0xff] }
 0x10a   : > { %v873_v50 = vadd.f32 %v3219_v43, %v872_v48  ;;  %v1091_v43 = vld [vmem:[#allocation9 + $0x24] sm:$0xff]  ;;  %v1624_v48 = vld [vmem:[%s4884_s4 + $0x378] sm:$0xff] }
 0x10b   : > { %v719_v42 = vmax.f32 %v702_v49, 0.0  ;;  %1796 = vmatpush.msra.mxu0 %v1785_v38  ;;  %v1707_v49 = vld [vmem:[%s4884_s4 + $0x3f8] sm:$0xff]  ;;  %1625 = vmatpush.msra.mxu3 %v1624_v48  ;;  %v1611_v48 = vld [vmem:[%s4884_s4 + $0x310] sm:$0xff] }
 0x10c   : > { %v890_v57 = vmax.f32 %v873_v50, 0.0  ;;  %v1782_v50 = vld [vmem:[%s4884_s4 + $0x438] sm:$0xff]  ;;  %1708 = vmatpush.msrb.mxu2 %v1707_v49  ;;  %v1694_v49 = vld [vmem:[%s4884_s4 + $0x390] sm:$0xff] }
 0x10d   : > { %735 = vst [vmem:[#allocation2 + $0x78] sm:$0xff] %v719_v42  ;;  %1797 = vmatpush.msra.mxu0 %v1784_v44  ;;  %v1154_v55 = vld [vmem:[#allocation3 + $0x39] sm:$0xff]  ;;  %v1781_v42 = vld [vmem:[%s4884_s4 + $0x430] sm:$0xff]  ;;  %1626 = vmatpush.msra.mxu3 %v1623_v52 }
 0x10e   : > { %906 = vst [vmem:[#allocation2 + $0xf8] sm:$0xff] %v890_v57  ;;  %v1092_v58 = vld [vmem:[#allocation9 + $0x2d] sm:$0xff]  ;;  %1709 = vmatpush.msrb.mxu2 %v1706_v53  ;;  %v1695_v44 = vld [vmem:[%s4884_s4 + $0x398] sm:$0xff] }
 0x10f   : > { %v1093_v59 = vmax.f32 %v1091_v43, %v1092_v58  ;;  %v1111_v16 = vld [vmem:[#allocation9 + $0x6c] sm:$0xff]  ;;  %1798 = vmatpush.msra.mxu0 %v1783_v47  ;;  %v3639_v57 = vld [vmem:[#allocation3 + $0x34] sm:$0xff] }
 0x110   : > { %v1780_v43 = vld [vmem:[%s4884_s4 + $0x428] sm:$0xff]  ;;  %v1355_v52 = vld [vmem:[#allocation3 + $0x32] sm:$0xff] }
 0x111   : > { %1094 = vst [vmem:[#allocation3 + $0x1f] sm:$0xff] %v1093_v59  ;;  %1799 = vmatpush.msra.mxu0 %v1782_v50  ;;  %v1622_v58 = vld [vmem:[%s4884_s4 + $0x368] sm:$0xff]  ;;  %v1779_v59 = vld [vmem:[%s4884_s4 + $0x420] sm:$0xff] }
 0x112   : > { %1627 = vmatpush.msra.mxu3 %v1622_v58  ;;  %v1610_v50 = vld [vmem:[%s4884_s4 + $0x308] sm:$0xff]  ;;  %v1769_v58 = vld [vmem:[#allocation3 + $0x36] sm:$0xff] }
 0x113   : > { %1800 = vmatpush.msra.mxu0 %v1781_v42  ;;  %v1692_v42 = vld [vmem:[%s4884_s4 + $0x380] sm:$0xff] }
 0x114   : > { %v984_v63 = vld [vmem:[#allocation2 + $0x70] ss:$2 sm:$0xff]  ;;  %v1020_v0 = vld [vmem:[#allocation2 + $0x71] ss:$2 sm:$0xff]  ;;  %1628 = vmatpush.msra.mxu3 %v1621_v60 }
 0x115   : > { %v1048_v54 = vmax.f32 %v984_v63, %v1020_v0  ;;  %v1000_v1 = vld [vmem:[#allocation2 + $0xf0] ss:$2 sm:$0xff]  ;;  %v1036_v2 = vld [vmem:[#allocation2 + $0xf1] ss:$2 sm:$0xff]  ;;  %1801 = vmatpush.msra.mxu0 %v1780_v43 }
 0x116   : > { %v1056_v3 = vmax.f32 %v1000_v1, %v1036_v2  ;;  %v1778_v63 = vld [vmem:[%s4884_s4 + $0x418] sm:$0xff]  ;;  %v1777_v1 = vld [vmem:[%s4884_s4 + $0x410] sm:$0xff]  ;;  %v1704_v2 = vld [vmem:[%s4884_s4 + $0x3e0] sm:$0xff] }
 0x117   : > { %1066 = vst [vmem:[#allocation9 + $0x38] sm:$0xff] %v1048_v54  ;;  %1802 = vmatpush.msra.mxu0 %v1779_v59  ;;  %v1439_v0 = vld [vmem:[#allocation3 + $0x3b] sm:$0xff] }
 0x118   : > { %1074 = vst [vmem:[#allocation9 + $0x78] sm:$0xff] %v1056_v3  ;;  %v1150_v4 = vld [vmem:[#allocation3 + $0x19] sm:$0xff]  ;;  %v1151_v23 = vld [vmem:[#allocation3 + $0x21] sm:$0xff] }
 0x119   : > { %v1124_v5 = vld [vmem:[#allocation3 + $0x18] sm:$0xff]  ;;  %1198 = vmatmul.f32.gmra.mxu3 %v1150_v4  ;;  %v1125_v24 = vld [vmem:[#allocation3 + $0x20] sm:$0xff]  ;;  %1803 = vmatpush.msra.mxu0 %v1778_v63 }
 0x11a   : > { %v1435_v6 = vld [vmem:[#allocation3 + $0x1b] sm:$0xff]  ;;  %1245 = vmatmul.f32.gmra.mxu2 %v1124_v5  ;;  %v1776_v5 = vld [vmem:[%s4884_s4 + $0x408] sm:$0xff] }
 0x11b   : > { %v3561_v7 = vld [vmem:[#allocation3 + $0x1c] sm:$0xff]  ;;  %1481 = vmatmul.f32.gmra.mxu0 %v1435_v6 }
 0x11c   : > { %1564 = vmatmul.f32.gmra.mxu1 %v3561_v7  ;;  %v3661_v54 = vld [vmem:[#allocation3 + $0x3c] sm:$0xff]  ;;  %1804 = vmatpush.msra.mxu0 %v1777_v1 }
 0x11d   : > { %v1620_v3 = vld [vmem:[%s4884_s4 + $0x358] sm:$0xff] }
 0x11e   : > { %v1096_v12 = vld [vmem:[#allocation9 + $0x36] sm:$0xff]  ;;  %v1097_v14 = vld [vmem:[#allocation9 + $0x3f] sm:$0xff]  ;;  %1629 = vmatpush.msra.mxu3 %v1620_v3  ;;  %1805 = vmatpush.msra.mxu0 %v1776_v5 }
 0x11f   : > { %v1098_v15 = vmax.f32 %v1096_v12, %v1097_v14  ;;  %v1112_v19 = vld [vmem:[#allocation9 + $0x75] sm:$0xff]  ;;  %v1116_v21 = vld [vmem:[#allocation9 + $0x7e] sm:$0xff] }
 0x120   : > { %v1113_v25 = vmax.f32 %v1111_v16, %v1112_v19  ;;  %v1118_v26 = vmax.f32 %v1116_v21, %v1117_v11  ;;  %v1703_v4 = vld [vmem:[%s4884_s4 + $0x3d8] sm:$0xff]  ;;  %v1619_v12 = vld [vmem:[%s4884_s4 + $0x350] sm:$0xff]  ;;  %1806 = vmatpush.msra.mxu0 %v1775_v9  ;;  %v1267_v16 = vld [vmem:[#allocation3 + $0x2] sm:$0xff] }
 0x121   : > { %1201 = vmatmul.f32.gmra.mxu3 %v1151_v23  ;;  %1099 = vst [vmem:[#allocation3 + $0x29] sm:$0xff] %v1098_v15  ;;  %v1702_v14 = vld [vmem:[%s4884_s4 + $0x3d0] sm:$0xff]  ;;  %v1766_v39 = vld [vmem:[#allocation3 + $0x1e] sm:$0xff] }
 0x122   : > { %1248 = vmatmul.f32.gmra.mxu2 %v1125_v24  ;;  %1114 = vst [vmem:[#allocation3 + $0x47] sm:$0xff] %v1113_v25  ;;  %1630 = vmatpush.msra.mxu3 %v1619_v12  ;;  %v1350_v19 = vld [vmem:[#allocation3 + $0xa] sm:$0xff]  ;;  %v1617_v25 = vld [vmem:[%s4884_s4 + $0x340] sm:$0xff]  ;;  %v3754_v59 = vpop.f32.mrf.mxu3 }
 0x123   : > { %1119 = vst [vmem:[#allocation3 + $0x51] sm:$0xff] %v1118_v26  ;;  %v1701_v24 = vld [vmem:[%s4884_s4 + $0x3c8] sm:$0xff]  ;;  %v1700_v26 = vld [vmem:[%s4884_s4 + $0x3c0] sm:$0xff] }
 0x124   : > { %v1356_v43 = vld [vmem:[#allocation3 + $0x3a] sm:$0xff] }
 0x128   : > { %v1126_v18 = vld [vmem:[#allocation3 + $0x28] sm:$0xff]  ;;  %v1127_v41 = vld [vmem:[#allocation3 + $0x30] sm:$0xff] }
 0x129   : > { %v1436_v20 = vld [vmem:[#allocation3 + $0x23] sm:$0xff]  ;;  %1204 = vmatmul.f32.gmra.mxu3 %v1098_v15  ;;  %v1437_v45 = vld [vmem:[#allocation3 + $0x2b] sm:$0xff] }
 0x12a   : > { %v3594_v34 = vld [vmem:[#allocation3 + $0x24] sm:$0xff]  ;;  %1251 = vmatmul.f32.gmra.mxu2 %v1126_v18  ;;  %1484 = vmatmul.f32.gmra.mxu0 %v1436_v20  ;;  %v3615_v46 = vld [vmem:[#allocation3 + $0x2c] sm:$0xff]  ;;  %v1525_v29 = vld [vmem:[#allocation3 + $0x54] sm:$0x3f] }
 0x12b   : > { %1567 = vmatmul.f32.gmra.mxu1 %v3594_v34  ;;  %v1155_v61 = vld [vmem:[#allocation3 + $0x41] sm:$0xff]  ;;  %v1156_v6 = vld [vmem:[#allocation3 + $0x49] sm:$0x3f]  ;;  %v1442_v28 = vld [vmem:[#allocation3 + $0x53] sm:$0x3f] }
 0x12c   : > { %v1129_v62 = vld [vmem:[#allocation3 + $0x40] sm:$0xff]  ;;  %v1130_v8 = vld [vmem:[#allocation3 + $0x48] sm:$0x3f]  ;;  %v1765_v20 = vld [vmem:[#allocation3 + $0x16] sm:$0xff] }
 0x12d   : > { %v1440_v10 = vld [vmem:[#allocation3 + $0x43] sm:$0xff]  ;;  %v1441_v21 = vld [vmem:[#allocation3 + $0x4b] sm:$0xff]  ;;  %v1352_v18 = vld [vmem:[#allocation3 + $0x1a] sm:$0xff] }
 0x12e   : > { %v3682_v11 = vld [vmem:[#allocation3 + $0x44] sm:$0xff]  ;;  %v3694_v23 = vld [vmem:[#allocation3 + $0x4c] sm:$0xff]  ;;  %v1773_v12 = vld [vmem:[#allocation3 + $0x56] sm:$0xff] }
 0x12f   : > { %v1618_v15 = vld [vmem:[%s4884_s4 + $0x348] sm:$0xff]  ;;  %v1359_v5 = vld [vmem:[#allocation3 + $0x52] sm:$0x3f] }
 0x130   : > { %1631 = vmatpush.msra.mxu3 %v1618_v15  ;;  %v1353_v38 = vld [vmem:[#allocation3 + $0x22] sm:$0xff]  ;;  %v1768_v53 = vld [vmem:[#allocation3 + $0x2e] sm:$0xff] }
 0x131   : > { %1207 = vmatmul.f32.gmra.mxu3 %v1153_v40  ;;  %v1696_v40 = vld [vmem:[%s4884_s4 + $0x3a0] sm:$0xff] }
 0x132   : > { %1254 = vmatmul.f32.gmra.mxu2 %v1127_v41  ;;  %1487 = vmatmul.f32.gmra.mxu0 %v1437_v45  ;;  %v1612_v41 = vld [vmem:[%s4884_s4 + $0x318] sm:$0xff]  ;;  %v1354_v45 = vld [vmem:[#allocation3 + $0x2a] sm:$0xff]  ;;  %v1357_v60 = vld [vmem:[#allocation3 + $0x42] sm:$0xff] }
 0x133   : > { %1570 = vmatmul.f32.gmra.mxu1 %v3615_v46  ;;  %1632 = vmatpush.msra.mxu3 %v1617_v25  ;;  %v1767_v47 = vld [vmem:[#allocation3 + $0x26] sm:$0xff] }
 0x134   : > { %v1771_v1 = vld [vmem:[#allocation3 + $0x46] sm:$0xff] }
 0x135   : > { %1633 = vmatpush.msra.mxu3 %v1616_v30 }
 0x137   : > { %1634 = vmatpush.msra.mxu3 %v1615_v32 }
 0x139   : > { %1210 = vmatmul.f32.gmra.mxu3 %v1154_v55  ;;  %v1693_v55 = vld [vmem:[%s4884_s4 + $0x388] sm:$0xff] }
 0x13a   : > { %1257 = vmatmul.f32.gmra.mxu2 %v1128_v56  ;;  %1490 = vmatmul.f32.gmra.mxu0 %v3468_v22  ;;  %v1705_v22 = vld [vmem:[%s4884_s4 + $0x3e8] sm:$0xff]  ;;  %v1609_v56 = vld [vmem:[%s4884_s4 + $0x300] sm:$0xff] }
 0x13b   : > { %1573 = vmatmul.f32.gmra.mxu1 %v3639_v57  ;;  %1710 = vmatpush.msrb.mxu2 %v1705_v22  ;;  %v3756_v22 = vpop.f32.mrf.mxu2 }
 0x13c   : > { %1635 = vmatpush.msra.mxu3 %v1614_v35  ;;  %v1688_v35 = vld [vmem:[#allocation3 + $0x45] sm:$0xff] }
 0x13d   : > { %1711 = vmatpush.msrb.mxu2 %v1704_v2 }
 0x13e   : > { %1636 = vmatpush.msra.mxu3 %v1613_v37 }
 0x13f   : > { %1712 = vmatpush.msrb.mxu2 %v1703_v4  ;;  %v1276_v4 = vld [vmem:[#allocation3 + $0x4a] sm:$0x3f] }
 0x140   : > { %1637 = vmatpush.msra.mxu3 %v1612_v41  ;;  %v1690_v41 = vld [vmem:[#allocation3 + $0x55] sm:$0xff] }
 0x141   : > { %1213 = vmatmul.f32.gmra.mxu3 %v1155_v61  ;;  %1713 = vmatpush.msrb.mxu2 %v1702_v14  ;;  %v1770_v61 = vld [vmem:[#allocation3 + $0x3e] sm:$0xff] }
 0x142   : > { %1260 = vmatmul.f32.gmra.mxu2 %v1129_v62  ;;  %1493 = vmatmul.f32.gmra.mxu0 %v1439_v0  ;;  %v1358_v0 = vld [vmem:[#allocation3 + $0x4a] sm:$0xff] }
 0x143   : > { %1576 = vmatmul.f32.gmra.mxu1 %v3661_v54  ;;  %1714 = vmatpush.msrb.mxu2 %v1701_v24 }
 0x144   : > { %1638 = vmatpush.msra.mxu3 %v1611_v48  ;;  %v1691_v48 = vld [vmem:[#allocation3 + $0x5d] sm:$0x3f] }
 0x145   : > { %1715 = vmatpush.msrb.mxu2 %v1700_v26  ;;  %v1684_v26 = vld [vmem:[#allocation3 + $0x25] sm:$0xff] }
 0x146   : > { %1639 = vmatpush.msra.mxu3 %v1610_v50 }
 0x147   : > { %1716 = vmatpush.msrb.mxu2 %v1699_v31 }
 0x148   : > { %1640 = vmatpush.msra.mxu3 %v1609_v56 }
 0x149   : > { %1216 = vmatmul.f32.gmra.mxu3 %v1156_v6  ;;  %1717 = vmatpush.msrb.mxu2 %v1698_v33  ;;  %v1772_v6 = vld [vmem:[#allocation3 + $0x4e] sm:$0xff] }
 0x14a   : > { %1263 = vmatmul.f32.gmra.mxu2 %v1130_v8  ;;  %1496 = vmatmul.f32.gmra.mxu0 %v1440_v10 }
 0x14b   : > { %1579 = vmatmul.f32.gmra.mxu1 %v3682_v11  ;;  %1718 = vmatpush.msrb.mxu2 %v1697_v36  ;;  %v1774_v36 = vld [vmem:[#allocation3 + $0x5e] sm:$0x3f] }
 0x14d   : > { %1719 = vmatpush.msrb.mxu2 %v1696_v40  ;;  %v1607_v40 = vld [vmem:[#allocation3 + $0x54] sm:$0xff] }
 0x14f   : > { %1720 = vmatpush.msrb.mxu2 %v1695_v44 }
 0x151   : > { %1309 = vmatmul.f32.vlgmr.msrb.gmra.mxu3 %v1267_v16  ;;  %1721 = vmatpush.msrb.mxu2 %v1694_v49 }
 0x152   : > { %1392 = vmatmul.f32.vlgmr.msra.gmra.mxu2 %v1350_v19  ;;  %1499 = vmatmul.f32.gmra.mxu0 %v1441_v21 }
 0x153   : > { %1582 = vmatmul.f32.gmra.mxu1 %v3694_v23  ;;  %1722 = vmatpush.msrb.mxu2 %v1693_v55 }
 0x155   : > { %1723 = vmatpush.msrb.mxu2 %v1692_v42 }
 0x159   : > { %1312 = vmatmul.f32.gmra.mxu3 %v1350_v19  ;;  %v1683_v19 = vld [vmem:[#allocation3 + $0x1d] sm:$0xff] }
 0x15a   : > { %1395 = vmatmul.f32.gmra.mxu2 %v1351_v27  ;;  %1502 = vmatmul.f32.gmra.mxu0 %v1442_v28  ;;  %v1685_v28 = vld [vmem:[#allocation3 + $0x2d] sm:$0xff] }
 0x15b   : > { %1585 = vmatmul.f32.gmra.mxu1 %v1525_v29 }
 0x15c   : > { %v3758_v62 = vpop.f32.mrf.mxu3 }
 0x15d   : > { %v3760_v63 = vpop.f32.mrf.mxu2 }
 0x161   : > { %1315 = vmatmul.f32.gmra.mxu3 %v1351_v27 }
 0x162   : > { %1398 = vmatmul.f32.gmra.mxu2 %v1352_v18  ;;  %1807 = vmatmul.f32.vlgmr.msra.gmra.mxu0 %v1765_v20 }
 0x169   : > { %1318 = vmatmul.f32.gmra.mxu3 %v1352_v18 }
 0x16a   : > { %1401 = vmatmul.f32.gmra.mxu2 %v1353_v38  ;;  %1810 = vmatmul.f32.gmra.mxu0 %v1766_v39 }
 0x171   : > { %1321 = vmatmul.f32.gmra.mxu3 %v1353_v38  ;;  %v1689_v38 = vld [vmem:[#allocation3 + $0x4d] sm:$0xff] }
 0x172   : > { %1404 = vmatmul.f32.gmra.mxu2 %v1354_v45  ;;  %1813 = vmatmul.f32.gmra.mxu0 %v1767_v47  ;;  %v1608_v47 = vld [vmem:[#allocation3 + $0x5c] sm:$0x3f] }
 0x179   : > { %1324 = vmatmul.f32.gmra.mxu3 %v1354_v45 }
 0x17a   : > { %1407 = vmatmul.f32.gmra.mxu2 %v1355_v52  ;;  %1816 = vmatmul.f32.gmra.mxu0 %v1768_v53 }
 0x17c   : > { %v3762_v2 = vpop.f32.mrf.mxu3 }
 0x17d   : > { %v3764_v3 = vpop.f32.mrf.mxu2 }
 0x181   : > { %1327 = vmatmul.f32.gmra.mxu3 %v1355_v52 }
 0x182   : > { %1410 = vmatmul.f32.gmra.mxu2 %v1356_v43  ;;  %1819 = vmatmul.f32.gmra.mxu0 %v1769_v58 }
 0x189   : > { %1330 = vmatmul.f32.gmra.mxu3 %v1356_v43 }
 0x18a   : > { %1413 = vmatmul.f32.gmra.mxu2 %v1357_v60  ;;  %1822 = vmatmul.f32.gmra.mxu0 %v1770_v61  ;;  %v1970_v61 = vld [vmem:[%s4886_s6 + $0xf8] sm:$0xff] }
 0x18b   : > { %1971 = vmatpush.msra.mxu1 %v1970_v61 }
 0x191   : > { %1333 = vmatmul.f32.gmra.mxu3 %v1357_v60 }
 0x192   : > { %1416 = vmatmul.f32.gmra.mxu2 %v1358_v0  ;;  %1825 = vmatmul.f32.gmra.mxu0 %v1771_v1 }
 0x199   : > { %1336 = vmatmul.f32.gmra.mxu3 %v1276_v4 }
 0x19a   : > { %1419 = vmatmul.f32.gmra.mxu2 %v1359_v5  ;;  %1828 = vmatmul.f32.gmra.mxu0 %v1772_v6 }
 0x19c   : > { %v1199_v8 = vpop.f32.mrf.mxu3 }
 0x19d   : > { %v1246_v9 = vpop.f32.mrf.mxu2 }
 0x19e   : > { %v3766_v10 = vadd.f32 %v1246_v9, %v1199_v8 }
 0x1a1   : > { %1641 = vmatmul.f32.vlgmr.msra.gmra.mxu3 %v3491_v13 }
 0x1a2   : > { %1724 = vmatmul.f32.vlgmr.msrb.gmra.mxu2 %v3484_v51  ;;  %1831 = vmatmul.f32.gmra.mxu0 %v1773_v12  ;;  %v3774_v51 = vpop.f32.mrf.mxu0 }
 0x1a4   : > { %v1202_v14 = vpop.f32.mrf.mxu3 }
 0x1a5   : > { %v1249_v15 = vpop.f32.mrf.mxu2 }
 0x1a6   : > { %v3770_v16 = vadd.f32 %v1249_v15, %v1202_v14 }
 0x1a9   : > { %1644 = vmatmul.f32.gmra.mxu3 %v3561_v7  ;;  %v1686_v7 = vld [vmem:[#allocation3 + $0x35] sm:$0xff] }
 0x1aa   : > { %1727 = vmatmul.f32.gmra.mxu2 %v1683_v19  ;;  %v3777_v31 = vpop.f32.mrf.mxu0  ;;  %1834 = vmatmul.f32.gmra.mxu0 %v1774_v36 }
 0x1ac   : > { %v1205_v21 = vpop.f32.mrf.mxu3 }
 0x1ad   : > { %v1252_v24 = vpop.f32.mrf.mxu2 }
 0x1ae   : > { %v1253_v25 = vadd.f32 %v1252_v24, %v1205_v21  ;;  %v1969_v21 = vld [vmem:[%s4886_s6 + $0xf0] sm:$0xff] }
 0x1af   : > { %1972 = vmatpush.msra.mxu1 %v1969_v21 }
 0x1b1   : > { %1647 = vmatmul.f32.gmra.mxu3 %v3594_v34 }
 0x1b2   : > { %1730 = vmatmul.f32.gmra.mxu2 %v1684_v26  ;;  %v3780_v34 = vpop.f32.mrf.mxu0 }
 0x1b4   : > { %v1208_v13 = vpop.f32.mrf.mxu3 }
 0x1b5   : > { %v1255_v27 = vpop.f32.mrf.mxu2 }
 0x1b6   : > { %v1256_v0 = vadd.f32 %v1255_v27, %v1208_v13  ;;  %v1238_v13 = vadd.f32 %v3756_v22, %v3754_v59  ;;  %v1559_v27 = vpop.f32.mrf.mxu1  ;;  %v1968_v22 = vld [vmem:[%s4886_s6 + $0xe8] sm:$0xff] }
 0x1b7   : > { %1973 = vmatpush.msra.mxu1 %v1968_v22  ;;  %v2037_v22 = vld [vmem:[%s4886_s6 + $0x158] sm:$0xff] }
 0x1b9   : > { %1650 = vmatmul.f32.gmra.mxu3 %v3615_v46 }
 0x1ba   : > { %1733 = vmatmul.f32.gmra.mxu2 %v1685_v28  ;;  %v3784_v46 = vpop.f32.mrf.mxu0 }
 0x1bc   : > { %v1211_v29 = vpop.f32.mrf.mxu3 }
 0x1bd   : > { %v1258_v30 = vpop.f32.mrf.mxu2 }
 0x1be   : > { %v1259_v8 = vadd.f32 %v1258_v30, %v1211_v29 }
 0x1c1   : > { %1653 = vmatmul.f32.gmra.mxu3 %v3639_v57 }
 0x1c2   : > { %1736 = vmatmul.f32.gmra.mxu2 %v1686_v7  ;;  %v3787_v39 = vpop.f32.mrf.mxu0 }
 0x1c4   : > { %v1214_v32 = vpop.f32.mrf.mxu3 }
 0x1c5   : > { %v1261_v33 = vpop.f32.mrf.mxu2 }
 0x1c6   : > { %v1262_v24 = vadd.f32 %v1261_v33, %v1214_v32 }
 0x1c9   : > { %1656 = vmatmul.f32.gmra.mxu3 %v3661_v54 }
 0x1ca   : > { %1739 = vmatmul.f32.gmra.mxu2 %v3524_v17  ;;  %v3790_v44 = vpop.f32.mrf.mxu0 }
 0x1cc   : > { %v1217_v18 = vpop.f32.mrf.mxu3 }
 0x1cd   : > { %v1264_v20 = vpop.f32.mrf.mxu2 }
 0x1d1   : > { %1659 = vmatmul.f32.gmra.mxu3 %v3682_v11 }
 0x1d2   : > { %1742 = vmatmul.f32.gmra.mxu2 %v1688_v35  ;;  %v3800_v50 = vpop.f32.mrf.mxu0  ;;  %v1265_v35 = vadd.f32 %v1264_v20, %v1217_v18  ;;  %v1967_v18 = vld [vmem:[%s4886_s6 + $0xe0] sm:$0xff] }
 0x1d3   : > { %1974 = vmatpush.msra.mxu1 %v1967_v18 }
 0x1d4   : > { %v1310_v57 = vpop.f32.mrf.mxu3 }
 0x1d5   : > { %v1393_v37 = vpop.f32.mrf.mxu2  ;;  %v1340_v30 = vadd.f32 %v1310_v57, %v1238_v13  ;;  %v2041_v13 = vld [vmem:[%s4886_s6 + $0x178] sm:$0xff] }
 0x1d6   : > { %2042 = vmatpush.msrb.mxu3 %v2041_v13  ;;  %v2135_v13 = vld [vmem:[%s4886_s6 + $0x268] sm:$0xff] }
 0x1d7   : > { %v1423_v36 = vadd.f32 %v1393_v37, %v1340_v30  ;;  %v1244_v37 = vadd.f32 %v3764_v3, %v3762_v2  ;;  %v2039_v30 = vld [vmem:[%s4886_s6 + $0x168] sm:$0xff] }
 0x1d9   : > { %1662 = vmatmul.f32.gmra.mxu3 %v3694_v23  ;;  %v1506_v33 = vadd.f32 %v3774_v51, %v1423_v36 }
 0x1da   : > { %1745 = vmatmul.f32.gmra.mxu2 %v1689_v38  ;;  %v3806_v55 = vpop.f32.mrf.mxu0 }
 0x1db   : > { %v1589_v57 = vadd.f32 %v1559_v27, %v1506_v33 }
 0x1dc   : > { %v1313_v54 = vpop.f32.mrf.mxu3 }
 0x1dd   : > { %v1396_v17 = vpop.f32.mrf.mxu2 }
 0x1e1   : > { %1665 = vmatmul.f32.gmra.mxu3 %v1607_v40 }
 0x1e2   : > { %1748 = vmatmul.f32.gmra.mxu2 %v1690_v41  ;;  %v3810_v60 = vpop.f32.mrf.mxu0  ;;  %v1241_v41 = vadd.f32 %v3760_v63, %v3758_v62  ;;  %v1966_v62 = vld [vmem:[%s4886_s6 + $0xd8] sm:$0xff] }
 0x1e3   : > { %1975 = vmatpush.msra.mxu1 %v1966_v62 }
 0x1e4   : > { %v3792_v11 = vpop.f32.mrf.mxu3 }
 0x1e5   : > { %v3794_v45 = vpop.f32.mrf.mxu2  ;;  %v1342_v61 = vadd.f32 %v3792_v11, %v1244_v37  ;;  %v2035_v37 = vld [vmem:[%s4886_s6 + $0x148] sm:$0xff] }
 0x1e9   : > { %1668 = vmatmul.f32.gmra.mxu3 %v1608_v47  ;;  %v1562_v47 = vpop.f32.mrf.mxu1 }
 0x1ea   : > { %1751 = vmatmul.f32.gmra.mxu2 %v1691_v48  ;;  %v3817_v9 = vpop.f32.mrf.mxu0  ;;  %v1341_v48 = vadd.f32 %v1313_v54, %v1241_v41  ;;  %v1962_v41 = vld [vmem:[%s4886_s6 + $0xb8] sm:$0xff] }
 0x1ec   : > { %v3796_v49 = vpop.f32.mrf.mxu3  ;;  %v1424_v20 = vadd.f32 %v1396_v17, %v1341_v48  ;;  %v3849_v17 = vld [vmem:[%s4885_s5] ss:$0 sm:$0xff] }
 0x1ed   : > { %v3798_v23 = vpop.f32.mrf.mxu2  ;;  %v1343_v21 = vadd.f32 %v3796_v49, %v3766_v10  ;;  %v2040_v10 = vld [vmem:[%s4886_s6 + $0x170] sm:$0xff] }
 0x1ee   : > { %2043 = vmatpush.msrb.mxu3 %v2040_v10  ;;  %v2183_v10 = vld [vmem:[%s4886_s6 + $0x2e8] sm:$0xff] }
 0x1f0   : > { %2044 = vmatpush.msrb.mxu3 %v2039_v30  ;;  %v2182_v30 = vld [vmem:[%s4886_s6 + $0x2e0] sm:$0xff] }
 0x1f1   : > { %v1565_v54 = vpop.f32.mrf.mxu1 }
 0x1f2   : > { %v1808_v28 = vpop.f32.mrf.mxu0 }
 0x1f4   : > { %v3802_v52 = vpop.f32.mrf.mxu3 }
 0x1f5   : > { %v3804_v53 = vpop.f32.mrf.mxu2  ;;  %v1344_v33 = vadd.f32 %v3802_v52, %v3770_v16 }
 0x1f7   : > { %v1427_v18 = vadd.f32 %v3804_v53, %v1344_v33  ;;  %v1961_v53 = vld [vmem:[%s4886_s6 + $0xb0] sm:$0xff] }
 0x1fc   : > { %v1325_v56 = vpop.f32.mrf.mxu3 }
 0x1fd   : > { %v1408_v42 = vpop.f32.mrf.mxu2  ;;  %v1345_v43 = vadd.f32 %v1325_v56, %v1253_v25  ;;  %v1811_v56 = vpop.f32.mrf.mxu0 }
 0x1ff   : > { %v3808_v58 = vadd.f32 %v1408_v42, %v1345_v43  ;;  %v1507_v43 = vadd.f32 %v3777_v31, %v1424_v20 }
 0x201   : > { %v1590_v2 = vadd.f32 %v1562_v47, %v1507_v43  ;;  %v1510_v43 = vadd.f32 %v3787_v39, %v1427_v18  ;;  %v2137_v39 = vld [vmem:[%s4886_s6 + $0x278] sm:$0xff]  ;;  %v2132_v18 = vld [vmem:[%s4886_s6 + $0x250] sm:$0xff] }
 0x202   : > { %2138 = vmatpush.msra.mxu2 %v2137_v39  ;;  %v2129_v39 = vld [vmem:[%s4886_s6 + $0x238] sm:$0xff] }
 0x204   : > { %v1328_v1 = vpop.f32.mrf.mxu3 }
 0x205   : > { %v1411_v4 = vpop.f32.mrf.mxu2  ;;  %v1346_v5 = vadd.f32 %v1328_v1, %v1256_v0  ;;  %v1814_v1 = vpop.f32.mrf.mxu0 }
 0x207   : > { %v3815_v6 = vadd.f32 %v1411_v4, %v1346_v5  ;;  %v1425_v5 = vadd.f32 %v3794_v45, %v1342_v61  ;;  %v1965_v45 = vld [vmem:[%s4886_s6 + $0xd0] sm:$0xff] }
 0x208   : > { %1976 = vmatpush.msra.mxu1 %v1965_v45 }
 0x209   : > { %v1508_v11 = vadd.f32 %v3780_v34, %v1425_v5  ;;  %v1426_v34 = vadd.f32 %v3798_v23, %v1343_v21  ;;  %v2038_v23 = vld [vmem:[%s4886_s6 + $0x160] sm:$0xff]  ;;  %v2184_v21 = vld [vmem:[%s4886_s6 + $0x2f0] sm:$0xff] }
 0x20a   : > { %2045 = vmatpush.msrb.mxu3 %v2038_v23 }
 0x20c   : > { %v1331_v12 = vpop.f32.mrf.mxu3  ;;  %2046 = vmatpush.msrb.mxu3 %v2037_v22  ;;  %v2028_v22 = vld [vmem:[%s4886_s6 + $0x110] sm:$0xff] }
 0x20d   : > { %v1414_v14 = vpop.f32.mrf.mxu2  ;;  %v1347_v15 = vadd.f32 %v1331_v12, %v1259_v8  ;;  %v1817_v49 = vpop.f32.mrf.mxu0 }
 0x20f   : > { %v3819_v19 = vadd.f32 %v1414_v14, %v1347_v15  ;;  %v1568_v14 = vpop.f32.mrf.mxu1 }
 0x214   : > { %v1334_v25 = vpop.f32.mrf.mxu3 }
 0x215   : > { %v1417_v26 = vpop.f32.mrf.mxu2  ;;  %v1348_v29 = vadd.f32 %v1334_v25, %v1262_v24  ;;  %v1820_v62 = vpop.f32.mrf.mxu0 }
 0x217   : > { %v3826_v7 = vadd.f32 %v1417_v26, %v1348_v29  ;;  %v1964_v26 = vld [vmem:[%s4886_s6 + $0xc8] sm:$0xff]  ;;  %v1963_v29 = vld [vmem:[%s4886_s6 + $0xc0] sm:$0xff]  ;;  %v1571_v47 = vpop.f32.mrf.mxu1 }
 0x218   : > { %1977 = vmatpush.msra.mxu1 %v1964_v26 }
 0x21a   : > { %1978 = vmatpush.msra.mxu1 %v1963_v29  ;;  %v2134_v29 = vld [vmem:[%s4886_s6 + $0x260] sm:$0xff] }
 0x21c   : > { %v1337_v38 = vpop.f32.mrf.mxu3  ;;  %1979 = vmatpush.msra.mxu1 %v1962_v41  ;;  %v2029_v41 = vld [vmem:[%s4886_s6 + $0x118] sm:$0xff] }
 0x21d   : > { %v1420_v40 = vpop.f32.mrf.mxu2  ;;  %v1349_v32 = vadd.f32 %v1337_v38, %v1265_v35 }
 0x21e   : > { %1980 = vmatpush.msra.mxu1 %v1961_v53  ;;  %v1512_v53 = vadd.f32 %v3800_v50, %v3815_v6  ;;  %v2178_v50 = vld [vmem:[%s4886_s6 + $0x2c0] sm:$0xff] }
 0x21f   : > { %v3831_v59 = vadd.f32 %v1420_v40, %v1349_v32  ;;  %v1509_v32 = vadd.f32 %v3784_v46, %v1426_v34  ;;  %v2036_v46 = vld [vmem:[%s4886_s6 + $0x150] sm:$0xff]  ;;  %v1574_v5 = vpop.f32.mrf.mxu1 }
 0x220   : > { %2047 = vmatpush.msrb.mxu3 %v2036_v46  ;;  %v1957_v34 = vld [vmem:[%s4886_s6 + $0x90] sm:$0xff] }
 0x221   : > { %v2180_v46 = vld [vmem:[%s4886_s6 + $0x2d0] sm:$0xff] }
 0x222   : > { %2048 = vmatpush.msrb.mxu3 %v2035_v37 }
 0x224   : > { %v1642_v63 = vpop.f32.mrf.mxu3 }
 0x225   : > { %v1725_v51 = vpop.f32.mrf.mxu2  ;;  %v1672_v42 = vadd.f32 %v1642_v63, %v1589_v57  ;;  %v1592_v57 = vadd.f32 %v1568_v14, %v1509_v32  ;;  %v1959_v14 = vld [vmem:[%s4886_s6 + $0xa0] sm:$0xff] }
 0x227   : > { %v1755_v0 = vadd.f32 %v1725_v51, %v1672_v42  ;;  %v1577_v32 = vpop.f32.mrf.mxu1 }
 0x229   : > { %v1838_v4 = vadd.f32 %v1808_v28, %v1755_v0  ;;  %v1591_v28 = vadd.f32 %v1565_v54, %v1508_v11  ;;  %v1593_v11 = vadd.f32 %v1571_v47, %v1510_v43  ;;  %v2133_v47 = vld [vmem:[%s4886_s6 + $0x258] sm:$0xff] }
 0x22b   : > { %v1852_v8 = vadd.f32 %v3849_v17, %v1838_v4  ;;  %v1960_v4 = vld [vmem:[%s4886_s6 + $0xa8] sm:$0xff] }
 0x22c   : > { %v1645_v3 = vpop.f32.mrf.mxu3  ;;  %1981 = vmatpush.msra.mxu1 %v1960_v4  ;;  %v2130_v4 = vld [vmem:[%s4886_s6 + $0x240] sm:$0xff] }
 0x22d   : > { %v1728_v12 = vpop.f32.mrf.mxu2  ;;  %v1862_v15 = vmax.f32 %v1852_v8, 0.0  ;;  %v1673_v31 = vadd.f32 %v1645_v3, %v1590_v2  ;;  %v2033_v2 = vld [vmem:[%s4886_s6 + $0x138] sm:$0xff]  ;;  %v2136_v3 = vld [vmem:[%s4886_s6 + $0x270] sm:$0xff] }
 0x22e   : > { %1982 = vmatpush.msra.mxu1 %v1959_v14  ;;  %2139 = vmatpush.msra.mxu2 %v2136_v3  ;;  %v1947_v3 = vld [vmem:[%s4886_s6 + $0x58] sm:$0xff]  ;;  %v2176_v14 = vld [vmem:[%s4886_s6 + $0x2b0] sm:$0xff] }
 0x22f   : > { %1872 = vst [vmem:[#allocation4] sm:$0xff] %v1862_v15  ;;  %v1756_v24 = vadd.f32 %v1728_v12, %v1673_v31  ;;  %v2185_v12 = vld [vmem:[%s4886_s6 + $0x2f8] sm:$0xff]  ;;  %v2032_v15 = vld [vmem:[%s4886_s6 + $0x130] sm:$0xff] }
 0x230   : > { %2186 = vmatpush.msrb.mxu0 %v2185_v12  ;;  %2140 = vmatpush.msra.mxu2 %v2135_v13  ;;  %v2128_v12 = vld [vmem:[%s4886_s6 + $0x230] sm:$0xff] }
 0x231   : > { %v1839_v25 = vadd.f32 %v1811_v56, %v1756_v24  ;;  %v1958_v24 = vld [vmem:[%s4886_s6 + $0x98] sm:$0xff] }
 0x232   : > { %2187 = vmatpush.msrb.mxu0 %v2184_v21  ;;  %1983 = vmatpush.msra.mxu1 %v1958_v24 }
 0x233   : > { %v1853_v27 = vadd.f32 %v3849_v17, %v1839_v25  ;;  %v2031_v25 = vld [vmem:[%s4886_s6 + $0x128] sm:$0xff]  ;;  %2141 = vmatpush.msra.mxu2 %v2134_v29  ;;  %v1513_v29 = vadd.f32 %v3806_v55, %v3819_v19  ;;  %v2173_v55 = vld [vmem:[%s4886_s6 + $0x298] sm:$0xff] }
 0x234   : > { %v1648_v35 = vpop.f32.mrf.mxu3  ;;  %2188 = vmatpush.msrb.mxu0 %v2183_v10  ;;  %1984 = vmatpush.msra.mxu1 %v1957_v34  ;;  %v1945_v10 = vld [vmem:[%s4886_s6 + $0x48] sm:$0xff]  ;;  %v1580_v34 = vpop.f32.mrf.mxu1 }
 0x235   : > { %v1731_v36 = vpop.f32.mrf.mxu2  ;;  %v1863_v38 = vmax.f32 %v1853_v27, 0.0  ;;  %v1674_v40 = vadd.f32 %v1648_v35, %v1591_v28  ;;  %v2030_v28 = vld [vmem:[%s4886_s6 + $0x120] sm:$0xff]  ;;  %v1956_v35 = vld [vmem:[%s4886_s6 + $0x88] sm:$0xff]  ;;  %2142 = vmatpush.msra.mxu2 %v2133_v47  ;;  %v1943_v47 = vld [vmem:[%s4886_s6 + $0x38] sm:$0xff] }
 0x236   : > { %2189 = vmatpush.msrb.mxu0 %v2182_v30  ;;  %1985 = vmatpush.msra.mxu1 %v1956_v35 }
 0x237   : > { %1873 = vst [vmem:[#allocation4 + $0x8] sm:$0xff] %v1863_v38  ;;  %v1757_v48 = vadd.f32 %v1731_v36, %v1674_v40  ;;  %v1511_v36 = vadd.f32 %v3790_v44, %v3808_v58  ;;  %v1823_v38 = vpop.f32.mrf.mxu0  ;;  %v2181_v44 = vld [vmem:[%s4886_s6 + $0x2d8] sm:$0xff]  ;;  %v1955_v58 = vld [vmem:[%s4886_s6 + $0x80] sm:$0xff]  ;;  %2143 = vmatpush.msra.mxu2 %v2132_v18 }
 0x238   : > { %2190 = vmatpush.msrb.mxu0 %v2181_v44  ;;  %1986 = vmatpush.msra.mxu1 %v1955_v58  ;;  %v2124_v44 = vld [vmem:[%s4886_s6 + $0x210] sm:$0xff] }
 0x239   : > { %v1840_v56 = vadd.f32 %v1814_v1, %v1757_v48  ;;  %v2034_v1 = vld [vmem:[%s4886_s6 + $0x140] sm:$0xff]  ;;  %v1594_v48 = vadd.f32 %v1574_v5, %v1511_v36  ;;  %v2172_v58 = vld [vmem:[%s4886_s6 + $0x290] sm:$0xff] }
 0x23a   : > { %2049 = vmatpush.msrb.mxu3 %v2034_v1  ;;  %2191 = vmatpush.msrb.mxu0 %v2180_v46  ;;  %v2026_v1 = vld [vmem:[%s4886_s6 + $0x100] sm:$0xff]  ;;  %v2123_v46 = vld [vmem:[%s4886_s6 + $0x208] sm:$0xff] }
 0x23b   : > { %v1854_v20 = vadd.f32 %v3849_v17, %v1840_v56  ;;  %v1951_v56 = vld [vmem:[%s4886_s6 + $0x78] sm:$0xff]  ;;  %v1944_v36 = vld [vmem:[%s4886_s6 + $0x40] sm:$0xff] }
 0x23c   : > { %v1651_v16 = vpop.f32.mrf.mxu3  ;;  %2050 = vmatpush.msrb.mxu3 %v2033_v2  ;;  %1997 = vmatpush.msrb.mxu1 %v1951_v56  ;;  %v2177_v2 = vld [vmem:[%s4886_s6 + $0x2b8] sm:$0xff] }
 0x23d   : > { %v1734_v52 = vpop.f32.mrf.mxu2  ;;  %v1864_v63 = vmax.f32 %v1854_v20, 0.0  ;;  %v1675_v51 = vadd.f32 %v1651_v16, %v1592_v57 }
 0x23e   : > { %v1882_v54 = vld [vmem:[#allocation4] ss:$2 sm:$0xff]  ;;  %v1892_v42 = vld [vmem:[#allocation4 + $0x1] ss:$2 sm:$0xff]  ;;  %2051 = vmatpush.msrb.mxu3 %v2032_v15 }
 0x23f   : > { %v1901_v61 = vmax.f32 %v1882_v54, %v1892_v42  ;;  %1874 = vst [vmem:[#allocation4 + $0x10] sm:$0xff] %v1864_v63  ;;  %v1758_v0 = vadd.f32 %v1734_v52, %v1675_v51  ;;  %v2027_v63 = vld [vmem:[%s4886_s6 + $0x108] sm:$0xff]  ;;  %v1826_v6 = vpop.f32.mrf.mxu0 }
 0x240   : > { %2052 = vmatpush.msrb.mxu3 %v2031_v25  ;;  %v2131_v51 = vld [vmem:[%s4886_s6 + $0x248] sm:$0xff] }
 0x241   : > { %1906 = vst [vmem:[#allocation9] sm:$0xff] %v1901_v61  ;;  %v1841_v8 = vadd.f32 %v1817_v49, %v1758_v0  ;;  %v2179_v42 = vld [vmem:[%s4886_s6 + $0x2c8] sm:$0xff]  ;;  %2144 = vmatpush.msra.mxu2 %v2131_v51  ;;  %v1514_v51 = vadd.f32 %v3810_v60, %v3826_v7  ;;  %v2230_v60 = vld [vmem:[%s4886_s6 + $0x360] sm:$0xff] }
 0x242   : > { %2053 = vmatpush.msrb.mxu3 %v2030_v28  ;;  %2192 = vmatpush.msrb.mxu0 %v2179_v42  ;;  %v1949_v0 = vld [vmem:[%s4886_s6 + $0x68] sm:$0xff]  ;;  %v2233_v28 = vld [vmem:[%s4886_s6 + $0x378] sm:$0xff] }
 0x243   : > { %v1855_v31 = vadd.f32 %v3849_v17, %v1841_v8  ;;  %2145 = vmatpush.msra.mxu2 %v2130_v4  ;;  %v1948_v8 = vld [vmem:[%s4886_s6 + $0x60] sm:$0xff]  ;;  %v2127_v25 = vld [vmem:[%s4886_s6 + $0x228] sm:$0xff]  ;;  %v1939_v4 = vld [vmem:[%s4886_s6 + $0x18] sm:$0xff] }
 0x244   : > { %v1654_v45 = vpop.f32.mrf.mxu3  ;;  %2054 = vmatpush.msrb.mxu3 %v2029_v41  ;;  %2193 = vmatpush.msrb.mxu0 %v2178_v50  ;;  %v1941_v42 = vld [vmem:[%s4886_s6 + $0x28] sm:$0xff] }
 0x245   : > { %v1737_v26 = vpop.f32.mrf.mxu2  ;;  %v1865_v49 = vmax.f32 %v1855_v31, 0.0  ;;  %v1676_v27 = vadd.f32 %v1654_v45, %v1593_v11  ;;  %v1595_v31 = vadd.f32 %v1577_v32, %v1512_v53  ;;  %2146 = vmatpush.msra.mxu2 %v2129_v39  ;;  %v1946_v11 = vld [vmem:[%s4886_s6 + $0x50] sm:$0xff]  ;;  %v2175_v45 = vld [vmem:[%s4886_s6 + $0x2a8] sm:$0xff]  ;;  %v2122_v53 = vld [vmem:[%s4886_s6 + $0x200] sm:$0xff] }
 0x246   : > { %2055 = vmatpush.msrb.mxu3 %v2028_v22  ;;  %2194 = vmatpush.msrb.mxu0 %v2177_v2  ;;  %v2228_v39 = vld [vmem:[%s4886_s6 + $0x350] sm:$0xff] }
 0x247   : > { %1875 = vst [vmem:[#allocation4 + $0x18] sm:$0xff] %v1865_v49  ;;  %v1759_v40 = vadd.f32 %v1737_v26, %v1676_v27  ;;  %2147 = vmatpush.msra.mxu2 %v2128_v12  ;;  %v2126_v49 = vld [vmem:[%s4886_s6 + $0x220] sm:$0xff]  ;;  %v1829_v32 = vpop.f32.mrf.mxu0  ;;  %v1938_v2 = vld [vmem:[%s4886_s6 + $0x10] sm:$0xff] }
 0x248   : > { %2056 = vmatpush.msrb.mxu3 %v2027_v63  ;;  %2195 = vmatpush.msrb.mxu0 %v2176_v14  ;;  %v2174_v27 = vld [vmem:[%s4886_s6 + $0x2a0] sm:$0xff]  ;;  %v2231_v63 = vld [vmem:[%s4886_s6 + $0x368] sm:$0xff] }
 0x249   : > { %v1842_v23 = vadd.f32 %v1820_v62, %v1759_v40  ;;  %v1950_v62 = vld [vmem:[%s4886_s6 + $0x70] sm:$0xff]  ;;  %v1913_v35 = vld [vmem:[#allocation9] sm:$0xf]  ;;  %2148 = vmatpush.msra.mxu2 %v2127_v25 }
 0x24a   : > { %1998 = vmatpush.msrb.mxu1 %v1950_v62  ;;  %2057 = vmatpush.msrb.mxu3 %v2026_v1  ;;  %v2229_v1 = vld [vmem:[%s4886_s6 + $0x358] sm:$0xff]  ;;  %v2328_v25 = vld [vmem:[%s4886_s6 + $0x470] sm:$0xff] }
 0x24b   : > { %v1856_v33 = vadd.f32 %v3849_v17, %v1842_v23  ;;  %2196 = vmatpush.msrb.mxu0 %v2175_v45  ;;  %v2125_v23 = vld [vmem:[%s4886_s6 + $0x218] sm:$0xff]  ;;  %2149 = vmatpush.msra.mxu2 %v2126_v49  ;;  %v1515_v45 = vadd.f32 %v3817_v9, %v3831_v59  ;;  %v2327_v9 = vld [vmem:[%s4886_s6 + $0x468] sm:$0xff] }
 0x24c   : > { %v1657_v20 = vpop.f32.mrf.mxu3  ;;  %1999 = vmatpush.msrb.mxu1 %v1949_v0  ;;  %2234 = vmatpush.msra.mxu3 %v2233_v28  ;;  %v1940_v0 = vld [vmem:[%s4886_s6 + $0x20] sm:$0xff] }
 0x24d   : > { %v1740_v57 = vpop.f32.mrf.mxu2  ;;  %v1866_v16 = vmax.f32 %v1856_v33, 0.0  ;;  %v1677_v52 = vadd.f32 %v1657_v20, %v1594_v48  ;;  %2197 = vmatpush.msrb.mxu0 %v2174_v27  ;;  %v1596_v48 = vadd.f32 %v1580_v34, %v1513_v29  ;;  %2150 = vmatpush.msra.mxu2 %v2125_v23  ;;  %v1936_v34 = vld [vmem:[%s4886_s6] sm:$0xff]  ;;  %v2089_v27 = vld [vmem:[%s4886_s6 + $0x1f8] sm:$0xff]  ;;  %v2224_v23 = vld [vmem:[%s4886_s6 + $0x330] sm:$0xff] }
 0x24e   : > { %v1884_v37 = vld [vmem:[#allocation4 + $0x10] ss:$2 sm:$0xff]  ;;  %v1894_v54 = vld [vmem:[#allocation4 + $0x11] ss:$2 sm:$0xff]  ;;  %2000 = vmatpush.msrb.mxu1 %v1948_v8 }
 0x24f   : > { %v1902_v43 = vmax.f32 %v1884_v37, %v1894_v54  ;;  %1876 = vst [vmem:[#allocation4 + $0x20] sm:$0xff] %v1866_v16  ;;  %v1760_v61 = vadd.f32 %v1740_v57, %v1677_v52  ;;  %2198 = vmatpush.msrb.mxu0 %v2173_v55  ;;  %2151 = vmatpush.msra.mxu2 %v2124_v44  ;;  %v1942_v57 = vld [vmem:[%s4886_s6 + $0x30] sm:$0xff]  ;;  %v2171_v16 = vld [vmem:[%s4886_s6 + $0x288] sm:$0xff]  ;;  %v2225_v29 = vld [vmem:[%s4886_s6 + $0x338] sm:$0xff] }
 0x250   : > { %2001 = vmatpush.msrb.mxu1 %v1947_v3 }
 0x251   : > { %1907 = vst [vmem:[#allocation9 + $0x8] sm:$0xff] %v1902_v43  ;;  %v1843_v5 = vadd.f32 %v1823_v38, %v1760_v61  ;;  %v2232_v38 = vld [vmem:[%s4886_s6 + $0x370] sm:$0xff]  ;;  %2199 = vmatpush.msrb.mxu0 %v2172_v58  ;;  %2152 = vmatpush.msra.mxu2 %v2123_v46  ;;  %v2170_v43 = vld [vmem:[%s4886_s6 + $0x280] sm:$0xff]  ;;  %v1583_v61 = vpop.f32.mrf.mxu1 }
 0x252   : > { %2002 = vmatpush.msrb.mxu1 %v1946_v11  ;;  %2235 = vmatpush.msra.mxu3 %v2232_v38  ;;  %v1597_v8 = vadd.f32 %v1583_v61, %v1514_v51  ;;  %v1937_v11 = vld [vmem:[%s4886_s6 + $0x8] sm:$0xff]  ;;  %v2222_v46 = vld [vmem:[%s4886_s6 + $0x320] sm:$0xff]  ;;  %v2084_v61 = vld [vmem:[%s4886_s6 + $0x1d0] sm:$0xff] }
 0x253   : > { %v1857_v15 = vadd.f32 %v3849_v17, %v1843_v5  ;;  %2200 = vmatpush.msrb.mxu0 %v2171_v16  ;;  %2153 = vmatpush.msra.mxu2 %v2122_v53  ;;  %v2323_v53 = vld [vmem:[%s4886_s6 + $0x448] sm:$0xff] }
 0x254   : > { %v1660_v21 = vpop.f32.mrf.mxu3  ;;  %2003 = vmatpush.msrb.mxu1 %v1945_v10  ;;  %2236 = vmatpush.msra.mxu3 %v2231_v63  ;;  %v2226_v10 = vld [vmem:[%s4886_s6 + $0x340] sm:$0xff] }
 0x255   : > { %v1743_v24 = vpop.f32.mrf.mxu2  ;;  %v1867_v26 = vmax.f32 %v1857_v15, 0.0  ;;  %v1678_v13 = vadd.f32 %v1660_v21, %v1595_v31  ;;  %2201 = vmatpush.msrb.mxu0 %v2170_v43  ;;  %v2227_v31 = vld [vmem:[%s4886_s6 + $0x348] sm:$0xff]  ;;  %v2329_v21 = vld [vmem:[%s4886_s6 + $0x478] sm:$0xff]  ;;  %v2220_v43 = vld [vmem:[%s4886_s6 + $0x310] sm:$0xff] }
 0x256   : > { %2004 = vmatpush.msrb.mxu1 %v1944_v36  ;;  %2237 = vmatpush.msra.mxu3 %v2230_v60  ;;  %v2326_v36 = vld [vmem:[%s4886_s6 + $0x460] sm:$0xff] }
 0x257   : > { %1877 = vst [vmem:[#allocation4 + $0x28] sm:$0xff] %v1867_v26  ;;  %v1761_v30 = vadd.f32 %v1743_v24, %v1678_v13  ;;  %v1832_v24 = vpop.f32.mrf.mxu0  ;;  %2330 = vmatpush.msrb.mxu2 %v2329_v21  ;;  %v2322_v60 = vld [vmem:[%s4886_s6 + $0x440] sm:$0xff] }
 0x258   : > { %v1914_v40 = vld [vmem:[#allocation9 + $0x5] sm:$0xf]  ;;  %2005 = vmatpush.msrb.mxu1 %v1943_v47  ;;  %2238 = vmatpush.msra.mxu3 %v2229_v1  ;;  %v1918_v13 = vld [vmem:[#allocation9 + $0xa] sm:$0xf]  ;;  %v2325_v47 = vld [vmem:[%s4886_s6 + $0x458] sm:$0xff] }
 0x259   : > { %v1844_v19 = vadd.f32 %v1826_v6, %v1761_v30  ;;  %v1915_v41 = vmax.f32 %v1913_v35, %v1914_v40  ;;  %2331 = vmatpush.msrb.mxu2 %v2328_v25  ;;  %v1586_v30 = vpop.f32.mrf.mxu1  ;;  %v2088_v35 = vld [vmem:[%s4886_s6 + $0x1f0] sm:$0xff]  ;;  %v2078_v25 = vld [vmem:[%s4886_s6 + $0x1a0] sm:$0xff] }
 0x25a   : > { %2006 = vmatpush.msrb.mxu1 %v1942_v57  ;;  %2239 = vmatpush.msra.mxu3 %v2228_v39  ;;  %v1598_v40 = vadd.f32 %v1586_v30, %v1515_v45  ;;  %v2320_v39 = vld [vmem:[%s4886_s6 + $0x430] sm:$0xff] }
 0x25b   : > { %v1858_v33 = vadd.f32 %v3849_v17, %v1844_v19  ;;  %1916 = vst [vmem:[#allocation5 + $0x7] sm:$0xf] %v1915_v41  ;;  %2332 = vmatpush.msrb.mxu2 %v2327_v9  ;;  %v2087_v41 = vld [vmem:[%s4886_s6 + $0x1e8] sm:$0xff]  ;;  %v2316_v45 = vld [vmem:[%s4886_s6 + $0x410] sm:$0xff] }
 0x25c   : > { %v1663_v56 = vpop.f32.mrf.mxu3  ;;  %2007 = vmatpush.msrb.mxu1 %v1941_v42  ;;  %2240 = vmatpush.msra.mxu3 %v2227_v31  ;;  %v2076_v9 = vld [vmem:[%s4886_s6 + $0x190] sm:$0xff] }
 0x25d   : > { %v1746_v22 = vpop.f32.mrf.mxu2  ;;  %v1868_v18 = vmax.f32 %v1858_v33, 0.0  ;;  %v1679_v20 = vadd.f32 %v1663_v56, %v1596_v48  ;;  %2333 = vmatpush.msrb.mxu2 %v2326_v36  ;;  %v2086_v33 = vld [vmem:[%s4886_s6 + $0x1e0] sm:$0xff] }
 0x25e   : > { %v1886_v52 = vld [vmem:[#allocation4 + $0x20] ss:$2 sm:$0xff]  ;;  %v1896_v62 = vld [vmem:[#allocation4 + $0x21] ss:$2 sm:$0xff]  ;;  %2008 = vmatpush.msrb.mxu1 %v1940_v0  ;;  %2241 = vmatpush.msra.mxu3 %v2226_v10 }
 0x25f   : > { %v1903_v37 = vmax.f32 %v1886_v52, %v1896_v62  ;;  %1878 = vst [vmem:[#allocation4 + $0x30] sm:$0xff] %v1868_v18  ;;  %v1762_v54 = vadd.f32 %v1746_v22, %v1679_v20  ;;  %v1835_v22 = vpop.f32.mrf.mxu0  ;;  %v2324_v18 = vld [vmem:[%s4886_s6 + $0x450] sm:$0xff]  ;;  %2334 = vmatpush.msrb.mxu2 %v2325_v47  ;;  %v2221_v52 = vld [vmem:[%s4886_s6 + $0x318] sm:$0xff]  ;;  %v2083_v0 = vld [vmem:[%s4886_s6 + $0x1c8] sm:$0xff] }
 0x260   : > { %2009 = vmatpush.msrb.mxu1 %v1939_v4  ;;  %2242 = vmatpush.msra.mxu3 %v2225_v29  ;;  %v2085_v62 = vld [vmem:[%s4886_s6 + $0x1d8] sm:$0xff] }
 0x261   : > { %1908 = vst [vmem:[#allocation9 + $0x10] sm:$0xff] %v1903_v37  ;;  %v1845_v7 = vadd.f32 %v1829_v32, %v1762_v54  ;;  %v2223_v32 = vld [vmem:[%s4886_s6 + $0x328] sm:$0xff]  ;;  %2335 = vmatpush.msrb.mxu2 %v2324_v18  ;;  %v2321_v4 = vld [vmem:[%s4886_s6 + $0x438] sm:$0xff] }
 0x262   : > { %v1952_v50 = vld [vmem:[#allocation5 + $0x1] sm:$0xff]  ;;  %2010 = vmatpush.msrb.mxu1 %v1938_v2  ;;  %2243 = vmatpush.msra.mxu3 %v2224_v23  ;;  %v2275_v18 = vld [vmem:[%s4886_s6 + $0x3c8] sm:$0xff] }
 0x263   : > { %v2023_v6 = vld [vmem:[#allocation5 + $0x2] sm:$0xff]  ;;  %v1859_v5 = vadd.f32 %v3849_v17, %v1845_v7  ;;  %1987 = vmatmul.f32.vlgmr.msra.gmra.mxu1 %v1952_v50  ;;  %v2219_v7 = vld [vmem:[%s4886_s6 + $0x308] sm:$0xff]  ;;  %2336 = vmatpush.msrb.mxu2 %v2323_v53  ;;  %v2266_v53 = vld [vmem:[%s4886_s6 + $0x380] sm:$0xff] }
 0x264   : > { %2058 = vmatmul.f32.vlgmr.msrb.gmra.mxu3 %v2023_v6  ;;  %v1666_v3 = vpop.f32.mrf.mxu3  ;;  %2011 = vmatpush.msrb.mxu1 %v1937_v11  ;;  %v2218_v6 = vld [vmem:[%s4886_s6 + $0x300] sm:$0xff]  ;;  %v2081_v2 = vld [vmem:[%s4886_s6 + $0x1b8] sm:$0xff]  ;;  %v2079_v11 = vld [vmem:[%s4886_s6 + $0x1a8] sm:$0xff] }
 0x265   : > { %v1749_v12 = vpop.f32.mrf.mxu2  ;;  %v1869_v14 = vmax.f32 %v1859_v5, 0.0  ;;  %v1680_v15 = vadd.f32 %v1666_v3, %v1597_v8  ;;  %2244 = vmatpush.msra.mxu3 %v2223_v32  ;;  %2337 = vmatpush.msrb.mxu2 %v2322_v60  ;;  %v2082_v5 = vld [vmem:[%s4886_s6 + $0x1c0] sm:$0xff]  ;;  %v2319_v3 = vld [vmem:[%s4886_s6 + $0x428] sm:$0xff]  ;;  %v1933_v36 = vld [vmem:[#allocation5] sm:$0xff] }
 0x266   : > { %2012 = vmatpush.msrb.mxu1 %v1936_v34  ;;  %v2281_v23 = vld [vmem:[%s4886_s6 + $0x3f8] sm:$0xff]  ;;  %v2265_v60 = vld [vmem:[#allocation5 + $0x1d] sm:$0x3f] }
 0x267   : > { %1879 = vst [vmem:[#allocation4 + $0x38] sm:$0xff] %v1869_v14  ;;  %v1763_v26 = vadd.f32 %v1749_v12, %v1680_v15  ;;  %2245 = vmatpush.msra.mxu3 %v2222_v46  ;;  %2338 = vmatpush.msrb.mxu2 %v2321_v4  ;;  %v2080_v12 = vld [vmem:[%s4886_s6 + $0x1b0] sm:$0xff]  ;;  %v2318_v14 = vld [vmem:[%s4886_s6 + $0x420] sm:$0xff]  ;;  %v2277_v32 = vld [vmem:[%s4886_s6 + $0x3d8] sm:$0xff] }
 0x268   : > { %v1919_v49 = vld [vmem:[#allocation9 + $0xf] sm:$0xf]  ;;  %2090 = vmatpush.msra.mxu1 %v2089_v27  ;;  %v1923_v1 = vld [vmem:[#allocation9 + $0x14] sm:$0xf]  ;;  %v2428_v4 = vld [vmem:[%s4888_s8 + $0xf8] sm:$0xff] }
 0x269   : > { %v1846_v59 = vadd.f32 %v1832_v24, %v1763_v26  ;;  %v1920_v28 = vmax.f32 %v1918_v13, %v1919_v49  ;;  %2246 = vmatpush.msra.mxu3 %v2221_v52  ;;  %2339 = vmatpush.msrb.mxu2 %v2320_v39  ;;  %v2317_v24 = vld [vmem:[%s4886_s6 + $0x418] sm:$0xff]  ;;  %v2315_v27 = vld [vmem:[%s4886_s6 + $0x408] sm:$0xff]  ;;  %v2272_v46 = vld [vmem:[%s4886_s6 + $0x3b0] sm:$0xff] }
 0x26a   : > { %2091 = vmatpush.msra.mxu1 %v2088_v35  ;;  %v2077_v49 = vld [vmem:[%s4886_s6 + $0x198] sm:$0xff]  ;;  %v2075_v35 = vld [vmem:[%s4886_s6 + $0x188] sm:$0xff]  ;;  %2429 = vmatpush.msra.mxu0 %v2428_v4 }
 0x26b   : > { %v1860_v38 = vadd.f32 %v3849_v17, %v1846_v59  ;;  %1921 = vst [vmem:[#allocation5 + $0xd] sm:$0xf] %v1920_v28  ;;  %2247 = vmatpush.msra.mxu3 %v2220_v43  ;;  %2340 = vmatpush.msrb.mxu2 %v2319_v3  ;;  %v2314_v59 = vld [vmem:[%s4886_s6 + $0x400] sm:$0xff]  ;;  %v2485_v39 = vld [vmem:[%s4888_s8 + $0x178] sm:$0xff] }
 0x26c   : > { %v1669_v55 = vpop.f32.mrf.mxu3  ;;  %2092 = vmatpush.msra.mxu1 %v2087_v41  ;;  %v2424_v3 = vld [vmem:[%s4888_s8 + $0xd8] sm:$0xff] }
 0x26d   : > { %v1752_v19 = vpop.f32.mrf.mxu2  ;;  %v1870_v44 = vmax.f32 %v1860_v38, 0.0  ;;  %v1681_v58 = vadd.f32 %v1669_v55, %v1598_v40  ;;  %2248 = vmatpush.msra.mxu3 %v2219_v7  ;;  %2341 = vmatpush.msrb.mxu2 %v2318_v14  ;;  %v2074_v40 = vld [vmem:[%s4886_s6 + $0x180] sm:$0xff]  ;;  %v2280_v55 = vld [vmem:[%s4886_s6 + $0x3f0] sm:$0xff] }
 0x26e   : > { %v1888_v48 = vld [vmem:[#allocation4 + $0x30] ss:$2 sm:$0xff]  ;;  %v1898_v56 = vld [vmem:[#allocation4 + $0x31] ss:$2 sm:$0xff]  ;;  %2093 = vmatpush.msra.mxu1 %v2086_v33  ;;  %v2276_v33 = vld [vmem:[%s4886_s6 + $0x3d0] sm:$0xff] }
 0x26f   : > { %v1904_v20 = vmax.f32 %v1888_v48, %v1898_v56  ;;  %1880 = vst [vmem:[#allocation4 + $0x40] sm:$0xff] %v1870_v44  ;;  %v1764_v57 = vadd.f32 %v1752_v19, %v1681_v58  ;;  %2249 = vmatpush.msra.mxu3 %v2218_v6  ;;  %2342 = vmatpush.msrb.mxu2 %v2317_v24  ;;  %v2279_v19 = vld [vmem:[%s4886_s6 + $0x3e8] sm:$0xff]  ;;  %v2278_v58 = vld [vmem:[%s4886_s6 + $0x3e0] sm:$0xff]  ;;  %v2427_v6 = vld [vmem:[%s4888_s8 + $0xf0] sm:$0xff] }
 0x270   : > { %2094 = vmatpush.msra.mxu1 %v2085_v62  ;;  %v2271_v62 = vld [vmem:[%s4886_s6 + $0x3a8] sm:$0xff]  ;;  %2430 = vmatpush.msra.mxu0 %v2427_v6  ;;  %v2423_v14 = vld [vmem:[%s4888_s8 + $0xd0] sm:$0xff]  ;;  %v2400_v6 = vld [vmem:[%s4888_s8 + $0x20] sm:$0xff] }
 0x271   : > { %1909 = vst [vmem:[#allocation9 + $0x18] sm:$0xff] %v1904_v20  ;;  %v1847_v16 = vadd.f32 %v1835_v22, %v1764_v57  ;;  %2343 = vmatpush.msrb.mxu2 %v2316_v45  ;;  %v2274_v20 = vld [vmem:[%s4886_s6 + $0x3c0] sm:$0xff]  ;;  %v2273_v57 = vld [vmem:[%s4886_s6 + $0x3b8] sm:$0xff]  ;;  %v2483_v24 = vld [vmem:[%s4888_s8 + $0x168] sm:$0xff] }
 0x272   : > { %v1953_v63 = vld [vmem:[#allocation5 + $0x9] sm:$0xff]  ;;  %2095 = vmatpush.msra.mxu1 %v2084_v61 }
 0x273   : > { %v2024_v51 = vld [vmem:[#allocation5 + $0xa] sm:$0xff]  ;;  %v1861_v54 = vadd.f32 %v3849_v17, %v1847_v16  ;;  %1990 = vmatmul.f32.gmra.mxu1 %v1953_v63  ;;  %2344 = vmatpush.msrb.mxu2 %v2315_v27 }
 0x274   : > { %v2119_v37 = vld [vmem:[#allocation5 + $0x7] sm:$0xff]  ;;  %2061 = vmatmul.f32.gmra.mxu3 %v2024_v51  ;;  %2096 = vmatpush.msra.mxu1 %v2083_v0  ;;  %v2270_v63 = vld [vmem:[%s4886_s6 + $0x3a0] sm:$0xff] }
 0x275   : > { %v4178_v42 = vld [vmem:[#allocation5 + $0x8] sm:$0xff]  ;;  %2154 = vmatmul.f32.vlgmr.msra.gmra.mxu2 %v2119_v37  ;;  %v1871_v17 = vmax.f32 %v1861_v54, 0.0  ;;  %v2313_v37 = vld [vmem:[#allocation5 + $0x1e] sm:$0x3f]  ;;  %v2408_v45 = vld [vmem:[%s4888_s8 + $0x60] sm:$0xff] }
 0x276   : > { %2202 = vmatmul.f32.vlgmr.msrb.gmra.mxu0 %v4178_v42  ;;  %2097 = vmatpush.msra.mxu1 %v2082_v5  ;;  %v2071_v16 = vld [vmem:[#allocation5 + $0x6] sm:$0xff]  ;;  %v2426_v5 = vld [vmem:[%s4888_s8 + $0xe8] sm:$0xff] }
 0x277   : > { %1881 = vst [vmem:[#allocation4 + $0x48] sm:$0x3f] %v1871_v17  ;;  %2345 = vmatpush.msrb.mxu2 %v2314_v59  ;;  %v2269_v51 = vld [vmem:[%s4886_s6 + $0x398] sm:$0xff]  ;;  %v2268_v54 = vld [vmem:[%s4886_s6 + $0x390] sm:$0xff]  ;;  %2431 = vmatpush.msra.mxu0 %v2426_v5  ;;  %v2474_v5 = vld [vmem:[%s4888_s8 + $0x120] sm:$0xff] }
 0x278   : > { %v1924_v50 = vld [vmem:[#allocation9 + $0x19] sm:$0xf]  ;;  %2098 = vmatpush.msra.mxu1 %v2081_v2  ;;  %v2425_v2 = vld [vmem:[%s4888_s8 + $0xe0] sm:$0xff] }
 0x279   : > { %v1925_v8 = vmax.f32 %v1923_v1, %v1924_v50  ;;  %2432 = vmatpush.msra.mxu0 %v2425_v2  ;;  %v2516_v2 = vld [vmem:[%s4888_s8 + $0x1c0] sm:$0xff] }
 0x27a   : > { %2099 = vmatpush.msra.mxu1 %v2080_v12 }
 0x27b   : > { %1926 = vst [vmem:[#allocation5 + $0x13] sm:$0xf] %v1925_v8  ;;  %v2411_v8 = vld [vmem:[%s4888_s8 + $0x78] sm:$0xff]  ;;  %2433 = vmatpush.msra.mxu0 %v2424_v3 }
 0x27c   : > { %2100 = vmatpush.msra.mxu1 %v2079_v11  ;;  %2449 = vmatpush.msrb.mxu3 %v2411_v8  ;;  %v2422_v11 = vld [vmem:[%s4888_s8 + $0xc8] sm:$0xff]  ;;  %v2561_v3 = vld [vmem:[%s4888_s8 + $0x278] sm:$0xff] }
 0x27d   : > { %2434 = vmatpush.msra.mxu0 %v2423_v14  ;;  %v2473_v14 = vld [vmem:[%s4888_s8 + $0x118] sm:$0xff] }
 0x27e   : > { %v1890_v15 = vld [vmem:[#allocation4 + $0x40] ss:$2 sm:$0xff]  ;;  %v1900_v31 = vld [vmem:[#allocation4 + $0x41] ss:$2 sm:$0xff]  ;;  %2101 = vmatpush.msra.mxu1 %v2078_v25  ;;  %v2421_v25 = vld [vmem:[%s4888_s8 + $0xc0] sm:$0xff] }
 0x27f   : > { %v1905_v21 = vmax.f32 %v1890_v15, %v1900_v31  ;;  %v2410_v15 = vld [vmem:[%s4888_s8 + $0x70] sm:$0xff]  ;;  %2435 = vmatpush.msra.mxu0 %v2422_v11 }
 0x280   : > { %2102 = vmatpush.msra.mxu1 %v2077_v49  ;;  %v2484_v31 = vld [vmem:[%s4888_s8 + $0x170] sm:$0xff]  ;;  %2450 = vmatpush.msrb.mxu3 %v2410_v15  ;;  %v2515_v15 = vld [vmem:[%s4888_s8 + $0x1b8] sm:$0xff] }
 0x281   : > { %1910 = vst [vmem:[#allocation9 + $0x20] sm:$0xff] %v1905_v21  ;;  %v2409_v21 = vld [vmem:[%s4888_s8 + $0x68] sm:$0xff]  ;;  %2436 = vmatpush.msra.mxu0 %v2421_v25  ;;  %v2514_v25 = vld [vmem:[%s4888_s8 + $0x1b0] sm:$0xff] }
 0x282   : > { %v1954_v26 = vld [vmem:[#allocation5 + $0x11] sm:$0x3f]  ;;  %2103 = vmatpush.msra.mxu1 %v2076_v9  ;;  %2451 = vmatpush.msrb.mxu3 %v2409_v21  ;;  %v2481_v9 = vld [vmem:[%s4888_s8 + $0x158] sm:$0xff]  ;;  %v2398_v21 = vld [vmem:[%s4888_s8 + $0x10] sm:$0xff] }
 0x283   : > { %v2025_v13 = vld [vmem:[#allocation5 + $0x12] sm:$0x3f]  ;;  %1993 = vmatmul.f32.gmra.mxu1 %v1954_v26 }
 0x284   : > { %v2120_v10 = vld [vmem:[#allocation5 + $0xf] sm:$0xff]  ;;  %2064 = vmatmul.f32.gmra.mxu3 %v2025_v13  ;;  %2104 = vmatpush.msra.mxu1 %v2075_v35  ;;  %v2406_v35 = vld [vmem:[%s4888_s8 + $0x50] sm:$0xff] }
 0x285   : > { %v2168_v34 = vld [vmem:[#allocation5 + $0x10] sm:$0xff]  ;;  %2157 = vmatmul.f32.gmra.mxu2 %v2120_v10  ;;  %v2420_v13 = vld [vmem:[%s4888_s8 + $0xb8] sm:$0xff]  ;;  %2452 = vmatpush.msrb.mxu3 %v2408_v45 }
 0x286   : > { %2205 = vmatmul.f32.gmra.mxu0 %v2168_v34  ;;  %v2215_v38 = vld [vmem:[#allocation5 + $0xc] sm:$0xff]  ;;  %2105 = vmatpush.msra.mxu1 %v2074_v40  ;;  %v2418_v40 = vld [vmem:[%s4888_s8 + $0xa8] sm:$0xff] }
 0x287   : > { %v1935_v48 = vld [vmem:[#allocation5 + $0x10] sm:$0x3f]  ;;  %v2407_v10 = vld [vmem:[%s4888_s8 + $0x58] sm:$0xff]  ;;  %2437 = vmatpush.msra.mxu0 %v2420_v13  ;;  %v2559_v13 = vld [vmem:[%s4888_s8 + $0x268] sm:$0xff] }
 0x288   : > { %v1928_v28 = vld [vmem:[#allocation9 + $0x1e] sm:$0xf]  ;;  %v1929_v29 = vld [vmem:[#allocation9 + $0x23] sm:$0xf]  ;;  %2453 = vmatpush.msrb.mxu3 %v2407_v10 }
 0x289   : > { %v1930_v30 = vmax.f32 %v1928_v28, %v1929_v29  ;;  %v2311_v56 = vld [vmem:[#allocation5 + $0xe] sm:$0xff] }
 0x28a   : > { %v2263_v61 = vld [vmem:[#allocation5 + $0xd] sm:$0xff]  ;;  %2454 = vmatpush.msrb.mxu3 %v2406_v35 }
 0x28b   : > { %2013 = vmatmul.f32.vlgmr.msrb.gmra.mxu1 %v1933_v36  ;;  %1931 = vst [vmem:[#allocation5 + $0x19] sm:$0xf] %v1930_v30  ;;  %v2482_v26 = vld [vmem:[%s4888_s8 + $0x160] sm:$0xff]  ;;  %v2523_v34 = vld [vmem:[%s4888_s8 + $0x1f8] sm:$0xff]  ;;  %v2419_v30 = vld [vmem:[%s4888_s8 + $0xb0] sm:$0xff] }
 0x28c   : > { %2250 = vmatmul.f32.vlgmr.msra.gmra.mxu3 %v2215_v38  ;;  %2282 = vmatpush.msrb.mxu1 %v2281_v23  ;;  %v2480_v36 = vld [vmem:[%s4888_s8 + $0x150] sm:$0xff]  ;;  %v2405_v23 = vld [vmem:[%s4888_s8 + $0x48] sm:$0xff]  ;;  %v2396_v35 = vld [vmem:[%s4888_s8] sm:$0xff] }
 0x28d   : > { %2524 = vmatpush.msra.mxu2 %v2523_v34  ;;  %2438 = vmatpush.msra.mxu0 %v2419_v30  ;;  %v2522_v38 = vld [vmem:[%s4888_s8 + $0x1f0] sm:$0xff]  ;;  %v2397_v34 = vld [vmem:[%s4888_s8 + $0x8] sm:$0xff] }
 0x28e   : > { %2283 = vmatpush.msrb.mxu1 %v2280_v55  ;;  %v2479_v55 = vld [vmem:[%s4888_s8 + $0x148] sm:$0xff]  ;;  %2455 = vmatpush.msrb.mxu3 %v2405_v23 }
 0x28f   : > { %2525 = vmatpush.msra.mxu2 %v2522_v38  ;;  %2439 = vmatpush.msra.mxu0 %v2418_v40  ;;  %v2512_v38 = vld [vmem:[%s4888_s8 + $0x1a0] sm:$0xff] }
 0x290   : > { %2284 = vmatpush.msrb.mxu1 %v2279_v19  ;;  %v2521_v19 = vld [vmem:[%s4888_s8 + $0x1e8] sm:$0xff] }
 0x291   : > { %2526 = vmatpush.msra.mxu2 %v2521_v19  ;;  %v2557_v19 = vld [vmem:[%s4888_s8 + $0x258] sm:$0xff] }
 0x292   : > { %v2121_v41 = vld [vmem:[#allocation5 + $0x17] sm:$0x3f]  ;;  %2285 = vmatpush.msrb.mxu1 %v2278_v58 }
 0x293   : > { %v2169_v47 = vld [vmem:[#allocation5 + $0x18] sm:$0x3f]  ;;  %2016 = vmatmul.f32.gmra.mxu1 %v4178_v42  ;;  %2160 = vmatmul.f32.gmra.mxu2 %v2121_v41  ;;  %v2417_v41 = vld [vmem:[%s4888_s8 + $0xa0] sm:$0xff] }
 0x294   : > { %v2216_v44 = vld [vmem:[#allocation5 + $0x14] sm:$0xff]  ;;  %2208 = vmatmul.f32.gmra.mxu0 %v2169_v47  ;;  %2286 = vmatpush.msrb.mxu1 %v2277_v32  ;;  %v2217_v22 = vld [vmem:[#allocation5 + $0x1c] sm:$0x3f] }
 0x295   : > { %2253 = vmatmul.f32.gmra.mxu3 %v2216_v44  ;;  %v2312_v52 = vld [vmem:[#allocation5 + $0x16] sm:$0xff]  ;;  %2440 = vmatpush.msra.mxu0 %v2417_v41  ;;  %v2599_v41 = vld [vmem:[%s4888_s8 + $0x2f8] sm:$0xff] }
 0x296   : > { %2287 = vmatpush.msrb.mxu1 %v2276_v33  ;;  %v2267_v42 = vld [vmem:[%s4886_s6 + $0x388] sm:$0xff]  ;;  %v2404_v44 = vld [vmem:[%s4888_s8 + $0x40] sm:$0xff] }
 0x297   : > { %v2073_v43 = vld [vmem:[#allocation5 + $0x16] sm:$0x3f]  ;;  %2456 = vmatpush.msrb.mxu3 %v2404_v44 }
 0x298   : > { %2288 = vmatpush.msrb.mxu1 %v2275_v18  ;;  %v2264_v17 = vld [vmem:[#allocation5 + $0x15] sm:$0xff]  ;;  %v2519_v18 = vld [vmem:[%s4888_s8 + $0x1d8] sm:$0xff] }
 0x299   : > { %v2478_v58 = vld [vmem:[%s4888_s8 + $0x140] sm:$0xff] }
 0x29a   : > { %2289 = vmatpush.msrb.mxu1 %v2274_v20  ;;  %v2520_v32 = vld [vmem:[%s4888_s8 + $0x1e0] sm:$0xff] }
 0x29b   : > { %2019 = vmatmul.f32.gmra.mxu1 %v1935_v48  ;;  %2346 = vmatmul.f32.vlgmr.msrb.gmra.mxu2 %v2311_v56  ;;  %v2416_v48 = vld [vmem:[%s4888_s8 + $0x98] sm:$0xff] }
 0x29c   : > { %2290 = vmatpush.msrb.mxu1 %v2273_v57  ;;  %2527 = vmatpush.msra.mxu2 %v2520_v32  ;;  %v2556_v32 = vld [vmem:[%s4888_s8 + $0x250] sm:$0xff] }
 0x29d   : > { %2256 = vmatmul.f32.gmra.mxu3 %v2217_v22  ;;  %v2477_v22 = vld [vmem:[%s4888_s8 + $0x138] sm:$0xff]  ;;  %2441 = vmatpush.msra.mxu0 %v2416_v48 }
 0x29e   : > { %2291 = vmatpush.msrb.mxu1 %v2272_v46  ;;  %2528 = vmatpush.msra.mxu2 %v2519_v18  ;;  %v2555_v18 = vld [vmem:[%s4888_s8 + $0x248] sm:$0xff] }
 0x2a0   : > { %2292 = vmatpush.msrb.mxu1 %v2271_v62 }
 0x2a2   : > { %2293 = vmatpush.msrb.mxu1 %v2270_v63  ;;  %v2415_v63 = vld [vmem:[%s4888_s8 + $0x90] sm:$0xff] }
 0x2a3   : > { %2106 = vmatmul.f32.vlgmr.msra.gmra.mxu1 %v2071_v16  ;;  %2349 = vmatmul.f32.gmra.mxu2 %v2312_v52 }
 0x2a4   : > { %2294 = vmatpush.msrb.mxu1 %v2269_v51  ;;  %v2402_v51 = vld [vmem:[%s4888_s8 + $0x30] sm:$0xff]  ;;  %2442 = vmatpush.msra.mxu0 %v2415_v63  ;;  %v2509_v63 = vld [vmem:[%s4888_s8 + $0x188] sm:$0xff] }
 0x2a6   : > { %2295 = vmatpush.msrb.mxu1 %v2268_v54 }
 0x2a8   : > { %2296 = vmatpush.msrb.mxu1 %v2267_v42  ;;  %v2518_v42 = vld [vmem:[%s4888_s8 + $0x1d0] sm:$0xff] }
 0x2a9   : > { %2529 = vmatpush.msra.mxu2 %v2518_v42 }
 0x2aa   : > { %2297 = vmatpush.msrb.mxu1 %v2266_v53 }
 0x2ab   : > { %2109 = vmatmul.f32.gmra.mxu1 %v2311_v56  ;;  %2352 = vmatmul.f32.gmra.mxu2 %v2313_v37  ;;  %v2403_v56 = vld [vmem:[%s4888_s8 + $0x38] sm:$0xff]  ;;  %v2476_v37 = vld [vmem:[%s4888_s8 + $0x130] sm:$0xff] }
 0x2ac   : > { %2486 = vmatpush.msra.mxu1 %v2485_v39  ;;  %2457 = vmatpush.msrb.mxu3 %v2403_v56  ;;  %v2636_v56 = vld [vmem:[%s4888_s8 + $0x370] sm:$0xff] }
 0x2ae   : > { %2487 = vmatpush.msra.mxu1 %v2484_v31  ;;  %2458 = vmatpush.msrb.mxu3 %v2402_v51  ;;  %v2560_v31 = vld [vmem:[%s4888_s8 + $0x270] sm:$0xff] }
 0x2b0   : > { %2488 = vmatpush.msra.mxu1 %v2483_v24  ;;  %v2472_v24 = vld [vmem:[%s4888_s8 + $0x110] sm:$0xff] }
 0x2b2   : > { %2489 = vmatpush.msra.mxu1 %v2482_v26 }
 0x2b3   : > { %2112 = vmatmul.f32.gmra.mxu1 %v2073_v43  ;;  %v2414_v43 = vld [vmem:[%s4888_s8 + $0x88] sm:$0xff] }
 0x2b4   : > { %2490 = vmatpush.msra.mxu1 %v2481_v9  ;;  %2443 = vmatpush.msra.mxu0 %v2414_v43  ;;  %v2508_v43 = vld [vmem:[%s4888_s8 + $0x180] sm:$0xff] }
 0x2b6   : > { %2491 = vmatpush.msra.mxu1 %v2480_v36  ;;  %v2470_v36 = vld [vmem:[%s4888_s8 + $0x100] sm:$0xff] }
 0x2b8   : > { %2492 = vmatpush.msra.mxu1 %v2479_v55 }
 0x2ba   : > { %2493 = vmatpush.msra.mxu1 %v2478_v58  ;;  %v2511_v58 = vld [vmem:[%s4888_s8 + $0x198] sm:$0xff] }
 0x2bb   : > { %2298 = vmatmul.f32.vlgmr.msrb.gmra.mxu1 %v2263_v61  ;;  %v2401_v61 = vld [vmem:[%s4888_s8 + $0x28] sm:$0xff] }
 0x2bc   : > { %2494 = vmatpush.msra.mxu1 %v2477_v22  ;;  %2459 = vmatpush.msrb.mxu3 %v2401_v61  ;;  %v2510_v22 = vld [vmem:[%s4888_s8 + $0x190] sm:$0xff] }
 0x2be   : > { %2495 = vmatpush.msra.mxu1 %v2476_v37  ;;  %2460 = vmatpush.msrb.mxu3 %v2400_v6  ;;  %v2552_v6 = vld [vmem:[%s4888_s8 + $0x230] sm:$0xff] }
 0x2c3   : > { %2301 = vmatmul.f32.gmra.mxu1 %v2264_v17  ;;  %v2475_v17 = vld [vmem:[%s4888_s8 + $0x128] sm:$0xff] }
 0x2c4   : > { %2496 = vmatpush.msra.mxu1 %v2475_v17  ;;  %v2553_v17 = vld [vmem:[%s4888_s8 + $0x238] sm:$0xff] }
 0x2c6   : > { %2497 = vmatpush.msra.mxu1 %v2474_v5  ;;  %v2594_v5 = vld [vmem:[%s4888_s8 + $0x2d0] sm:$0xff] }
 0x2c8   : > { %2498 = vmatpush.msra.mxu1 %v2473_v14  ;;  %v2593_v14 = vld [vmem:[%s4888_s8 + $0x2c8] sm:$0xff] }
 0x2ca   : > { %2499 = vmatpush.msra.mxu1 %v2472_v24 }
 0x2cb   : > { %2304 = vmatmul.f32.gmra.mxu1 %v2265_v60 }
 0x2e0   : > { %v4302_v7 = vpop.f32.mrf.mxu1 }
 0x2e7   : > { %v2059_v49 = vpop.f32.mrf.mxu3 }
 0x2f0   : > { %v4304_v0 = vpop.f32.mrf.mxu1 }
 0x2f7   : > { %v2062_v28 = vpop.f32.mrf.mxu3 }
 0x2f8   : > { %v2155_v59 = vpop.f32.mrf.mxu2 }
 0x300   : > { %v4306_v1 = vpop.f32.mrf.mxu1 }
 0x307   : > { %v4426_v20 = vpop.f32.mrf.mxu3 }
 0x308   : > { %v4311_v50 = vpop.f32.mrf.mxu1  ;;  %v4401_v47 = vpop.f32.mrf.mxu2 }
 0x309   : > { %v2015_v33 = vadd.f32 %v4311_v50, %v4302_v7  ;;  %v2517_v7 = vld [vmem:[%s4888_s8 + $0x1c8] sm:$0xff]  ;;  %v2413_v50 = vld [vmem:[%s4888_s8 + $0x80] sm:$0xff] }
 0x30a   : > { %2530 = vmatpush.msra.mxu2 %v2517_v7  ;;  %2444 = vmatpush.msra.mxu0 %v2413_v50  ;;  %v2675_v50 = vld [vmem:[%s4888_s8 + $0x3f8] sm:$0xff] }
 0x30b   : > { %v2068_v46 = vadd.f32 %v2059_v49, %v2015_v33  ;;  %v2471_v49 = vld [vmem:[%s4888_s8 + $0x108] sm:$0xff]  ;;  %v2598_v33 = vld [vmem:[%s4888_s8 + $0x2f0] sm:$0xff] }
 0x30c   : > { %2531 = vmatpush.msra.mxu2 %v2516_v2  ;;  %2562 = vmatpush.msrb.mxu0 %v2561_v3  ;;  %v2674_v2 = vld [vmem:[%s4888_s8 + $0x3f0] sm:$0xff] }
 0x30d   : > { %2500 = vmatpush.msra.mxu1 %v2471_v49  ;;  %v2591_v49 = vld [vmem:[%s4888_s8 + $0x2b8] sm:$0xff] }
 0x30e   : > { %2532 = vmatpush.msra.mxu2 %v2515_v15  ;;  %2563 = vmatpush.msrb.mxu0 %v2560_v31 }
 0x30f   : > { %v2251_v4 = vpop.f32.mrf.mxu3  ;;  %2501 = vmatpush.msra.mxu1 %v2470_v36  ;;  %v2628_v36 = vld [vmem:[%s4888_s8 + $0x330] sm:$0xff] }
 0x310   : > { %v4331_v12 = vpop.f32.mrf.mxu1  ;;  %2533 = vmatpush.msra.mxu2 %v2514_v25  ;;  %2564 = vmatpush.msrb.mxu0 %v2559_v13  ;;  %v2630_v13 = vld [vmem:[%s4888_s8 + $0x340] sm:$0xff] }
 0x311   : > { %v2018_v62 = vadd.f32 %v4331_v12, %v4304_v0  ;;  %v2203_v0 = vpop.f32.mrf.mxu0  ;;  %v2399_v12 = vld [vmem:[%s4888_s8 + $0x18] sm:$0xff] }
 0x312   : > { %2461 = vmatpush.msrb.mxu3 %v2399_v12  ;;  %v2551_v12 = vld [vmem:[%s4888_s8 + $0x228] sm:$0xff] }
 0x313   : > { %v2069_v60 = vadd.f32 %v2062_v28, %v2018_v62  ;;  %v4511_v28 = vld [vmem:[%s4887_s7] ss:$0 sm:$0xff]  ;;  %v2635_v62 = vld [vmem:[%s4888_s8 + $0x368] sm:$0xff] }
 0x314   : > { %2462 = vmatpush.msrb.mxu3 %v2398_v21  ;;  %v2673_v21 = vld [vmem:[%s4888_s8 + $0x3e8] sm:$0xff] }
 0x316   : > { %v4428_v52 = vpop.f32.mrf.mxu2  ;;  %2463 = vmatpush.msrb.mxu3 %v2397_v34  ;;  %v2549_v34 = vld [vmem:[%s4888_s8 + $0x218] sm:$0xff] }
 0x318   : > { %v4369_v27 = vpop.f32.mrf.mxu1  ;;  %2464 = vmatpush.msrb.mxu3 %v2396_v35  ;;  %v2254_v44 = vpop.f32.mrf.mxu3 }
 0x319   : > { %v2021_v11 = vadd.f32 %v4369_v27, %v4306_v1  ;;  %v2513_v27 = vld [vmem:[%s4888_s8 + $0x1a8] sm:$0xff]  ;;  %v2206_v30 = vpop.f32.mrf.mxu0 }
 0x31a   : > { %2534 = vmatpush.msra.mxu2 %v2513_v27  ;;  %2600 = vmatpush.msra.mxu3 %v2599_v41  ;;  %v2546_v41 = vld [vmem:[%s4888_s8 + $0x200] sm:$0xff] }
 0x31b   : > { %v2070_v9 = vadd.f32 %v4426_v20, %v2021_v11  ;;  %v2597_v20 = vld [vmem:[%s4888_s8 + $0x2e8] sm:$0xff] }
 0x31c   : > { %2535 = vmatpush.msra.mxu2 %v2512_v38  ;;  %2601 = vmatpush.msra.mxu3 %v2598_v33  ;;  %v2631_v11 = vld [vmem:[%s4888_s8 + $0x348] sm:$0xff]  ;;  %v2670_v38 = vld [vmem:[%s4888_s8 + $0x3d0] sm:$0xff]  ;;  %v2626_v33 = vld [vmem:[%s4888_s8 + $0x320] sm:$0xff] }
 0x31e   : > { %v2347_v45 = vpop.f32.mrf.mxu2  ;;  %2536 = vmatpush.msra.mxu2 %v2511_v58  ;;  %2602 = vmatpush.msra.mxu3 %v2597_v20  ;;  %v2588_v58 = vld [vmem:[%s4888_s8 + $0x2a0] sm:$0xff]  ;;  %v2586_v20 = vld [vmem:[%s4888_s8 + $0x290] sm:$0xff] }
 0x320   : > { %v2107_v29 = vpop.f32.mrf.mxu1  ;;  %2537 = vmatpush.msra.mxu2 %v2510_v22  ;;  %v2257_v3 = vpop.f32.mrf.mxu3  ;;  %v2625_v22 = vld [vmem:[%s4888_s8 + $0x318] sm:$0xff] }
 0x321   : > { %v2116_v16 = vadd.f32 %v2107_v29, %v2068_v46  ;;  %v2558_v29 = vld [vmem:[%s4888_s8 + $0x260] sm:$0xff]  ;;  %v2209_v61 = vpop.f32.mrf.mxu0 }
 0x322   : > { %2565 = vmatpush.msrb.mxu0 %v2558_v29  ;;  %2538 = vmatpush.msra.mxu2 %v2509_v63  ;;  %v2548_v29 = vld [vmem:[%s4888_s8 + $0x210] sm:$0xff]  ;;  %v2665_v63 = vld [vmem:[%s4888_s8 + $0x3a8] sm:$0xff] }
 0x323   : > { %v2164_v54 = vadd.f32 %v2155_v59, %v2116_v16 }
 0x324   : > { %2566 = vmatpush.msrb.mxu0 %v2557_v19  ;;  %2539 = vmatpush.msra.mxu2 %v2508_v43  ;;  %v2669_v19 = vld [vmem:[%s4888_s8 + $0x3c8] sm:$0xff] }
 0x325   : > { %v2212_v39 = vadd.f32 %v2203_v0, %v2164_v54  ;;  %v2596_v54 = vld [vmem:[%s4888_s8 + $0x2e0] sm:$0xff] }
 0x326   : > { %2567 = vmatpush.msrb.mxu0 %v2556_v32  ;;  %v2350_v51 = vpop.f32.mrf.mxu2  ;;  %2603 = vmatpush.msra.mxu3 %v2596_v54 }
 0x327   : > { %v2260_v1 = vadd.f32 %v2251_v4, %v2212_v39  ;;  %v2633_v4 = vld [vmem:[%s4888_s8 + $0x358] sm:$0xff]  ;;  %v2632_v39 = vld [vmem:[%s4888_s8 + $0x350] sm:$0xff]  ;;  %2676 = vmatpush.msrb.mxu2 %v2675_v50 }
 0x328   : > { %v2110_v57 = vpop.f32.mrf.mxu1  ;;  %2568 = vmatpush.msrb.mxu0 %v2555_v18  ;;  %v2667_v18 = vld [vmem:[%s4888_s8 + $0x3b8] sm:$0xff] }
 0x329   : > { %v2117_v8 = vadd.f32 %v2110_v57, %v2069_v60  ;;  %v2595_v60 = vld [vmem:[%s4888_s8 + $0x2d8] sm:$0xff]  ;;  %2677 = vmatpush.msrb.mxu2 %v2674_v2 }
 0x32a   : > { %2604 = vmatpush.msra.mxu3 %v2595_v60  ;;  %v2663_v60 = vld [vmem:[%s4888_s8 + $0x398] sm:$0xff] }
 0x32b   : > { %v2165_v26 = vadd.f32 %v4401_v47, %v2117_v8  ;;  %v2637_v47 = vld [vmem:[%s4888_s8 + $0x378] sm:$0xff]  ;;  %2678 = vmatpush.msrb.mxu2 %v2673_v21 }
 0x32c   : > { %2638 = vmatpush.msrb.mxu1 %v2637_v47  ;;  %2605 = vmatpush.msra.mxu3 %v2594_v5  ;;  %v2713_v5 = vld [vmem:[%s4888_s8 + $0x478] sm:$0xff] }
 0x32d   : > { %v2213_v55 = vadd.f32 %v2206_v30, %v2165_v26  ;;  %v2592_v26 = vld [vmem:[%s4888_s8 + $0x2c0] sm:$0xff]  ;;  %v2590_v30 = vld [vmem:[%s4888_s8 + $0x2b0] sm:$0xff] }
 0x32e   : > { %2639 = vmatpush.msrb.mxu1 %v2636_v56  ;;  %v2353_v25 = vpop.f32.mrf.mxu2  ;;  %2606 = vmatpush.msra.mxu3 %v2593_v14  ;;  %v2587_v56 = vld [vmem:[%s4888_s8 + $0x298] sm:$0xff]  ;;  %v2711_v14 = vld [vmem:[%s4888_s8 + $0x468] sm:$0xff] }
 0x32f   : > { %v2261_v16 = vadd.f32 %v2254_v44, %v2213_v55  ;;  %v2627_v55 = vld [vmem:[%s4888_s8 + $0x328] sm:$0xff] }
 0x330   : > { %v2113_v53 = vpop.f32.mrf.mxu1  ;;  %2640 = vmatpush.msrb.mxu1 %v2635_v62  ;;  %2607 = vmatpush.msra.mxu3 %v2592_v26  ;;  %v2623_v62 = vld [vmem:[%s4888_s8 + $0x308] sm:$0xff] }
 0x331   : > { %v2118_v40 = vadd.f32 %v2113_v53, %v2070_v9  ;;  %v2634_v53 = vld [vmem:[%s4888_s8 + $0x360] sm:$0xff]  ;;  %v2629_v9 = vld [vmem:[%s4888_s8 + $0x338] sm:$0xff]  ;;  %v2707_v26 = vld [vmem:[%s4888_s8 + $0x448] sm:$0xff] }
 0x332   : > { %2641 = vmatpush.msrb.mxu1 %v2634_v53  ;;  %2608 = vmatpush.msra.mxu3 %v2591_v49  ;;  %v2664_v53 = vld [vmem:[%s4888_s8 + $0x3a0] sm:$0xff]  ;;  %v2703_v49 = vld [vmem:[%s4888_s8 + $0x428] sm:$0xff] }
 0x333   : > { %v2166_v57 = vadd.f32 %v4428_v52, %v2118_v40  ;;  %v2554_v52 = vld [vmem:[%s4888_s8 + $0x240] sm:$0xff]  ;;  %v2547_v40 = vld [vmem:[%s4888_s8 + $0x208] sm:$0xff] }
 0x334   : > { %2569 = vmatpush.msrb.mxu0 %v2554_v52  ;;  %2642 = vmatpush.msrb.mxu1 %v2633_v4  ;;  %v2660_v4 = vld [vmem:[%s4888_s8 + $0x380] sm:$0xff] }
 0x335   : > { %v2214_v0 = vadd.f32 %v2209_v61, %v2166_v57  ;;  %2609 = vmatpush.msra.mxu3 %v2590_v30  ;;  %v2624_v57 = vld [vmem:[%s4888_s8 + $0x310] sm:$0xff]  ;;  %v2698_v30 = vld [vmem:[%s4888_s8 + $0x400] sm:$0xff] }
 0x336   : > { %2570 = vmatpush.msrb.mxu0 %v2553_v17  ;;  %2643 = vmatpush.msrb.mxu1 %v2632_v39 }
 0x337   : > { %v2262_v31 = vadd.f32 %v2257_v3, %v2214_v0  ;;  %v2661_v0 = vld [vmem:[%s4888_s8 + $0x388] sm:$0xff] }
 0x338   : > { %v2299_v10 = vpop.f32.mrf.mxu1  ;;  %2571 = vmatpush.msrb.mxu0 %v2552_v6  ;;  %2644 = vmatpush.msrb.mxu1 %v2631_v11 }
 0x339   : > { %v2308_v59 = vadd.f32 %v2299_v10, %v2260_v1  ;;  %v2672_v10 = vld [vmem:[%s4888_s8 + $0x3e0] sm:$0xff] }
 0x33a   : > { %2572 = vmatpush.msrb.mxu0 %v2551_v12  ;;  %2645 = vmatpush.msrb.mxu1 %v2630_v13  ;;  %v2712_v12 = vld [vmem:[%s4888_s8 + $0x470] sm:$0xff] }
 0x33b   : > { %v2356_v23 = vadd.f32 %v2347_v45, %v2308_v59  ;;  %v2550_v45 = vld [vmem:[%s4888_s8 + $0x220] sm:$0xff]  ;;  %v2671_v59 = vld [vmem:[%s4888_s8 + $0x3d8] sm:$0xff]  ;;  %2679 = vmatpush.msrb.mxu2 %v2672_v10 }
 0x33c   : > { %2573 = vmatpush.msrb.mxu0 %v2550_v45  ;;  %2646 = vmatpush.msrb.mxu1 %v2629_v9  ;;  %v2708_v45 = vld [vmem:[%s4888_s8 + $0x450] sm:$0xff]  ;;  %v2705_v10 = vld [vmem:[%s4888_s8 + $0x438] sm:$0xff] }
 0x33d   : > { %v2363_v48 = vadd.f32 %v4511_v28, %v2356_v23  ;;  %2680 = vmatpush.msrb.mxu2 %v2671_v59  ;;  %v2701_v9 = vld [vmem:[%s4888_s8 + $0x418] sm:$0xff]  ;;  %v2700_v59 = vld [vmem:[%s4888_s8 + $0x410] sm:$0xff] }
 0x33e   : > { %2574 = vmatpush.msrb.mxu0 %v2549_v34  ;;  %2647 = vmatpush.msrb.mxu1 %v2628_v36  ;;  %v2704_v34 = vld [vmem:[%s4888_s8 + $0x430] sm:$0xff] }
 0x33f   : > { %v2366_v46 = vmax.f32 %v2363_v48, 0.0  ;;  %2681 = vmatpush.msrb.mxu2 %v2670_v38  ;;  %v2668_v48 = vld [vmem:[%s4888_s8 + $0x3c0] sm:$0xff] }
 0x340   : > { %v2302_v37 = vpop.f32.mrf.mxu1  ;;  %2575 = vmatpush.msrb.mxu0 %v2548_v29  ;;  %2648 = vmatpush.msrb.mxu1 %v2627_v55  ;;  %v2699_v29 = vld [vmem:[%s4888_s8 + $0x408] sm:$0xff] }
 0x341   : > { %2369 = vst [vmem:[#allocation6] sm:$0xff] %v2366_v46  ;;  %v2309_v42 = vadd.f32 %v2302_v37, %v2261_v16  ;;  %2682 = vmatpush.msrb.mxu2 %v2669_v19  ;;  %v2666_v46 = vld [vmem:[%s4888_s8 + $0x3b0] sm:$0xff]  ;;  %v2585_v16 = vld [vmem:[%s4888_s8 + $0x288] sm:$0xff] }
 0x342   : > { %2576 = vmatpush.msrb.mxu0 %v2547_v40  ;;  %2649 = vmatpush.msrb.mxu1 %v2626_v33  ;;  %v2765_v33 = vld [vmem:[%s4890_s10 + $0x60] sm:$0xff] }
 0x343   : > { %v2357_v7 = vadd.f32 %v2350_v51, %v2309_v42  ;;  %2683 = vmatpush.msrb.mxu2 %v2668_v48  ;;  %v2584_v51 = vld [vmem:[%s4888_s8 + $0x280] sm:$0xff] }
 0x344   : > { %2577 = vmatpush.msrb.mxu0 %v2546_v41  ;;  %2650 = vmatpush.msrb.mxu1 %v2625_v22  ;;  %v2622_v42 = vld [vmem:[%s4888_s8 + $0x300] sm:$0xff]  ;;  %v2768_v41 = vld [vmem:[%s4890_s10 + $0x78] sm:$0xff] }
 0x345   : > { %v2364_v8 = vadd.f32 %v4511_v28, %v2357_v7  ;;  %2684 = vmatpush.msrb.mxu2 %v2667_v18  ;;  %v2662_v7 = vld [vmem:[%s4888_s8 + $0x390] sm:$0xff]  ;;  %v2769_v48 = vld [vmem:[%s4891_s11] sm:$0xff] }
 0x346   : > { %2651 = vmatpush.msrb.mxu1 %v2624_v57  ;;  %v2752_v22 = vld [vmem:[%s559_s0] sm:$0x1]  ;;  %v2763_v57 = vld [vmem:[%s4890_s10 + $0x50] sm:$0xff] }
 0x347   : > { %v2367_v15 = vmax.f32 %v2364_v8, 0.0  ;;  %2685 = vmatpush.msrb.mxu2 %v2666_v46  ;;  %v2762_v46 = vld [vmem:[%s4890_s10 + $0x48] sm:$0xff] }
 0x348   : > { %v2305_v24 = vpop.f32.mrf.mxu1  ;;  %2652 = vmatpush.msrb.mxu1 %v2623_v62 }
 0x349   : > { %2370 = vst [vmem:[#allocation6 + $0x8] sm:$0xff] %v2367_v15  ;;  %v2310_v1 = vadd.f32 %v2305_v24, %v2262_v31  ;;  %2686 = vmatpush.msrb.mxu2 %v2665_v63  ;;  %v2710_v15 = vld [vmem:[%s4888_s8 + $0x460] sm:$0xff]  ;;  %v2709_v31 = vld [vmem:[%s4888_s8 + $0x458] sm:$0xff] }
 0x34a   : > { %2653 = vmatpush.msrb.mxu1 %v2622_v42  ;;  %v2761_v63 = vld [vmem:[%s4890_s10 + $0x40] sm:$0xff]  ;;  %v2759_v42 = vld [vmem:[%s4890_s10 + $0x30] sm:$0xff] }
 0x34b   : > { %v2358_v27 = vadd.f32 %v2353_v25, %v2310_v1  ;;  %2687 = vmatpush.msrb.mxu2 %v2664_v53  ;;  %v2706_v1 = vld [vmem:[%s4888_s8 + $0x440] sm:$0xff] }
 0x34d   : > { %v2365_v35 = vadd.f32 %v4511_v28, %v2358_v27  ;;  %v2589_v28 = vld [vmem:[%s4888_s8 + $0x2a8] sm:$0xff]  ;;  %2688 = vmatpush.msrb.mxu2 %v2663_v60  ;;  %v2702_v27 = vld [vmem:[%s4888_s8 + $0x420] sm:$0xff] }
 0x34e   : > { %2610 = vmatpush.msra.mxu3 %v2589_v28  ;;  %v2757_v60 = vld [vmem:[%s4890_s10 + $0x20] sm:$0xff] }
 0x34f   : > { %v2368_v23 = vmax.f32 %v2365_v35, 0.0  ;;  %2689 = vmatpush.msrb.mxu2 %v2662_v7  ;;  %v2824_v7 = vld [vmem:[%s4893_s13 + $0x38] sm:$0xff] }
 0x350   : > { %v2372_v47 = vld [vmem:[#allocation6] ss:$2 sm:$0xff]  ;;  %v2376_v44 = vld [vmem:[#allocation6 + $0x1] ss:$2 sm:$0xff]  ;;  %2611 = vmatpush.msra.mxu3 %v2588_v58 }
 0x351   : > { %v2379_v32 = vmax.f32 %v2372_v47, %v2376_v44  ;;  %2371 = vst [vmem:[#allocation6 + $0x10] sm:$0x3f] %v2368_v23  ;;  %2690 = vmatpush.msrb.mxu2 %v2661_v0  ;;  %v2767_v47 = vld [vmem:[%s4890_s10 + $0x70] sm:$0xff]  ;;  %v2766_v44 = vld [vmem:[%s4890_s10 + $0x68] sm:$0xff] }
 0x352   : > { %2612 = vmatpush.msra.mxu3 %v2587_v56  ;;  %v2764_v56 = vld [vmem:[%s4890_s10 + $0x58] sm:$0xff]  ;;  %v2823_v0 = vld [vmem:[%s4893_s13 + $0x30] sm:$0xff] }
 0x353   : > { %2381 = vst [vmem:[#allocation9] sm:$0xff] %v2379_v32  ;;  %2691 = vmatpush.msrb.mxu2 %v2660_v4 }
 0x354   : > { %2613 = vmatpush.msra.mxu3 %v2586_v20 }
 0x356   : > { %2614 = vmatpush.msra.mxu3 %v2585_v16 }
 0x358   : > { %v2374_v37 = vld [vmem:[#allocation6 + $0x10] ss:$2 sm:$0xf]  ;;  %v2378_v52 = vld [vmem:[#allocation6 + $0x11] ss:$2 sm:$0xf]  ;;  %2615 = vmatpush.msra.mxu3 %v2584_v51 }
 0x359   : > { %v2380_v54 = vmax.f32 %v2374_v37, %v2378_v52  ;;  %v2760_v37 = vld [vmem:[%s4890_s10 + $0x38] sm:$0xff] }
 0x35a   : > { %v2385_v43 = vld [vmem:[#allocation9] sm:$0x3]  ;;  %v2386_v61 = vld [vmem:[#allocation9 + $0x3] sm:$0x3]  ;;  %v2390_v50 = vld [vmem:[#allocation9 + $0x6] sm:$0x3] }
 0x35b   : > { %2382 = vst [vmem:[#allocation9 + $0x8] sm:$0xf] %v2380_v54  ;;  %v2387_v17 = vmax.f32 %v2385_v43, %v2386_v61  ;;  %v3002_v54 = vld [vmem:[%s4889_s9] ss:$0 sm:$0xff]  ;;  %v2758_v61 = vld [vmem:[%s4890_s10 + $0x28] sm:$0xff] }
 0x35d   : > { %2388 = vst [vmem:[#allocation7 + $0x5] sm:$0x3] %v2387_v17 }
 0x362   : > { %v2391_v6 = vld [vmem:[#allocation9 + $0x9] sm:$0x3] }
 0x363   : > { %v2392_v8 = vmax.f32 %v2390_v50, %v2391_v6  ;;  %v2756_v50 = vld [vmem:[%s4890_s10 + $0x18] sm:$0xff]  ;;  %v2822_v6 = vld [vmem:[%s4893_s13 + $0x28] sm:$0xff] }
 0x364   : > { %v2412_v39 = vld [vmem:[#allocation7 + $0x1] sm:$0x3f] }
 0x365   : > { %v2395_v2 = vld [vmem:[#allocation7] sm:$0x3f]  ;;  %2445 = vmatmul.f32.vlgmr.msra.gmra.mxu0 %v2412_v39  ;;  %2393 = vst [vmem:[#allocation7 + $0x9] sm:$0x3] %v2392_v8  ;;  %v2754_v39 = vld [vmem:[%s4890_s10 + $0x8] sm:$0xff] }
 0x366   : > { %v2469_v3 = vld [vmem:[#allocation7 + $0x2] sm:$0x3f]  ;;  %2465 = vmatmul.f32.vlgmr.msrb.gmra.mxu3 %v2395_v2  ;;  %2714 = vmatpush.msra.mxu0 %v2713_v5  ;;  %v2755_v5 = vld [vmem:[%s4890_s10 + $0x10] sm:$0xff] }
 0x367   : > { %2502 = vmatmul.f32.vlgmr.msra.gmra.mxu1 %v2469_v3  ;;  %2789 = vmatpush.msrb.mxu3 %v2769_v48  ;;  %v2821_v8 = vld [vmem:[%s4893_s13 + $0x20] sm:$0xff] }
 0x368   : > { %2715 = vmatpush.msra.mxu0 %v2712_v12  ;;  %2794 = vmatpush.msra.mxu1 %v2768_v41  ;;  %v2753_v2 = vld [vmem:[%s4890_s10] sm:$0xff] }
 0x36a   : > { %2716 = vmatpush.msra.mxu0 %v2711_v14  ;;  %2795 = vmatpush.msra.mxu1 %v2767_v47 }
 0x36c   : > { %2717 = vmatpush.msra.mxu0 %v2710_v15  ;;  %v2507_v11 = vld [vmem:[#allocation7 + $0x4] sm:$0x3f]  ;;  %v2697_v35 = vld [vmem:[#allocation7 + $0xa] sm:$0x3f]  ;;  %2796 = vmatpush.msra.mxu1 %v2766_v44 }
 0x36d   : > { %v2545_v21 = vld [vmem:[#allocation7 + $0x5] sm:$0x3f]  ;;  %2540 = vmatmul.f32.vlgmr.msra.gmra.mxu2 %v2507_v11 }
 0x36e   : > { %v2583_v24 = vld [vmem:[#allocation7 + $0x6] sm:$0x3f]  ;;  %2578 = vmatmul.f32.vlgmr.msrb.gmra.mxu0 %v2545_v21  ;;  %2797 = vmatpush.msra.mxu1 %v2765_v33 }
 0x36f   : > { %v2621_v25 = vld [vmem:[#allocation7 + $0x8] sm:$0x3f]  ;;  %2616 = vmatmul.f32.vlgmr.msra.gmra.mxu3 %v2583_v24  ;;  %2718 = vmatpush.msra.mxu0 %v2709_v31  ;;  %v2820_v24 = vld [vmem:[%s4893_s13 + $0x18] sm:$0xff] }
 0x370   : > { %2654 = vmatmul.f32.vlgmr.msrb.gmra.mxu1 %v2621_v25  ;;  %v2659_v13 = vld [vmem:[#allocation7 + $0x9] sm:$0x3f]  ;;  %2838 = vmatpush.msra.mxu2 %v2824_v7  ;;  %v2819_v25 = vld [vmem:[%s4893_s13 + $0x10] sm:$0xff] }
 0x371   : > { %2719 = vmatpush.msra.mxu0 %v2708_v45  ;;  %2798 = vmatpush.msra.mxu1 %v2764_v56  ;;  %v2818_v45 = vld [vmem:[%s4893_s13 + $0x8] sm:$0xff] }
 0x372   : > { %2839 = vmatpush.msra.mxu2 %v2823_v0 }
 0x373   : > { %2720 = vmatpush.msra.mxu0 %v2707_v26  ;;  %2799 = vmatpush.msra.mxu1 %v2763_v57  ;;  %v2854_v26 = vld [vmem:[%s4895_s15 + $0x18] sm:$0xff] }
 0x374   : > { %2840 = vmatpush.msra.mxu2 %v2822_v6  ;;  %2872 = vmatpush.msra.mxu3 %v2854_v26 }
 0x375   : > { %2721 = vmatpush.msra.mxu0 %v2706_v1  ;;  %2692 = vmatmul.f32.vlgmr.msrb.gmra.mxu2 %v2659_v13  ;;  %v2853_v1 = vld [vmem:[%s4895_s15 + $0x10] sm:$0xff]  ;;  %v2817_v13 = vld [vmem:[%s4893_s13] sm:$0xff] }
 0x376   : > { %2800 = vmatpush.msra.mxu1 %v2762_v46  ;;  %2841 = vmatpush.msra.mxu2 %v2821_v8 }
 0x377   : > { %2722 = vmatpush.msra.mxu0 %v2705_v10  ;;  %2983 = vmatmul.msk.f32.vlgmr.msrb.gmra.mxu3 %vm2770_vm2, %v2752_v22 }
 0x378   : > { %2801 = vmatpush.msra.mxu1 %v2761_v63  ;;  %2842 = vmatpush.msra.mxu2 %v2820_v24 }
 0x379   : > { %2723 = vmatpush.msra.mxu0 %v2704_v34  ;;  %2873 = vmatpush.msra.mxu3 %v2853_v1 }
 0x37a   : > { %2802 = vmatpush.msra.mxu1 %v2760_v37  ;;  %2843 = vmatpush.msra.mxu2 %v2819_v25 }
 0x37b   : > { %2724 = vmatpush.msra.mxu0 %v2703_v49  ;;  %v2814_v49 = vld [vmem:[%s4892_s12] sm:$0x1] }
 0x37c   : > { %2803 = vmatpush.msra.mxu1 %v2759_v42  ;;  %2844 = vmatpush.msra.mxu2 %v2818_v45 }
 0x37d   : > { %2725 = vmatpush.msra.mxu0 %v2702_v27 }
 0x37e   : > { %2804 = vmatpush.msra.mxu1 %v2758_v61  ;;  %2845 = vmatpush.msra.mxu2 %v2817_v13 }
 0x37f   : > { %2726 = vmatpush.msra.mxu0 %v2701_v9 }
 0x380   : > { %2805 = vmatpush.msra.mxu1 %v2757_v60 }
 0x381   : > { %2727 = vmatpush.msra.mxu0 %v2700_v59 }
 0x382   : > { %2806 = vmatpush.msra.mxu1 %v2756_v50 }
 0x383   : > { %2728 = vmatpush.msra.mxu0 %v2699_v29  ;;  %v2852_v29 = vld [vmem:[%s4895_s15 + $0x8] sm:$0xff] }
 0x384   : > { %2807 = vmatpush.msra.mxu1 %v2755_v5  ;;  %2874 = vmatpush.msra.mxu3 %v2852_v29 }
 0x385   : > { %2729 = vmatpush.msra.mxu0 %v2698_v30  ;;  %v2851_v30 = vld [vmem:[%s4895_s15] sm:$0xff] }
 0x386   : > { %2730 = vmatmul.f32.vlgmr.msra.gmra.mxu0 %v2697_v35  ;;  %2808 = vmatpush.msra.mxu1 %v2754_v39  ;;  %v2825_v35 = vld [vmem:[%s4894_s14] sm:$0x1] }
 0x387   : > { %2875 = vmatpush.msra.mxu3 %v2851_v30 }
 0x388   : > { %2809 = vmatpush.msra.mxu1 %v2753_v2 }
 0x3e2   : > { %v2446_v38 = vpop.f32.mrf.mxu0 }
 0x3e4   : > { %v2503_v28 = vpop.f32.mrf.mxu1 }
 0x3e9   : > { %v2466_v36 = vpop.f32.mrf.mxu3 }
 0x3ea   : > { %v2467_v40 = vadd.f32 %v2466_v36, %v2446_v38 }
 0x3eb   : > { %v2579_v58 = vpop.f32.mrf.mxu0 }
 0x3ec   : > { %v2506_v23 = vadd.f32 %v2503_v28, %v2467_v40  ;;  %v2855_v28 = vld [vmem:[#allocation11] sm:$0x1] }
 0x3ed   : > { %v2655_v16 = vpop.f32.mrf.mxu1 }
 0x3f0   : > { %v2541_v55 = vpop.f32.mrf.mxu2 }
 0x3f1   : > { %v2544_v19 = vadd.f32 %v2541_v55, %v2506_v23 }
 0x3f2   : > { %v2617_v18 = vpop.f32.mrf.mxu3 }
 0x3f3   : > { %v2582_v32 = vadd.f32 %v2579_v58, %v2544_v19 }
 0x3f5   : > { %v2620_v20 = vadd.f32 %v2617_v18, %v2582_v32 }
 0x3f7   : > { %v2658_v62 = vadd.f32 %v2655_v16, %v2620_v20 }
 0x3f8   : > { %v2693_v51 = vpop.f32.mrf.mxu2 }
 0x3f9   : > { %v2696_v52 = vadd.f32 %v2693_v51, %v2658_v62 }
 0x3fa   : > { %v2791_v10 = vpop.f32.mrf.mxu3 }
 0x403   : > { %v2731_v53 = vpop.f32.mrf.mxu0 }
 0x404   : > { %v2734_v43 = vadd.f32 %v2731_v53, %v2696_v52 }
 0x406   : > { %v2739_v17 = vadd.f32 %v3002_v54, %v2734_v43 }
 0x408   : > { %v2740_v4 = vmax.f32 %v2739_v17, 0.0 }
 0x40a   : > { %2741 = vst [vmem:[#allocation8] sm:$0x3f] %v2740_v4 }
 0x411   : > { %v2742_v3 = vld [vmem:[#allocation8] ss:$2 sm:$0xf]  ;;  %v2744_v12 = vld [vmem:[#allocation8 + $0x1] ss:$2 sm:$0xf] }
 0x412   : > { %v2745_v14 = vmax.f32 %v2742_v3, %v2744_v12 }
 0x414   : > { %2746 = vst [vmem:[#allocation9] sm:$0xf] %v2745_v14 }
 0x41b   : > { %v2747_v15 = vld [vmem:[#allocation9] sm:$0x1]  ;;  %v2748_v31 = vld [vmem:[#allocation9 + $0x2] sm:$0x1] }
 0x41c   : > { %v2749_v11 = vmax.f32 %v2747_v15, %v2748_v31 }
 0x41e   : > { %2750 = vst [vmem:[#allocation10] sm:$0x1] %v2749_v11 }
 0x425   : > { %v2751_v21 = vld [vmem:[#allocation10] sm:$0x1] }
 0x426   : > { %2810 = vmatmul.f32.vlgmr.msra.gmra.mxu1 %v2751_v21 }
 0x4a3   : > { %v2811_v34 = vpop.f32.mrf.mxu1 }
 0x4a4   : > { %v2812_v27 = vadd.f32 %v2811_v34, %v2791_v10 }
 0x4a6   : > { %v2815_v9 = vadd.f32 %v2814_v49, %v2812_v27 }
 0x4a8   : > { %v2816_v59 = vmax.f32 %v2815_v9, 0.0 }
 0x4aa   : > { %2984 = vmatmul.msk.f32.vlgmr.msra.gmra.mxu2 %vm2826_vm3, %v2816_v59 }
 0x52d   : > { %v2847_v36 = vpop.f32.mrf.mxu2 }
 0x52e   : > { %v2848_v38 = vadd.f32 %v2847_v36, %v2825_v35 }
 0x530   : > { %v2850_v40 = vmax.f32 %v2848_v38, 0.0 }
 0x532   : > { %2985 = vmatmul.msk.f32.vlgmr.msra.gmra.mxu3 %vm2856_vm4, %v2850_v40 }
 0x5b5   : > { %v2877_v23 = vpop.f32.mrf.mxu3 }
 0x5b6   : > { %v2878_v55 = vadd.f32 %v2877_v23, %v2855_v28 }
 0x5b8   : > { %2881 = vst.msk [vmem:[%s562_s20] sm:$0x1] %vm2880_vm5, %v2878_v55 }
 0x5b9 PF: > { %s29_s26 = sadd.s32 1, %s3009_s26  }
 0x5ba   : > { %p26_p5 = scmp.ge.s32.totalorder %s29_s26, 4  }
 0x5bc   :  { %28 = sbr.rel (!%p26_p5) target bundleno = 3 (0x3), region = 169 }

</bundles_post_ra>
